<compile_context>
chip_gen: v7x
topology: tpu7x:2x2x1
jax: 0.10.0
libtpu: 0.0.40
codegen_flags: <defaults>
</compile_context>

<pallas_src>
import functools

import jax
import jax.numpy as jnp
import numpy as np
from jax.experimental import pallas as pl
from jax.experimental.pallas import tpu as pltpu

LRELU_SLOPE = 0.2
BN_EPS = 1e-5
MXU_DTYPE = jnp.bfloat16            # MXU operand / activation storage dtype
TILE_BYTES_BUDGET = 28 * 1024 * 1024  # double-buffered block working set target
VMEM_LIMIT = 40 * 1024 * 1024       # scoped VMEM handed to Mosaic (v7x: 64 MiB phys)


# --------------------------------------------------------------------------
# Tile selection
# --------------------------------------------------------------------------
def _largest_divisor_tile(dim, target, multiple):
    """Largest divisor of `dim` that is <= target and a multiple of `multiple`
    (the full dim is always legal, even when < multiple)."""
    if dim <= target:
        return dim
    for t in range(min(target, dim), 0, -1):
        if dim % t == 0 and t % multiple == 0:
            return t
    return dim


def _choose_tiles(M, N, K, *, out_itemsize=2, budget=TILE_BYTES_BUDGET):
    """Per-layer (tm, tn, tk) under a VMEM budget (review items #3/#4)."""
    tk = _largest_divisor_tile(K, 2048, 128)     # lane dim of x-block
    tn = _largest_divisor_tile(N, 1024, 128)     # lane dim of w/out-blocks
    # Small-K layers (conv1: K=48) do little MXU work per row -> taller row
    # tiles to amortize the ~0.35us per-grid-step overhead.
    tm_target = 4096 if K <= 256 else (2048 if K <= 4096 else 1024)
    tm = _largest_divisor_tile(M, tm_target, 8)  # sublane dim

    # v7x has two TensorCores: keep at least two independent output tiles when
    # the problem allows it (review #4).
    if (M // tm) * (N // tn) < 2:
        if tn % 256 == 0:
            tn //= 2
        elif tm % 16 == 0 and tm > 8:
            tm //= 2

    def footprint(tm_, tn_, tk_):
        return (2 * (tm_ * tk_ + tk_ * tn_) * 2      # double-buffered bf16 inputs
                + 2 * tm_ * tn_ * out_itemsize       # double-buffered output tile
                + 2 * 3 * tn_ * 4                    # bias + stats tiles
                + 2 * tm_ * tn_ * 4)                 # f32 acc scratch + epilogue temp

    # Shrink (reduction tile first: extra grid steps but no extra HBM traffic)
    # until the working set fits the budget.
    while footprint(tm, tn, tk) > budget:
        if tk % 256 == 0 and tk > 512:
            tk //= 2
        elif tm % 16 == 0 and tm > 256:
            tm //= 2
        elif tn % 256 == 0 and tn > 128:
            tn //= 2
        else:
            break
    return tm, tn, tk


# --------------------------------------------------------------------------
# Pallas kernel: tiled matmul with fused bias / leaky_relu / BN-stat epilogue
# --------------------------------------------------------------------------
def _conv_matmul_kernel(x_ref, w_ref, b_ref, o_ref, s_ref, acc_ref, *, slope):
    """One (i, j) output tile, accumulated over the k (reduction) grid axis."""
    k = pl.program_id(2)

    partial = jnp.dot(x_ref[...], w_ref[...], preferred_element_type=jnp.float32)

    @pl.when(k == 0)
    def _():                      # first step: direct write (no zero + add)
        acc_ref[...] = partial

    @pl.when(k > 0)
    def _():
        acc_ref[...] += partial

    @pl.when(k == pl.num_programs(2) - 1)
    def _():
        y = acc_ref[...] + b_ref[...]
        if slope is not None:                        # static python branch
            y = jnp.where(y >= 0, y, slope * y)
        o_ref[...] = y.astype(o_ref.dtype)
        # per-tile per-column BatchNorm statistics, stored row-by-row
        s_ref[0, 0:1, :] = jnp.sum(y, axis=0, keepdims=True)
        s_ref[0, 1:2, :] = jnp.sum(y * y, axis=0, keepdims=True)


def matmul_bias_stats(x, w, b, *, slope=None, out_dtype=MXU_DTYPE):
    """y = act(x @ w + b) plus per-column sum / sum-of-squares of y.

    Returns (y, col_sum, col_sumsq).  Rows are zero-padded to a multiple of 8
    if needed; the padded rows' bias-only contribution is removed from the
    returned statistics and the padded rows are sliced off y.
    """
    M, K = x.shape
    K2, N = w.shape
    assert K == K2, (K, K2)

    pad_m = (-M) % 8
    if pad_m:
        x = jnp.pad(x, ((0, pad_m), (0, 0)))
    Mp = M + pad_m

    tm, tn, tk = _choose_tiles(Mp, N, K)
    gm, gn, gk = Mp // tm, N // tn, K // tk

    y, stats = pl.pallas_call(
        functools.partial(_conv_matmul_kernel, slope=slope),
        out_shape=(
            jax.ShapeDtypeStruct((Mp, N), out_dtype),
            jax.ShapeDtypeStruct((gm, 2, N), jnp.float32),
        ),
        grid=(gm, gn, gk),
        in_specs=[
            pl.BlockSpec((tm, tk), lambda i, j, k: (i, k)),
            pl.BlockSpec((tk, tn), lambda i, j, k: (k, j)),
            pl.BlockSpec((1, tn), lambda i, j, k: (0, j)),
        ],
        out_specs=(
            pl.BlockSpec((tm, tn), lambda i, j, k: (i, j)),
            pl.BlockSpec((1, 2, tn), lambda i, j, k: (i, 0, j)),
        ),
        scratch_shapes=[pltpu.VMEM((tm, tn), jnp.float32)],
        compiler_params=pltpu.CompilerParams(
            dimension_semantics=("parallel", "parallel", "arbitrary"),
            vmem_limit_bytes=VMEM_LIMIT),
    )(x.astype(MXU_DTYPE), w.astype(MXU_DTYPE),
      b.reshape(1, N).astype(jnp.float32))

    col_sum = jnp.sum(stats[:, 0, :], axis=0)
    col_sumsq = jnp.sum(stats[:, 1, :], axis=0)
    if pad_m:
        bb = b.astype(jnp.float32)
        pad_row = jnp.where(bb >= 0, bb, slope * bb) if slope is not None else bb
        col_sum = col_sum - pad_m * pad_row
        col_sumsq = col_sumsq - pad_m * pad_row * pad_row
        y = y[:M]
    return y, col_sum, col_sumsq


# --------------------------------------------------------------------------
# Glue: im2col (pure data movement, fused by XLA with BN+lrelu of the
# previous layer) + per-layer driver
# --------------------------------------------------------------------------
def im2col(x_nhwc, kh, kw, stride, pad):
    N, H, W, C = x_nhwc.shape
    xp = jnp.pad(x_nhwc, ((0, 0), (pad, pad), (pad, pad), (0, 0)))
    Ho = (H + 2 * pad - kh) // stride + 1
    Wo = (W + 2 * pad - kw) // stride + 1
    cols = []
    for i in range(kh):
        for j in range(kw):
            patch = jax.lax.slice(
                xp,
                (0, i, j, 0),
                (N, i + (Ho - 1) * stride + 1, j + (Wo - 1) * stride + 1, C),
                (1, stride, stride, 1),
            )
            cols.append(patch)  # (N, Ho, Wo, C), patch order (kh, kw, cin)
    X = jnp.concatenate(cols, axis=-1)
    return X.reshape(N * Ho * Wo, kh * kw * C), (N, Ho, Wo)


def conv2d_pallas(x_nhwc, w_oihw, b, stride, pad, *, slope=None):
    C_out, C_in, KH, KW = w_oihw.shape
    X, (N, Ho, Wo) = im2col(x_nhwc.astype(MXU_DTYPE), KH, KW, stride, pad)
    # (KH, KW, Cin, Cout) flattened to match the (kh, kw, cin) patch ordering.
    W_mat = jnp.transpose(w_oihw, (2, 3, 1, 0)).reshape(KH * KW * C_in, C_out)
    y, s0, s1 = matmul_bias_stats(X, W_mat, b, slope=slope)
    return y, s0, s1, (N, Ho, Wo)


def discriminator_forward(params, x_nchw):
    x = jnp.transpose(x_nchw, (0, 2, 3, 1)).astype(MXU_DTYPE)  # -> NHWC bf16
    N, H, W, _ = x.shape
    assert H == 64 and W == 64, "discriminator_W needs 64x64 input (conv5 is 4x4 VALID)"

    # conv1 + leaky_relu (fused in the matmul epilogue); stats unused here.
    y, _, _, (N, Ho, Wo) = conv2d_pallas(x, params["w1"], params["b1"], 2, 1,
                                         slope=LRELU_SLOPE)
    x = y.reshape(N, Ho, Wo, -1)

    # conv{2,3,4}: Pallas matmul (BN stats fused into the epilogue), then
    # BN + leaky_relu in plain jnp so XLA fuses them into the next im2col
    # (no standalone normalization pass over HBM).
    for i in (2, 3, 4):
        y, s0, s1, (N, Ho, Wo) = conv2d_pallas(x, params[f"w{i}"],
                                               params[f"b{i}"], 2, 1, slope=None)
        M = y.shape[0]
        mean = s0 / M
        # biased variance (PyTorch BN training norm); clamp against f32
        # cancellation in E[x^2] - mean^2.
        var = jnp.maximum(s1 / M - mean * mean, 0.0)
        inv = jax.lax.rsqrt(var + BN_EPS)
        scale = params[f"g{i}"] * inv
        shift = params[f"beta{i}"] - mean * scale
        z = y.astype(jnp.float32) * scale + shift
        z = jnp.where(z >= 0, z, LRELU_SLOPE * z)
        x = z.astype(MXU_DTYPE).reshape(N, Ho, Wo, -1)

    # conv5: 4x4 VALID, stride 1 over a 4x4 map -> one scalar per image.
    # M=batch, N=1 is far below Pallas launch overhead -> plain XLA dot.
    C_out, C_in, KH, KW = params["w5"].shape
    X5 = x.reshape(N, KH * KW * C_in).astype(jnp.float32)     # (h, w, c) order
    W5 = jnp.transpose(params["w5"], (2, 3, 1, 0)).reshape(KH * KW * C_in, C_out)
    y5 = jnp.dot(X5, W5) + params["b5"].reshape(1, C_out)     # (batch, 1)
    return jnp.mean(y5, axis=0)                               # == x.mean(0).view(1)


# --------------------------------------------------------------------------
# Parameter init (deterministic, mirrors normal_init(mean=0, std=0.02))
# --------------------------------------------------------------------------
def init_params(key, d=8):
    shapes = [
        (d, 3, 4, 4),
        (2 * d, d, 4, 4),
        (4 * d, 2 * d, 4, 4),
        (8 * d, 4 * d, 4, 4),
        (1, 8 * d, 4, 4),
    ]
    ks = jax.random.split(key, len(shapes))
    p = {}
    for i, (k, s) in enumerate(zip(ks, shapes), start=1):
        p[f"w{i}"] = 0.02 * jax.random.normal(k, s, dtype=jnp.float32)
        p[f"b{i}"] = jnp.zeros((s[0],), jnp.float32)
    for i, c in zip((2, 3, 4), (2 * d, 4 * d, 8 * d)):
        p[f"g{i}"] = jnp.ones((c,), jnp.float32)      # BatchNorm2d weight
        p[f"beta{i}"] = jnp.zeros((c,), jnp.float32)  # BatchNorm2d bias
    return p


# --------------------------------------------------------------------------
# Pure-JAX f32 reference (correctness check)
# --------------------------------------------------------------------------
def reference_forward(params, x_nchw):
    def conv(x, w, b, stride, pad):
        y = jax.lax.conv_general_dilated(
            x, w, (stride, stride), ((pad, pad), (pad, pad)),
            dimension_numbers=("NCHW", "OIHW", "NCHW"))
        return y + b.reshape(1, -1, 1, 1)

    def bn(x, g, beta):
        mean = jnp.mean(x, axis=(0, 2, 3), keepdims=True)
        var = jnp.mean((x - mean) ** 2, axis=(0, 2, 3), keepdims=True)
        return (x - mean) / jnp.sqrt(var + BN_EPS) * g.reshape(1, -1, 1, 1) \
            + beta.reshape(1, -1, 1, 1)

    def lrelu(x):
        return jnp.where(x >= 0, x, LRELU_SLOPE * x)

    x = lrelu(conv(x_nchw, params["w1"], params["b1"], 2, 1))
    x = lrelu(bn(conv(x, params["w2"], params["b2"], 2, 1), params["g2"], params["beta2"]))
    x = lrelu(bn(conv(x, params["w3"], params["b3"], 2, 1), params["g3"], params["beta3"]))
    x = lrelu(bn(conv(x, params["w4"], params["b4"], 2, 1), params["g4"], params["beta4"]))
    x = conv(x, params["w5"], params["b5"], 1, 0)
    return jnp.mean(x, axis=0).reshape(1)


if __name__ == "__main__":
    key = jax.random.PRNGKey(0)
    k_param, k_x = jax.random.split(key)

    d = 8          # reduced width (module default is 128); structure identical
    batch = 2
    x = jax.random.normal(k_x, (batch, 3, 64, 64), dtype=jnp.float32)  # NCHW input

    params = init_params(k_param, d=d)

    fwd = jax.jit(discriminator_forward)
    out = fwd(params, x)
    out = jax.block_until_ready(out)
    assert out.shape == (1,), out.shape

    ref = jax.block_until_ready(reference_forward(params, x))
    np.testing.assert_allclose(np.asarray(out), np.asarray(ref), rtol=5e-2, atol=5e-2)

    print("KERNEL_OK")
</pallas_src>

<mosaic_0001>
module attributes {stable_mosaic.version = 11 : i64} {
  func.func @_conv_matmul_kernel(%arg0: i32, %arg1: i32, %arg2: i32, %arg3: memref<1024x48xbf16, #tpu.memory_space<vmem>>, %arg4: memref<48x8xbf16, #tpu.memory_space<vmem>>, %arg5: memref<1x8xf32, #tpu.memory_space<vmem>>, %arg6: memref<1024x8xbf16, #tpu.memory_space<vmem>>, %arg7: memref<1x2x8xf32, #tpu.memory_space<vmem>>, %arg8: memref<1024x8xf32, #tpu.memory_space<vmem>>) attributes {dimension_semantics = [#tpu.dimension_semantics<parallel>, #tpu.dimension_semantics<parallel>, #tpu.dimension_semantics<arbitrary>], iteration_bounds = array<i64: 2, 1, 1>, scalar_prefetch = 0 : i64, scratch_operands = 1 : i64, tpu.core_type = #tpu.core_type<tc>, window_params = [{transform_indices = @transform_0, window_bounds = array<i64: 1024, 48>}, {transform_indices = @transform_1, window_bounds = array<i64: 48, 8>}, {transform_indices = @transform_2, window_bounds = array<i64: 1, 8>}, {transform_indices = @transform_3, window_bounds = array<i64: 1024, 8>}, {transform_indices = @transform_4, window_bounds = array<i64: 1, 2, 8>}]} {
    %c0 = arith.constant 0 : index
    %c0_0 = arith.constant 0 : index
    %0 = vector.load %arg3[%c0, %c0_0] : memref<1024x48xbf16, #tpu.memory_space<vmem>>, vector<1024x48xbf16>
    %c0_1 = arith.constant 0 : index
    %c0_2 = arith.constant 0 : index
    %1 = vector.load %arg4[%c0_1, %c0_2] : memref<48x8xbf16, #tpu.memory_space<vmem>>, vector<48x8xbf16>
    %cst = arith.constant dense<0.000000e+00> : vector<1024x8xf32>
    %2 = tpu.matmul %0, %1, %cst {dimension_numbers = #tpu.dot_dimension_numbers<[1], [0], [0], [1], [0, 0, 1, 1], [], []>} : vector<1024x48xbf16>, vector<48x8xbf16>, vector<1024x8xf32> -> vector<1024x8xf32>
    %c0_i32 = arith.constant 0 : i32
    %3 = arith.cmpi eq, %arg2, %c0_i32 : i32
    %4 = arith.extui %3 : i1 to i32
    %c0_i32_3 = arith.constant 0 : i32
    %5 = arith.cmpi ne, %4, %c0_i32_3 : i32
    scf.if %5 {
      %c0_8 = arith.constant 0 : index
      %c0_9 = arith.constant 0 : index
      %12 = vector.load %arg8[%c0_8, %c0_9] : memref<1024x8xf32, #tpu.memory_space<vmem>>, vector<1024x8xf32>
      tpu.vector_store %arg8[%c0_8, %c0_9], %2 {strides = array<i32>} : memref<1024x8xf32, #tpu.memory_space<vmem>>, vector<1024x8xf32>,
    } else {
    }
    %c0_i32_4 = arith.constant 0 : i32
    %6 = arith.cmpi sgt, %arg2, %c0_i32_4 : i32
    %7 = arith.extui %6 : i1 to i32
    %c0_i32_5 = arith.constant 0 : i32
    %8 = arith.cmpi ne, %7, %c0_i32_5 : i32
    scf.if %8 {
      %c0_8 = arith.constant 0 : index
      %c0_9 = arith.constant 0 : index
      %12 = vector.load %arg8[%c0_8, %c0_9] : memref<1024x8xf32, #tpu.memory_space<vmem>>, vector<1024x8xf32>
      %13 = arith.addf %12, %2 : vector<1024x8xf32>
      %c0_10 = arith.constant 0 : index
      %c0_11 = arith.constant 0 : index
      %14 = vector.load %arg8[%c0_10, %c0_11] : memref<1024x8xf32, #tpu.memory_space<vmem>>, vector<1024x8xf32>
      tpu.vector_store %arg8[%c0_10, %c0_11], %13 {strides = array<i32>} : memref<1024x8xf32, #tpu.memory_space<vmem>>, vector<1024x8xf32>,
    } else {
    }
    %c0_i32_6 = arith.constant 0 : i32
    %9 = arith.cmpi eq, %arg2, %c0_i32_6 : i32
    %10 = arith.extui %9 : i1 to i32
    %c0_i32_7 = arith.constant 0 : i32
    %11 = arith.cmpi ne, %10, %c0_i32_7 : i32
    scf.if %11 {
      %c0_8 = arith.constant 0 : index
      %c0_9 = arith.constant 0 : index
      %12 = vector.load %arg8[%c0_8, %c0_9] : memref<1024x8xf32, #tpu.memory_space<vmem>>, vector<1024x8xf32>
      %c0_10 = arith.constant 0 : index
      %c0_11 = arith.constant 0 : index
      %13 = vector.load %arg5[%c0_10, %c0_11] : memref<1x8xf32, #tpu.memory_space<vmem>>, vector<1x8xf32>
      %14 = vector.broadcast %13 : vector<1x8xf32> to vector<1024x8xf32>
      %15 = arith.addf %12, %14 : vector<1024x8xf32>
      %cst_12 = arith.constant 0.000000e+00 : f32
      %16 = vector.broadcast %cst_12 : f32 to vector<1024x8xf32>
      %17 = arith.cmpf oge, %15, %16 : vector<1024x8xf32>
      %cst_13 = arith.constant 2.000000e-01 : f32
      %18 = vector.broadcast %cst_13 : f32 to vector<1024x8xf32>
      %19 = arith.mulf %18, %15 : vector<1024x8xf32>
      %20 = arith.select %17, %15, %19 : vector<1024x8xi1>, vector<1024x8xf32>
      %21 = arith.truncf %20 : vector<1024x8xf32> to vector<1024x8xbf16>
      %c0_14 = arith.constant 0 : index
      %c0_15 = arith.constant 0 : index
      %22 = vector.load %arg6[%c0_14, %c0_15] : memref<1024x8xbf16, #tpu.memory_space<vmem>>, vector<1024x8xbf16>
      tpu.vector_store %arg6[%c0_14, %c0_15], %21 {strides = array<i32>} : memref<1024x8xbf16, #tpu.memory_space<vmem>>, vector<1024x8xbf16>,
      %cst_16 = arith.constant dense<0.000000e+00> : vector<8xf32>
      %23 = vector.multi_reduction <add>, %20, %cst_16 [0] : vector<1024x8xf32> to vector<8xf32>
      %24 = vector.shape_cast %23 : vector<8xf32> to vector<1x8xf32>
      %c0_17 = arith.constant 0 : index
      %c0_18 = arith.constant 0 : index
      %c0_19 = arith.constant 0 : index
      %25 = vector.load %arg7[%c0_17, %c0_18, %c0_19] : memref<1x2x8xf32, #tpu.memory_space<vmem>>, vector<1x1x8xf32>
      %26 = vector.shape_cast %25 : vector<1x1x8xf32> to vector<1x8xf32>
      %27 = vector.shape_cast %24 : vector<1x8xf32> to vector<1x1x8xf32>
      tpu.vector_store %arg7[%c0_17, %c0_18, %c0_19], %27 {strides = array<i32>} : memref<1x2x8xf32, #tpu.memory_space<vmem>>, vector<1x1x8xf32>,
      %28 = arith.mulf %20, %20 : vector<1024x8xf32>
      %cst_20 = arith.constant dense<0.000000e+00> : vector<8xf32>
      %29 = vector.multi_reduction <add>, %28, %cst_20 [0] : vector<1024x8xf32> to vector<8xf32>
      %30 = vector.shape_cast %29 : vector<8xf32> to vector<1x8xf32>
      %c0_21 = arith.constant 0 : index
      %c1 = arith.constant 1 : index
      %c0_22 = arith.constant 0 : index
      %31 = vector.load %arg7[%c0_21, %c1, %c0_22] : memref<1x2x8xf32, #tpu.memory_space<vmem>>, vector<1x1x8xf32>
      %32 = vector.shape_cast %31 : vector<1x1x8xf32> to vector<1x8xf32>
      %33 = vector.shape_cast %30 : vector<1x8xf32> to vector<1x1x8xf32>
      tpu.vector_store %arg7[%c0_21, %c1, %c0_22], %33 {strides = array<i32>} : memref<1x2x8xf32, #tpu.memory_space<vmem>>, vector<1x1x8xf32>,
    } else {
    }
    return
  }
  func.func @transform_0(%arg0: i32, %arg1: i32, %arg2: i32) -> (i32, i32) {
    %c0_i32 = arith.constant 0 : i32
    return %arg0, %arg2 : i32, i32
  }
  func.func @transform_1(%arg0: i32, %arg1: i32, %arg2: i32) -> (i32, i32) {
    %c0_i32 = arith.constant 0 : i32
    return %arg2, %arg1 : i32, i32
  }
  func.func @transform_2(%arg0: i32, %arg1: i32, %arg2: i32) -> (i32, i32) {
    %c0_i32 = arith.constant 0 : i32
    %c0_i32_0 = arith.constant 0 : i32
    return %c0_i32, %arg1 : i32, i32
  }
  func.func @transform_3(%arg0: i32, %arg1: i32, %arg2: i32) -> (i32, i32) {
    %c0_i32 = arith.constant 0 : i32
    return %arg0, %arg1 : i32, i32
  }
  func.func @transform_4(%arg0: i32, %arg1: i32, %arg2: i32) -> (i32, i32, i32) {
    %c0_i32 = arith.constant 0 : i32
    %c0_i32_0 = arith.constant 0 : i32
    return %arg0, %c0_i32, %arg1 : i32, i32, i32
  }
}

module attributes {stable_mosaic.version = 11 : i64} {
  func.func @_conv_matmul_kernel(%arg0: i32, %arg1: i32, %arg2: i32, %arg3: memref<256x128xbf16, #tpu.memory_space<vmem>>, %arg4: memref<128x16xbf16, #tpu.memory_space<vmem>>, %arg5: memref<1x16xf32, #tpu.memory_space<vmem>>, %arg6: memref<256x16xbf16, #tpu.memory_space<vmem>>, %arg7: memref<1x2x16xf32, #tpu.memory_space<vmem>>, %arg8: memref<256x16xf32, #tpu.memory_space<vmem>>) attributes {dimension_semantics = [#tpu.dimension_semantics<parallel>, #tpu.dimension_semantics<parallel>, #tpu.dimension_semantics<arbitrary>], iteration_bounds = array<i64: 2, 1, 1>, scalar_prefetch = 0 : i64, scratch_operands = 1 : i64, tpu.core_type = #tpu.core_type<tc>, window_params = [{transform_indices = @transform_0, window_bounds = array<i64: 256, 128>}, {transform_indices = @transform_1, window_bounds = array<i64: 128, 16>}, {transform_indices = @transform_2, window_bounds = array<i64: 1, 16>}, {transform_indices = @transform_3, window_bounds = array<i64: 256, 16>}, {transform_indices = @transform_4, window_bounds = array<i64: 1, 2, 16>}]} {
    %c0 = arith.constant 0 : index
    %c0_0 = arith.constant 0 : index
    %0 = vector.load %arg3[%c0, %c0_0] : memref<256x128xbf16, #tpu.memory_space<vmem>>, vector<256x128xbf16>
    %c0_1 = arith.constant 0 : index
    %c0_2 = arith.constant 0 : index
    %1 = vector.load %arg4[%c0_1, %c0_2] : memref<128x16xbf16, #tpu.memory_space<vmem>>, vector<128x16xbf16>
    %cst = arith.constant dense<0.000000e+00> : vector<256x16xf32>
    %2 = tpu.matmul %0, %1, %cst {dimension_numbers = #tpu.dot_dimension_numbers<[1], [0], [0], [1], [0, 0, 1, 1], [], []>} : vector<256x128xbf16>, vector<128x16xbf16>, vector<256x16xf32> -> vector<256x16xf32>
    %c0_i32 = arith.constant 0 : i32
    %3 = arith.cmpi eq, %arg2, %c0_i32 : i32
    %4 = arith.extui %3 : i1 to i32
    %c0_i32_3 = arith.constant 0 : i32
    %5 = arith.cmpi ne, %4, %c0_i32_3 : i32
    scf.if %5 {
      %c0_8 = arith.constant 0 : index
      %c0_9 = arith.constant 0 : index
      %12 = vector.load %arg8[%c0_8, %c0_9] : memref<256x16xf32, #tpu.memory_space<vmem>>, vector<256x16xf32>
      tpu.vector_store %arg8[%c0_8, %c0_9], %2 {strides = array<i32>} : memref<256x16xf32, #tpu.memory_space<vmem>>, vector<256x16xf32>,
    } else {
    }
    %c0_i32_4 = arith.constant 0 : i32
    %6 = arith.cmpi sgt, %arg2, %c0_i32_4 : i32
    %7 = arith.extui %6 : i1 to i32
    %c0_i32_5 = arith.constant 0 : i32
    %8 = arith.cmpi ne, %7, %c0_i32_5 : i32
    scf.if %8 {
      %c0_8 = arith.constant 0 : index
      %c0_9 = arith.constant 0 : index
      %12 = vector.load %arg8[%c0_8, %c0_9] : memref<256x16xf32, #tpu.memory_space<vmem>>, vector<256x16xf32>
      %13 = arith.addf %12, %2 : vector<256x16xf32>
      %c0_10 = arith.constant 0 : index
      %c0_11 = arith.constant 0 : index
      %14 = vector.load %arg8[%c0_10, %c0_11] : memref<256x16xf32, #tpu.memory_space<vmem>>, vector<256x16xf32>
      tpu.vector_store %arg8[%c0_10, %c0_11], %13 {strides = array<i32>} : memref<256x16xf32, #tpu.memory_space<vmem>>, vector<256x16xf32>,
    } else {
    }
    %c0_i32_6 = arith.constant 0 : i32
    %9 = arith.cmpi eq, %arg2, %c0_i32_6 : i32
    %10 = arith.extui %9 : i1 to i32
    %c0_i32_7 = arith.constant 0 : i32
    %11 = arith.cmpi ne, %10, %c0_i32_7 : i32
    scf.if %11 {
      %c0_8 = arith.constant 0 : index
      %c0_9 = arith.constant 0 : index
      %12 = vector.load %arg8[%c0_8, %c0_9] : memref<256x16xf32, #tpu.memory_space<vmem>>, vector<256x16xf32>
      %c0_10 = arith.constant 0 : index
      %c0_11 = arith.constant 0 : index
      %13 = vector.load %arg5[%c0_10, %c0_11] : memref<1x16xf32, #tpu.memory_space<vmem>>, vector<1x16xf32>
      %14 = vector.broadcast %13 : vector<1x16xf32> to vector<256x16xf32>
      %15 = arith.addf %12, %14 : vector<256x16xf32>
      %16 = arith.truncf %15 : vector<256x16xf32> to vector<256x16xbf16>
      %c0_12 = arith.constant 0 : index
      %c0_13 = arith.constant 0 : index
      %17 = vector.load %arg6[%c0_12, %c0_13] : memref<256x16xbf16, #tpu.memory_space<vmem>>, vector<256x16xbf16>
      tpu.vector_store %arg6[%c0_12, %c0_13], %16 {strides = array<i32>} : memref<256x16xbf16, #tpu.memory_space<vmem>>, vector<256x16xbf16>,
      %cst_14 = arith.constant dense<0.000000e+00> : vector<16xf32>
      %18 = vector.multi_reduction <add>, %15, %cst_14 [0] : vector<256x16xf32> to vector<16xf32>
      %19 = vector.shape_cast %18 : vector<16xf32> to vector<1x16xf32>
      %c0_15 = arith.constant 0 : index
      %c0_16 = arith.constant 0 : index
      %c0_17 = arith.constant 0 : index
      %20 = vector.load %arg7[%c0_15, %c0_16, %c0_17] : memref<1x2x16xf32, #tpu.memory_space<vmem>>, vector<1x1x16xf32>
      %21 = vector.shape_cast %20 : vector<1x1x16xf32> to vector<1x16xf32>
      %22 = vector.shape_cast %19 : vector<1x16xf32> to vector<1x1x16xf32>
      tpu.vector_store %arg7[%c0_15, %c0_16, %c0_17], %22 {strides = array<i32>} : memref<1x2x16xf32, #tpu.memory_space<vmem>>, vector<1x1x16xf32>,
      %23 = arith.mulf %15, %15 : vector<256x16xf32>
      %cst_18 = arith.constant dense<0.000000e+00> : vector<16xf32>
      %24 = vector.multi_reduction <add>, %23, %cst_18 [0] : vector<256x16xf32> to vector<16xf32>
      %25 = vector.shape_cast %24 : vector<16xf32> to vector<1x16xf32>
      %c0_19 = arith.constant 0 : index
      %c1 = arith.constant 1 : index
      %c0_20 = arith.constant 0 : index
      %26 = vector.load %arg7[%c0_19, %c1, %c0_20] : memref<1x2x16xf32, #tpu.memory_space<vmem>>, vector<1x1x16xf32>
      %27 = vector.shape_cast %26 : vector<1x1x16xf32> to vector<1x16xf32>
      %28 = vector.shape_cast %25 : vector<1x16xf32> to vector<1x1x16xf32>
      tpu.vector_store %arg7[%c0_19, %c1, %c0_20], %28 {strides = array<i32>} : memref<1x2x16xf32, #tpu.memory_space<vmem>>, vector<1x1x16xf32>,
    } else {
    }
    return
  }
  func.func @transform_0(%arg0: i32, %arg1: i32, %arg2: i32) -> (i32, i32) {
    %c0_i32 = arith.constant 0 : i32
    return %arg0, %arg2 : i32, i32
  }
  func.func @transform_1(%arg0: i32, %arg1: i32, %arg2: i32) -> (i32, i32) {
    %c0_i32 = arith.constant 0 : i32
    return %arg2, %arg1 : i32, i32
  }
  func.func @transform_2(%arg0: i32, %arg1: i32, %arg2: i32) -> (i32, i32) {
    %c0_i32 = arith.constant 0 : i32
    %c0_i32_0 = arith.constant 0 : i32
    return %c0_i32, %arg1 : i32, i32
  }
  func.func @transform_3(%arg0: i32, %arg1: i32, %arg2: i32) -> (i32, i32) {
    %c0_i32 = arith.constant 0 : i32
    return %arg0, %arg1 : i32, i32
  }
  func.func @transform_4(%arg0: i32, %arg1: i32, %arg2: i32) -> (i32, i32, i32) {
    %c0_i32 = arith.constant 0 : i32
    %c0_i32_0 = arith.constant 0 : i32
    return %arg0, %c0_i32, %arg1 : i32, i32, i32
  }
}

module attributes {stable_mosaic.version = 11 : i64} {
  func.func @_conv_matmul_kernel(%arg0: i32, %arg1: i32, %arg2: i32, %arg3: memref<64x256xbf16, #tpu.memory_space<vmem>>, %arg4: memref<256x32xbf16, #tpu.memory_space<vmem>>, %arg5: memref<1x32xf32, #tpu.memory_space<vmem>>, %arg6: memref<64x32xbf16, #tpu.memory_space<vmem>>, %arg7: memref<1x2x32xf32, #tpu.memory_space<vmem>>, %arg8: memref<64x32xf32, #tpu.memory_space<vmem>>) attributes {dimension_semantics = [#tpu.dimension_semantics<parallel>, #tpu.dimension_semantics<parallel>, #tpu.dimension_semantics<arbitrary>], iteration_bounds = array<i64: 2, 1, 1>, scalar_prefetch = 0 : i64, scratch_operands = 1 : i64, tpu.core_type = #tpu.core_type<tc>, window_params = [{transform_indices = @transform_0, window_bounds = array<i64: 64, 256>}, {transform_indices = @transform_1, window_bounds = array<i64: 256, 32>}, {transform_indices = @transform_2, window_bounds = array<i64: 1, 32>}, {transform_indices = @transform_3, window_bounds = array<i64: 64, 32>}, {transform_indices = @transform_4, window_bounds = array<i64: 1, 2, 32>}]} {
    %c0 = arith.constant 0 : index
    %c0_0 = arith.constant 0 : index
    %0 = vector.load %arg3[%c0, %c0_0] : memref<64x256xbf16, #tpu.memory_space<vmem>>, vector<64x256xbf16>
    %c0_1 = arith.constant 0 : index
    %c0_2 = arith.constant 0 : index
    %1 = vector.load %arg4[%c0_1, %c0_2] : memref<256x32xbf16, #tpu.memory_space<vmem>>, vector<256x32xbf16>
    %cst = arith.constant dense<0.000000e+00> : vector<64x32xf32>
    %2 = tpu.matmul %0, %1, %cst {dimension_numbers = #tpu.dot_dimension_numbers<[1], [0], [0], [1], [0, 0, 1, 1], [], []>} : vector<64x256xbf16>, vector<256x32xbf16>, vector<64x32xf32> -> vector<64x32xf32>
    %c0_i32 = arith.constant 0 : i32
    %3 = arith.cmpi eq, %arg2, %c0_i32 : i32
    %4 = arith.extui %3 : i1 to i32
    %c0_i32_3 = arith.constant 0 : i32
    %5 = arith.cmpi ne, %4, %c0_i32_3 : i32
    scf.if %5 {
      %c0_8 = arith.constant 0 : index
      %c0_9 = arith.constant 0 : index
      %12 = vector.load %arg8[%c0_8, %c0_9] : memref<64x32xf32, #tpu.memory_space<vmem>>, vector<64x32xf32>
      tpu.vector_store %arg8[%c0_8, %c0_9], %2 {strides = array<i32>} : memref<64x32xf32, #tpu.memory_space<vmem>>, vector<64x32xf32>,
    } else {
    }
    %c0_i32_4 = arith.constant 0 : i32
    %6 = arith.cmpi sgt, %arg2, %c0_i32_4 : i32
    %7 = arith.extui %6 : i1 to i32
    %c0_i32_5 = arith.constant 0 : i32
    %8 = arith.cmpi ne, %7, %c0_i32_5 : i32
    scf.if %8 {
      %c0_8 = arith.constant 0 : index
      %c0_9 = arith.constant 0 : index
      %12 = vector.load %arg8[%c0_8, %c0_9] : memref<64x32xf32, #tpu.memory_space<vmem>>, vector<64x32xf32>
      %13 = arith.addf %12, %2 : vector<64x32xf32>
      %c0_10 = arith.constant 0 : index
      %c0_11 = arith.constant 0 : index
      %14 = vector.load %arg8[%c0_10, %c0_11] : memref<64x32xf32, #tpu.memory_space<vmem>>, vector<64x32xf32>
      tpu.vector_store %arg8[%c0_10, %c0_11], %13 {strides = array<i32>} : memref<64x32xf32, #tpu.memory_space<vmem>>, vector<64x32xf32>,
    } else {
    }
    %c0_i32_6 = arith.constant 0 : i32
    %9 = arith.cmpi eq, %arg2, %c0_i32_6 : i32
    %10 = arith.extui %9 : i1 to i32
    %c0_i32_7 = arith.constant 0 : i32
    %11 = arith.cmpi ne, %10, %c0_i32_7 : i32
    scf.if %11 {
      %c0_8 = arith.constant 0 : index
      %c0_9 = arith.constant 0 : index
      %12 = vector.load %arg8[%c0_8, %c0_9] : memref<64x32xf32, #tpu.memory_space<vmem>>, vector<64x32xf32>
      %c0_10 = arith.constant 0 : index
      %c0_11 = arith.constant 0 : index
      %13 = vector.load %arg5[%c0_10, %c0_11] : memref<1x32xf32, #tpu.memory_space<vmem>>, vector<1x32xf32>
      %14 = vector.broadcast %13 : vector<1x32xf32> to vector<64x32xf32>
      %15 = arith.addf %12, %14 : vector<64x32xf32>
      %16 = arith.truncf %15 : vector<64x32xf32> to vector<64x32xbf16>
      %c0_12 = arith.constant 0 : index
      %c0_13 = arith.constant 0 : index
      %17 = vector.load %arg6[%c0_12, %c0_13] : memref<64x32xbf16, #tpu.memory_space<vmem>>, vector<64x32xbf16>
      tpu.vector_store %arg6[%c0_12, %c0_13], %16 {strides = array<i32>} : memref<64x32xbf16, #tpu.memory_space<vmem>>, vector<64x32xbf16>,
      %cst_14 = arith.constant dense<0.000000e+00> : vector<32xf32>
      %18 = vector.multi_reduction <add>, %15, %cst_14 [0] : vector<64x32xf32> to vector<32xf32>
      %19 = vector.shape_cast %18 : vector<32xf32> to vector<1x32xf32>
      %c0_15 = arith.constant 0 : index
      %c0_16 = arith.constant 0 : index
      %c0_17 = arith.constant 0 : index
      %20 = vector.load %arg7[%c0_15, %c0_16, %c0_17] : memref<1x2x32xf32, #tpu.memory_space<vmem>>, vector<1x1x32xf32>
      %21 = vector.shape_cast %20 : vector<1x1x32xf32> to vector<1x32xf32>
      %22 = vector.shape_cast %19 : vector<1x32xf32> to vector<1x1x32xf32>
      tpu.vector_store %arg7[%c0_15, %c0_16, %c0_17], %22 {strides = array<i32>} : memref<1x2x32xf32, #tpu.memory_space<vmem>>, vector<1x1x32xf32>,
      %23 = arith.mulf %15, %15 : vector<64x32xf32>
      %cst_18 = arith.constant dense<0.000000e+00> : vector<32xf32>
      %24 = vector.multi_reduction <add>, %23, %cst_18 [0] : vector<64x32xf32> to vector<32xf32>
      %25 = vector.shape_cast %24 : vector<32xf32> to vector<1x32xf32>
      %c0_19 = arith.constant 0 : index
      %c1 = arith.constant 1 : index
      %c0_20 = arith.constant 0 : index
      %26 = vector.load %arg7[%c0_19, %c1, %c0_20] : memref<1x2x32xf32, #tpu.memory_space<vmem>>, vector<1x1x32xf32>
      %27 = vector.shape_cast %26 : vector<1x1x32xf32> to vector<1x32xf32>
      %28 = vector.shape_cast %25 : vector<1x32xf32> to vector<1x1x32xf32>
      tpu.vector_store %arg7[%c0_19, %c1, %c0_20], %28 {strides = array<i32>} : memref<1x2x32xf32, #tpu.memory_space<vmem>>, vector<1x1x32xf32>,
    } else {
    }
    return
  }
  func.func @transform_0(%arg0: i32, %arg1: i32, %arg2: i32) -> (i32, i32) {
    %c0_i32 = arith.constant 0 : i32
    return %arg0, %arg2 : i32, i32
  }
  func.func @transform_1(%arg0: i32, %arg1: i32, %arg2: i32) -> (i32, i32) {
    %c0_i32 = arith.constant 0 : i32
    return %arg2, %arg1 : i32, i32
  }
  func.func @transform_2(%arg0: i32, %arg1: i32, %arg2: i32) -> (i32, i32) {
    %c0_i32 = arith.constant 0 : i32
    %c0_i32_0 = arith.constant 0 : i32
    return %c0_i32, %arg1 : i32, i32
  }
  func.func @transform_3(%arg0: i32, %arg1: i32, %arg2: i32) -> (i32, i32) {
    %c0_i32 = arith.constant 0 : i32
    return %arg0, %arg1 : i32, i32
  }
  func.func @transform_4(%arg0: i32, %arg1: i32, %arg2: i32) -> (i32, i32, i32) {
    %c0_i32 = arith.constant 0 : i32
    %c0_i32_0 = arith.constant 0 : i32
    return %arg0, %c0_i32, %arg1 : i32, i32, i32
  }
}

module attributes {stable_mosaic.version = 11 : i64} {
  func.func @_conv_matmul_kernel(%arg0: i32, %arg1: i32, %arg2: i32, %arg3: memref<16x512xbf16, #tpu.memory_space<vmem>>, %arg4: memref<512x64xbf16, #tpu.memory_space<vmem>>, %arg5: memref<1x64xf32, #tpu.memory_space<vmem>>, %arg6: memref<16x64xbf16, #tpu.memory_space<vmem>>, %arg7: memref<1x2x64xf32, #tpu.memory_space<vmem>>, %arg8: memref<16x64xf32, #tpu.memory_space<vmem>>) attributes {dimension_semantics = [#tpu.dimension_semantics<parallel>, #tpu.dimension_semantics<parallel>, #tpu.dimension_semantics<arbitrary>], iteration_bounds = array<i64: 2, 1, 1>, scalar_prefetch = 0 : i64, scratch_operands = 1 : i64, tpu.core_type = #tpu.core_type<tc>, window_params = [{transform_indices = @transform_0, window_bounds = array<i64: 16, 512>}, {transform_indices = @transform_1, window_bounds = array<i64: 512, 64>}, {transform_indices = @transform_2, window_bounds = array<i64: 1, 64>}, {transform_indices = @transform_3, window_bounds = array<i64: 16, 64>}, {transform_indices = @transform_4, window_bounds = array<i64: 1, 2, 64>}]} {
    %c0 = arith.constant 0 : index
    %c0_0 = arith.constant 0 : index
    %0 = vector.load %arg3[%c0, %c0_0] : memref<16x512xbf16, #tpu.memory_space<vmem>>, vector<16x512xbf16>
    %c0_1 = arith.constant 0 : index
    %c0_2 = arith.constant 0 : index
    %1 = vector.load %arg4[%c0_1, %c0_2] : memref<512x64xbf16, #tpu.memory_space<vmem>>, vector<512x64xbf16>
    %cst = arith.constant dense<0.000000e+00> : vector<16x64xf32>
    %2 = tpu.matmul %0, %1, %cst {dimension_numbers = #tpu.dot_dimension_numbers<[1], [0], [0], [1], [0, 0, 1, 1], [], []>} : vector<16x512xbf16>, vector<512x64xbf16>, vector<16x64xf32> -> vector<16x64xf32>
    %c0_i32 = arith.constant 0 : i32
    %3 = arith.cmpi eq, %arg2, %c0_i32 : i32
    %4 = arith.extui %3 : i1 to i32
    %c0_i32_3 = arith.constant 0 : i32
    %5 = arith.cmpi ne, %4, %c0_i32_3 : i32
    scf.if %5 {
      %c0_8 = arith.constant 0 : index
      %c0_9 = arith.constant 0 : index
      %12 = vector.load %arg8[%c0_8, %c0_9] : memref<16x64xf32, #tpu.memory_space<vmem>>, vector<16x64xf32>
      tpu.vector_store %arg8[%c0_8, %c0_9], %2 {strides = array<i32>} : memref<16x64xf32, #tpu.memory_space<vmem>>, vector<16x64xf32>,
    } else {
    }
    %c0_i32_4 = arith.constant 0 : i32
    %6 = arith.cmpi sgt, %arg2, %c0_i32_4 : i32
    %7 = arith.extui %6 : i1 to i32
    %c0_i32_5 = arith.constant 0 : i32
    %8 = arith.cmpi ne, %7, %c0_i32_5 : i32
    scf.if %8 {
      %c0_8 = arith.constant 0 : index
      %c0_9 = arith.constant 0 : index
      %12 = vector.load %arg8[%c0_8, %c0_9] : memref<16x64xf32, #tpu.memory_space<vmem>>, vector<16x64xf32>
      %13 = arith.addf %12, %2 : vector<16x64xf32>
      %c0_10 = arith.constant 0 : index
      %c0_11 = arith.constant 0 : index
      %14 = vector.load %arg8[%c0_10, %c0_11] : memref<16x64xf32, #tpu.memory_space<vmem>>, vector<16x64xf32>
      tpu.vector_store %arg8[%c0_10, %c0_11], %13 {strides = array<i32>} : memref<16x64xf32, #tpu.memory_space<vmem>>, vector<16x64xf32>,
    } else {
    }
    %c0_i32_6 = arith.constant 0 : i32
    %9 = arith.cmpi eq, %arg2, %c0_i32_6 : i32
    %10 = arith.extui %9 : i1 to i32
    %c0_i32_7 = arith.constant 0 : i32
    %11 = arith.cmpi ne, %10, %c0_i32_7 : i32
    scf.if %11 {
      %c0_8 = arith.constant 0 : index
      %c0_9 = arith.constant 0 : index
      %12 = vector.load %arg8[%c0_8, %c0_9] : memref<16x64xf32, #tpu.memory_space<vmem>>, vector<16x64xf32>
      %c0_10 = arith.constant 0 : index
      %c0_11 = arith.constant 0 : index
      %13 = vector.load %arg5[%c0_10, %c0_11] : memref<1x64xf32, #tpu.memory_space<vmem>>, vector<1x64xf32>
      %14 = vector.broadcast %13 : vector<1x64xf32> to vector<16x64xf32>
      %15 = arith.addf %12, %14 : vector<16x64xf32>
      %16 = arith.truncf %15 : vector<16x64xf32> to vector<16x64xbf16>
      %c0_12 = arith.constant 0 : index
      %c0_13 = arith.constant 0 : index
      %17 = vector.load %arg6[%c0_12, %c0_13] : memref<16x64xbf16, #tpu.memory_space<vmem>>, vector<16x64xbf16>
      tpu.vector_store %arg6[%c0_12, %c0_13], %16 {strides = array<i32>} : memref<16x64xbf16, #tpu.memory_space<vmem>>, vector<16x64xbf16>,
      %cst_14 = arith.constant dense<0.000000e+00> : vector<64xf32>
      %18 = vector.multi_reduction <add>, %15, %cst_14 [0] : vector<16x64xf32> to vector<64xf32>
      %19 = vector.shape_cast %18 : vector<64xf32> to vector<1x64xf32>
      %c0_15 = arith.constant 0 : index
      %c0_16 = arith.constant 0 : index
      %c0_17 = arith.constant 0 : index
      %20 = vector.load %arg7[%c0_15, %c0_16, %c0_17] : memref<1x2x64xf32, #tpu.memory_space<vmem>>, vector<1x1x64xf32>
      %21 = vector.shape_cast %20 : vector<1x1x64xf32> to vector<1x64xf32>
      %22 = vector.shape_cast %19 : vector<1x64xf32> to vector<1x1x64xf32>
      tpu.vector_store %arg7[%c0_15, %c0_16, %c0_17], %22 {strides = array<i32>} : memref<1x2x64xf32, #tpu.memory_space<vmem>>, vector<1x1x64xf32>,
      %23 = arith.mulf %15, %15 : vector<16x64xf32>
      %cst_18 = arith.constant dense<0.000000e+00> : vector<64xf32>
      %24 = vector.multi_reduction <add>, %23, %cst_18 [0] : vector<16x64xf32> to vector<64xf32>
      %25 = vector.shape_cast %24 : vector<64xf32> to vector<1x64xf32>
      %c0_19 = arith.constant 0 : index
      %c1 = arith.constant 1 : index
      %c0_20 = arith.constant 0 : index
      %26 = vector.load %arg7[%c0_19, %c1, %c0_20] : memref<1x2x64xf32, #tpu.memory_space<vmem>>, vector<1x1x64xf32>
      %27 = vector.shape_cast %26 : vector<1x1x64xf32> to vector<1x64xf32>
      %28 = vector.shape_cast %25 : vector<1x64xf32> to vector<1x1x64xf32>
      tpu.vector_store %arg7[%c0_19, %c1, %c0_20], %28 {strides = array<i32>} : memref<1x2x64xf32, #tpu.memory_space<vmem>>, vector<1x1x64xf32>,
    } else {
    }
    return
  }
  func.func @transform_0(%arg0: i32, %arg1: i32, %arg2: i32) -> (i32, i32) {
    %c0_i32 = arith.constant 0 : i32
    return %arg0, %arg2 : i32, i32
  }
  func.func @transform_1(%arg0: i32, %arg1: i32, %arg2: i32) -> (i32, i32) {
    %c0_i32 = arith.constant 0 : i32
    return %arg2, %arg1 : i32, i32
  }
  func.func @transform_2(%arg0: i32, %arg1: i32, %arg2: i32) -> (i32, i32) {
    %c0_i32 = arith.constant 0 : i32
    %c0_i32_0 = arith.constant 0 : i32
    return %c0_i32, %arg1 : i32, i32
  }
  func.func @transform_3(%arg0: i32, %arg1: i32, %arg2: i32) -> (i32, i32) {
    %c0_i32 = arith.constant 0 : i32
    return %arg0, %arg1 : i32, i32
  }
  func.func @transform_4(%arg0: i32, %arg1: i32, %arg2: i32) -> (i32, i32, i32) {
    %c0_i32 = arith.constant 0 : i32
    %c0_i32_0 = arith.constant 0 : i32
    return %arg0, %c0_i32, %arg1 : i32, i32, i32
  }
}

</mosaic_0001>

<bundles_post_ra>
// kernel: discriminator_forward.4
= control target key start
LH: loop header
LB: loop body
LE: loop exit
PB: predicated region body
PF: predicated region fallthrough
CT: control target
= control target key end

     0   :  { %10 = vsyncpa [#allocation4], 0  ;;  %s6186_s0 = inlined_call_operand.vmem [shape: bf16[2048,48], index: 0, kind: input, shape index: {}]   ;;  %s6187_s1 = inlined_call_operand.vmem [shape: bf16[48,8], index: 1, kind: input, shape index: {}]   ;;  %s6188_s2 = inlined_call_operand.vmem [shape: f32[1,8], index: 2, kind: input, shape index: {}]   ;;  %s6189_s3 = inlined_call_operand.vmem [shape: bf16[2048,8], index: 3, kind: output, shape index: {0}]   ;;  %s6190_s4 = inlined_call_operand.hbm [shape: f32[2,2,8], index: 4, kind: output, shape index: {1}]  }
   0x1   :  { %12 = vsyncpa [#allocation4 + $0x1], 0  ;;  %s4982_s15 = smov 0   ;;  %s4984_s16 = smov 0  }
   0x2   :  { %s4986_s17 = smov 0   ;;  %s4988_s18 = smov 0  }
   0x3   :  { %s4990_s19 = smov 0   ;;  %s4992_s20 = smov 0  }
   0x4 LB: > { %s4140_s21 = sadd.s32 4294967295, %s4954_s20   ;;  %s4141_s22 = sadd.s32 4294967294, %s4954_s20   ;;  %s4954_s20 = sphi %s4992_s20, %s18_s20   ;;  %s4950_s19 = sphi %s4990_s19, %s6197_s19   ;;  %s4946_s18 = sphi %s4988_s18, %s6196_s18   ;;  %s4942_s17 = sphi %s4986_s17, %s6195_s17   ;;  %s4938_s16 = sphi %s4984_s16, %s6194_s16   ;;  %s4934_s15 = sphi %s4982_s15, %s6193_s15  }
   0x5   : > { %s37_s23 = sadd.s32 1, %s4950_s19  ;;  %s156_s24 = sadd.s32 1, %s4942_s17 }
   0x6   : > { %p39_p0 = scmp.ge.s32.totalorder %s37_s23, 2  ;;  %p166_p1 = scmp.ne.s32.totalorder %s4942_s17, %s4938_s16 }
   0x7   : > { %p167_p2 = scmp.eq.s32.totalorder %s4140_s21, 1  ;;  %p172_p3 = scmp.ne.s32.totalorder %s4938_s16, %s4934_s15 }
   0x8   : > { %s6199_s23 = smov (%p39_p0, %s37_s23), 0  ;;  %p173_p5 = scmp.eq.s32.totalorder %s4141_s22, 1 }
   0x9   : > { %p5022_p4 = por %p167_p2, %p166_p1  ;;  %s151_s26 = ssub.s32 %s4950_s19, %s6199_s23 }
   0xa   : > { %p4146_p6 = scmp.ge.s32.totalorder %s4954_s20, 1  ;;  %p154_p7 = scmp.eq.s32.totalorder %s151_s26, 0 }
   0xb   : > { %p5029_p8 = por %p173_p5, %p172_p3  ;;  %p221_p9 = scmp.lt.s32.totalorder %s4954_s20, 3 }
   0xc   : > { %s5035_s28 = scalar_select %p154_p7, %s4942_s17, %s156_s24  }
   0xd   : > { %p222_p10 = pnand %p4146_p6, %p221_p9 }
   0xe   : > { %v4806_v0 = vld [vmem:[%s6187_s1] sm:$0xff] (!%p222_p10)   ;;  %s4148_s5 = sshll.u32 (!%p222_p10), %s4946_s18, 7  ;;  %v4807_v1 = vld [vmem:[%s6187_s1 + $0x8] sm:$0xff] (!%p222_p10)   ;;  %v4808_v2 = vld [vmem:[%s6187_s1 + $0x10] sm:$0xff] (!%p222_p10)   ;;  %vm772_vm0 = vcmask (!%p222_p10), 392192   ;;  %vm1514_vm1 = vcmask (!%p222_p10), 64512  }
   0xf   : > { %225 = sbr.rel (%p222_p10) target bundleno = 609 (0x261), region = 32  ;;  %p270_p11 = scmp.lt.s32.totalorder (!%p222_p10), %s4148_s5, 255  ;;  %4611 = vmatprep.subr.bf16.mxu0 (!%p222_p10), %v4806_v0  ;;  %4745 = vmatprep.subr.bf16.mxu1 (!%p222_p10), %v4806_v0  ;;  %vm3194_vm3 = vcmask (!%p222_p10), 60416  }
  0x10   : > { %4612 = vmatpush3.bf16.msra.mxu0 (!%p222_p10), %v4806_v0  ;;  %4748 = vmatpush3.bf16.msra.mxu1 (!%p222_p10), %v4806_v0  ;;  %s266_s9 = sand.u32 (!%p222_p10), 1, %s4938_s16   ;;  %s4413_s12 = sshll.u32 (!%p222_p10), %s4946_s18, 5 }
  0x11   : > { %4613 = vmatprep.subr.bf16.mxu0 (!%p222_p10), %v4807_v1  ;;  %4746 = vmatprep.subr.bf16.mxu1 (!%p222_p10), %v4807_v1  ;;  %s6139_s22 = scalar_lea.hbm (!%p222_p10), %s6190_s4, %s4413_s12  ;;  %s3986_s24 = scalar_lea.sflag (!%p222_p10), [#allocation4], %s266_s9 }
  0x12   : > { %s4956_s18 = smov (!%p222_p10), [#allocation3]  }
  0x13   : > { %s4880_s29 = sshll.u32 (!%p222_p10), %s4956_s18, 4  ;;  %s4881_s29 = int_to_ptr.vmem [resolvable:$false] %s4880_s29 }
  0x14   : > { %4614 = vmatpush3.bf16.msra.mxu0 (!%p222_p10), %v4807_v1  ;;  %4749 = vmatpush3.bf16.msra.mxu1 (!%p222_p10), %v4807_v1  ;;  %s4882_s30 = scalar_lea.vmem (!%p222_p10), %s4881_s29, 64 }
  0x15   : > { %4615 = vmatprep.subr.bf16.mxu0 (!%p222_p10), %v4808_v2  ;;  %4747 = vmatprep.subr.bf16.mxu1 (!%p222_p10), %v4808_v2 }
  0x16   : > { %s6201_s5 = smov (!%p270_p11, %s4148_s5), 255 }
  0x17   : > { %s4149_s10 = sshll.u32 %s6201_s5, 2 }
  0x18   : > { %s5055_s13 = scalar_lea.vmem %s6186_s0, %s4149_s10  ;;  %4616 = vmatpush3.bf16.msra.mxu0 %v4808_v2  ;;  %4750 = vmatpush3.bf16.msra.mxu1 %v4808_v2  ;;  %s5206_s26 = scalar_lea.vmem %s6189_s3, %s4149_s10 }
  0x19   : > { %v4809_v3 = vld [vmem:[%s5055_s13] sm:$0xff]   ;;  %v4810_v4 = vld [vmem:[%s5055_s13 + $0x8] sm:$0xff]   ;;  %v4811_v5 = vld [vmem:[%s5055_s13 + $0x10] sm:$0xff]   ;;  %s4147_s10 = sshll.u32 %s266_s9, 1 }
  0x1a   : > { %4617 = vmatprep.mubr.msk.bf16.mxu0 %vm772_vm0, %v4809_v3  ;;  %v4812_v6 = vld [vmem:[%s5055_s13 + $0x18] sm:$0xff]   ;;  %v4813_v7 = vld [vmem:[%s5055_s13 + $0x20] sm:$0xff]   ;;  %v4814_v8 = vld [vmem:[%s5055_s13 + $0x28] sm:$0xff]   ;;  %s268_s11 = scalar_lea.vmem [#allocation3], %s4147_s10 }
  0x1b   : > { %4618 = vmatmul.mubr.msk.bf16.vlgmr.msra.gmra.mrb[0].mxu0 %vm772_vm0, %v4810_v4  ;;  %v4815_v9 = vld [vmem:[%s5055_s13 + $0x30] sm:$0xff]   ;;  %v4816_v10 = vld [vmem:[%s5055_s13 + $0x38] sm:$0xff]   ;;  %v4817_v11 = vld [vmem:[%s5055_s13 + $0x40] sm:$0xff]  }
  0x1c   : > { %4621 = vmatprep.mubr.msk.bf16.mxu0 %vm772_vm0, %v4811_v5  ;;  %v4841_v12 = vld [vmem:[%s5055_s13 + $0x100] sm:$0xff]   ;;  %v4842_v13 = vld [vmem:[%s5055_s13 + $0x108] sm:$0xff]   ;;  %v4843_v14 = vld [vmem:[%s5055_s13 + $0x110] sm:$0xff]  }
  0x1d   : > { %4681 = vmatprep.mubr.msk.bf16.mxu1 %vm772_vm0, %v4841_v12  ;;  %v4818_v15 = vld [vmem:[%s5055_s13 + $0x48] sm:$0xff]   ;;  %v4819_v16 = vld [vmem:[%s5055_s13 + $0x50] sm:$0xff]   ;;  %v4844_v17 = vld [vmem:[%s5055_s13 + $0x118] sm:$0xff]  }
  0x1e   : > { %4682 = vmatmul.mubr.msk.bf16.vlgmr.msra.gmra.mrb[0].mxu1 %vm772_vm0, %v4842_v13  ;;  %v4845_v18 = vld [vmem:[%s5055_s13 + $0x120] sm:$0xff]   ;;  %v4820_v19 = vld [vmem:[%s5055_s13 + $0x58] sm:$0xff]   ;;  %v4846_v21 = vld [vmem:[%s5055_s13 + $0x128] sm:$0xff]  }
  0x1f   : > { %4685 = vmatprep.mubr.msk.bf16.mxu1 %vm772_vm0, %v4843_v14  ;;  %v4821_v20 = vld [vmem:[%s5055_s13 + $0x60] sm:$0xff]   ;;  %v4847_v22 = vld [vmem:[%s5055_s13 + $0x130] sm:$0xff]   ;;  %v4822_v23 = vld [vmem:[%s5055_s13 + $0x68] sm:$0xff]  }
  0x20   : > { %v4823_v24 = vld [vmem:[%s5055_s13 + $0x70] sm:$0xff]   ;;  %v4848_v25 = vld [vmem:[%s5055_s13 + $0x138] sm:$0xff]   ;;  %v4849_v26 = vld [vmem:[%s5055_s13 + $0x140] sm:$0xff]  }
  0x21   : > { %v4824_v27 = vld [vmem:[%s5055_s13 + $0x78] sm:$0xff]   ;;  %v4825_v28 = vld [vmem:[%s5055_s13 + $0x80] sm:$0xff]   ;;  %v4850_v29 = vld [vmem:[%s5055_s13 + $0x148] sm:$0xff]  }
  0x22   : > { %v4851_v30 = vld [vmem:[%s5055_s13 + $0x150] sm:$0xff]   ;;  %v4826_v31 = vld [vmem:[%s5055_s13 + $0x88] sm:$0xff]   ;;  %v4852_v33 = vld [vmem:[%s5055_s13 + $0x158] sm:$0xff]  }
  0x23   : > { %4622 = vmatmul.mubr.msk.bf16.gmra.mrb[4].mxu0 %vm772_vm0, %v4812_v6  ;;  %v4827_v32 = vld [vmem:[%s5055_s13 + $0x90] sm:$0xff]   ;;  %v4853_v34 = vld [vmem:[%s5055_s13 + $0x160] sm:$0xff]   ;;  %v4828_v35 = vld [vmem:[%s5055_s13 + $0x98] sm:$0xff]  }
  0x24   : > { %4625 = vmatprep.mubr.msk.bf16.mxu0 %vm772_vm0, %v4813_v7  ;;  %v4829_v36 = vld [vmem:[%s5055_s13 + $0xa0] sm:$0xff]   ;;  %v4854_v37 = vld [vmem:[%s5055_s13 + $0x168] sm:$0xff]   ;;  %v4855_v38 = vld [vmem:[%s5055_s13 + $0x170] sm:$0xff]  }
  0x25   : > { %v4830_v39 = vld [vmem:[%s5055_s13 + $0xa8] sm:$0xff]   ;;  %v4831_v40 = vld [vmem:[%s5055_s13 + $0xb0] sm:$0xff]   ;;  %v4856_v41 = vld [vmem:[%s5055_s13 + $0x178] sm:$0xff]  }
  0x26   : > { %4686 = vmatmul.mubr.msk.bf16.gmra.mrb[4].mxu1 %vm772_vm0, %v4844_v17  ;;  %v4857_v42 = vld [vmem:[%s5055_s13 + $0x180] sm:$0xff]   ;;  %v4832_v43 = vld [vmem:[%s5055_s13 + $0xb8] sm:$0xff]   ;;  %v4858_v45 = vld [vmem:[%s5055_s13 + $0x188] sm:$0xff]  }
  0x27   : > { %4689 = vmatprep.mubr.msk.bf16.mxu1 %vm772_vm0, %v4845_v18  ;;  %v4833_v44 = vld [vmem:[%s5055_s13 + $0xc0] sm:$0xff]   ;;  %v4859_v46 = vld [vmem:[%s5055_s13 + $0x190] sm:$0xff]   ;;  %v4834_v47 = vld [vmem:[%s5055_s13 + $0xc8] sm:$0xff]  }
  0x28   : > { %v4835_v48 = vld [vmem:[%s5055_s13 + $0xd0] sm:$0xff]   ;;  %v4860_v49 = vld [vmem:[%s5055_s13 + $0x198] sm:$0xff]   ;;  %v4861_v50 = vld [vmem:[%s5055_s13 + $0x1a0] sm:$0xff]  }
  0x29   : > { %v4836_v51 = vld [vmem:[%s5055_s13 + $0xd8] sm:$0xff]   ;;  %v4837_v52 = vld [vmem:[%s5055_s13 + $0xe0] sm:$0xff]   ;;  %v4862_v53 = vld [vmem:[%s5055_s13 + $0x1a8] sm:$0xff]  }
  0x2a   : > { %v4863_v54 = vld [vmem:[%s5055_s13 + $0x1b0] sm:$0xff]   ;;  %v4838_v55 = vld [vmem:[%s5055_s13 + $0xe8] sm:$0xff]   ;;  %v4864_v57 = vld [vmem:[%s5055_s13 + $0x1b8] sm:$0xff]  }
  0x2b   : > { %4626 = vmatmul.mubr.msk.bf16.gmra.mrb[8].mxu0 %vm772_vm0, %v4814_v8  ;;  %v4839_v56 = vld [vmem:[%s5055_s13 + $0xf0] sm:$0xff]   ;;  %v4865_v58 = vld [vmem:[%s5055_s13 + $0x1c0] sm:$0xff]   ;;  %v4840_v59 = vld [vmem:[%s5055_s13 + $0xf8] sm:$0xff]  }
  0x2c   : > { %4629 = vmatprep.mubr.msk.bf16.mxu0 %vm772_vm0, %v4815_v9  ;;  %v4866_v60 = vld [vmem:[%s5055_s13 + $0x1c8] sm:$0xff]   ;;  %v4867_v61 = vld [vmem:[%s5055_s13 + $0x1d0] sm:$0xff]   ;;  %v4868_v62 = vld [vmem:[%s5055_s13 + $0x1d8] sm:$0xff]  }
  0x2d   : > { %v4869_v63 = vld [vmem:[%s5055_s13 + $0x1e0] sm:$0xff]   ;;  %v4870_v0 = vld [vmem:[%s5055_s13 + $0x1e8] sm:$0xff]   ;;  %v4871_v1 = vld [vmem:[%s5055_s13 + $0x1f0] sm:$0xff]  }
  0x2e   : > { %4690 = vmatmul.mubr.msk.bf16.gmra.mrb[8].mxu1 %vm772_vm0, %v4846_v21  ;;  %v4872_v2 = vld [vmem:[%s5055_s13 + $0x1f8] sm:$0xff]   ;;  %v5192_v7 = vld [vmem:[%s6188_s2] ss:$0 sm:$0xff]  ;;  %s4004_s13 = sshll.u32 %s268_s11, 4  ;;  %s6141_s13 = int_to_ptr.vmem [resolvable:$true] %s4004_s13 }
  0x2f   : > { %4693 = vmatprep.mubr.msk.bf16.mxu1 %vm772_vm0, %v4847_v22  ;;  %p4883_p1 = scmp.lt.s32.totalorder %s6141_s13, %s4881_s29 }
  0x33   : > { %4630 = vmatmul.mubr.msk.bf16.gmra.mrb[12].mxu0 %vm772_vm0, %v4816_v10 }
  0x34   : > { %4633 = vmatprep.mubr.msk.bf16.mxu0 %vm772_vm0, %v4817_v11 }
  0x36   : > { %4694 = vmatmul.mubr.msk.bf16.gmra.mrb[12].mxu1 %vm772_vm0, %v4848_v25 }
  0x37   : > { %4697 = vmatprep.mubr.msk.bf16.mxu1 %vm772_vm0, %v4849_v26 }
  0x3b   : > { %4634 = vmatmul.mubr.msk.bf16.gmra.mrb[16].mxu0 %vm772_vm0, %v4818_v15 }
  0x3c   : > { %4637 = vmatprep.mubr.msk.bf16.mxu0 %vm772_vm0, %v4819_v16 }
  0x3e   : > { %4698 = vmatmul.mubr.msk.bf16.gmra.mrb[16].mxu1 %vm772_vm0, %v4850_v29 }
  0x3f   : > { %4701 = vmatprep.mubr.msk.bf16.mxu1 %vm772_vm0, %v4851_v30 }
  0x43   : > { %4638 = vmatmul.mubr.msk.bf16.gmra.mrb[20].mxu0 %vm772_vm0, %v4820_v19 }
  0x44   : > { %4641 = vmatprep.mubr.msk.bf16.mxu0 %vm772_vm0, %v4821_v20 }
  0x46   : > { %4702 = vmatmul.mubr.msk.bf16.gmra.mrb[20].mxu1 %vm772_vm0, %v4852_v33 }
  0x47   : > { %4705 = vmatprep.mubr.msk.bf16.mxu1 %vm772_vm0, %v4853_v34 }
  0x4b   : > { %4642 = vmatmul.mubr.msk.bf16.gmra.mrb[24].mxu0 %vm772_vm0, %v4822_v23 }
  0x4c   : > { %4645 = vmatprep.mubr.msk.bf16.mxu0 %vm772_vm0, %v4823_v24 }
  0x4e   : > { %4706 = vmatmul.mubr.msk.bf16.gmra.mrb[24].mxu1 %vm772_vm0, %v4854_v37 }
  0x4f   : > { %4709 = vmatprep.mubr.msk.bf16.mxu1 %vm772_vm0, %v4855_v38 }
  0x53   : > { %4646 = vmatmul.mubr.msk.bf16.gmra.mrb[28].mxu0 %vm772_vm0, %v4824_v27 }
  0x54   : > { %4649 = vmatprep.mubr.msk.bf16.mxu0 %vm772_vm0, %v4825_v28 }
  0x56   : > { %4710 = vmatmul.mubr.msk.bf16.gmra.mrb[28].mxu1 %vm772_vm0, %v4856_v41 }
  0x57   : > { %4713 = vmatprep.mubr.msk.bf16.mxu1 %vm772_vm0, %v4857_v42 }
  0x5b   : > { %4650 = vmatmul.mubr.msk.bf16.gmra.mrb[32].mxu0 %vm772_vm0, %v4826_v31 }
  0x5c   : > { %4653 = vmatprep.mubr.msk.bf16.mxu0 %vm772_vm0, %v4827_v32 }
  0x5e   : > { %4714 = vmatmul.mubr.msk.bf16.gmra.mrb[32].mxu1 %vm772_vm0, %v4858_v45 }
  0x5f   : > { %4717 = vmatprep.mubr.msk.bf16.mxu1 %vm772_vm0, %v4859_v46 }
  0x63   : > { %4654 = vmatmul.mubr.msk.bf16.gmra.mrb[36].mxu0 %vm772_vm0, %v4828_v35 }
  0x64   : > { %4657 = vmatprep.mubr.msk.bf16.mxu0 %vm772_vm0, %v4829_v36 }
  0x66   : > { %4718 = vmatmul.mubr.msk.bf16.gmra.mrb[36].mxu1 %vm772_vm0, %v4860_v49 }
  0x67   : > { %4721 = vmatprep.mubr.msk.bf16.mxu1 %vm772_vm0, %v4861_v50 }
  0x6b   : > { %4658 = vmatmul.mubr.msk.bf16.gmra.mrb[40].mxu0 %vm772_vm0, %v4830_v39 }
  0x6c   : > { %4661 = vmatprep.mubr.msk.bf16.mxu0 %vm772_vm0, %v4831_v40 }
  0x6e   : > { %4722 = vmatmul.mubr.msk.bf16.gmra.mrb[40].mxu1 %vm772_vm0, %v4862_v53 }
  0x6f   : > { %4725 = vmatprep.mubr.msk.bf16.mxu1 %vm772_vm0, %v4863_v54 }
  0x73   : > { %4662 = vmatmul.mubr.msk.bf16.gmra.mrb[44].mxu0 %vm772_vm0, %v4832_v43 }
  0x74   : > { %4665 = vmatprep.mubr.msk.bf16.mxu0 %vm772_vm0, %v4833_v44 }
  0x76   : > { %4726 = vmatmul.mubr.msk.bf16.gmra.mrb[44].mxu1 %vm772_vm0, %v4864_v57 }
  0x77   : > { %4729 = vmatprep.mubr.msk.bf16.mxu1 %vm772_vm0, %v4865_v58 }
  0x7b   : > { %4666 = vmatmul.mubr.msk.bf16.gmra.mrb[48].mxu0 %vm772_vm0, %v4834_v47 }
  0x7c   : > { %4669 = vmatprep.mubr.msk.bf16.mxu0 %vm772_vm0, %v4835_v48 }
  0x7e   : > { %4730 = vmatmul.mubr.msk.bf16.gmra.mrb[48].mxu1 %vm772_vm0, %v4866_v60 }
  0x7f   : > { %4733 = vmatprep.mubr.msk.bf16.mxu1 %vm772_vm0, %v4867_v61 }
  0x83   : > { %4670 = vmatmul.mubr.msk.bf16.gmra.mrb[52].mxu0 %vm772_vm0, %v4836_v51 }
  0x84   : > { %4673 = vmatprep.mubr.msk.bf16.mxu0 %vm772_vm0, %v4837_v52 }
  0x86   : > { %4734 = vmatmul.mubr.msk.bf16.gmra.mrb[52].mxu1 %vm772_vm0, %v4868_v62 }
  0x87   : > { %4737 = vmatprep.mubr.msk.bf16.mxu1 %vm772_vm0, %v4869_v63 }
  0x8b   : > { %4674 = vmatmul.mubr.msk.bf16.gmra.mrb[56].mxu0 %vm772_vm0, %v4838_v55 }
  0x8c   : > { %4677 = vmatprep.mubr.msk.bf16.mxu0 %vm772_vm0, %v4839_v56 }
  0x8e   : > { %4738 = vmatmul.mubr.msk.bf16.gmra.mrb[56].mxu1 %vm772_vm0, %v4870_v0 }
  0x8f   : > { %4741 = vmatprep.mubr.msk.bf16.mxu1 %vm772_vm0, %v4871_v1 }
  0x93   : > { %4678 = vmatmul.mubr.msk.bf16.gmra.mrb[60].mxu0 %vm772_vm0, %v4840_v59 }
  0x96   : > { %4742 = vmatmul.mubr.msk.bf16.gmra.mrb[60].mxu1 %vm772_vm0, %v4872_v2 }
  0xee   : > { %v4619_v3 = vpop.f32.mrb[0].mxu0 }
  0xef   : > { %1517 = vst.msk [vmem:[#allocation2 + $0x10] sm:$0xff] %vm1514_vm1, %v4619_v3  ;;  %v999_v4 = vpop.f32.mrb[1].mxu0 }
  0xf0   : > { %1515 = vst.msk [vmem:[#allocation2] sm:$0xff] %vm1514_vm1, %v999_v4  ;;  %v4620_v5 = vpop.f32.mrb[2].mxu0 }
  0xf1   : > { %1518 = vst.msk [vmem:[#allocation2 + $0x18] sm:$0xff] %vm1514_vm1, %v4620_v5  ;;  %v1002_v6 = vpop.f32.mrb[3].mxu0 }
  0xf2   : > { %1516 = vst.msk [vmem:[#allocation2 + $0x8] sm:$0xff] %vm1514_vm1, %v1002_v6 }
  0xf6   : > { %v2037_v8 = vld [vmem:[#allocation2 + $0x10] sm:$0xff]  ;;  %v4623_v9 = vpop.f32.mrb[4].mxu0 }
  0xf7   : > { %v2172_v10 = vadd.f32 %v5192_v7, %v2037_v8  ;;  %v2035_v11 = vld [vmem:[#allocation2] sm:$0xff]  ;;  %1521 = vst.msk [vmem:[#allocation2 + $0x30] sm:$0xff] %vm1514_vm1, %v4623_v9  ;;  %v1015_v12 = vpop.f32.mrb[5].mxu0 }
  0xf8   : > { %v2170_v13 = vadd.f32 %v5192_v7, %v2035_v11  ;;  %v2038_v14 = vld [vmem:[#allocation2 + $0x18] sm:$0xff]  ;;  %1519 = vst.msk [vmem:[#allocation2 + $0x20] sm:$0xff] %vm1514_vm1, %v1015_v12  ;;  %v4624_v15 = vpop.f32.mrb[6].mxu0 }
  0xf9   : > { %vm2300_vm2 = vcmp.ge.f32.partialorder %v2172_v10, 0.0  ;;  %v2428_v16 = vmul.f32 0.2, %v2172_v10  ;;  %v2173_v17 = vadd.f32 %v5192_v7, %v2038_v14  ;;  %v2036_v18 = vld [vmem:[#allocation2 + $0x8] sm:$0xff]  ;;  %1522 = vst.msk [vmem:[#allocation2 + $0x38] sm:$0xff] %vm1514_vm1, %v4624_v15  ;;  %v1018_v19 = vpop.f32.mrb[7].mxu0 }
  0xfa   : > { %vm2298_vm4 = vcmp.ge.f32.partialorder %v2170_v13, 0.0  ;;  %v2426_v20 = vmul.f32 0.2, %v2170_v13  ;;  %1520 = vst.msk [vmem:[#allocation2 + $0x28] sm:$0xff] %vm1514_vm1, %v1018_v19  ;;  %v2171_v23 = vadd.f32 %v5192_v7, %v2036_v18 }
  0xfb   : > { %v2556_v21 = vsel %vm2300_vm2, %v2172_v10, %v2428_v16  ;;  %vm2301_vm5 = vcmp.ge.f32.partialorder %v2173_v17, 0.0  ;;  %v2429_v22 = vmul.f32 0.2, %v2173_v17 }
  0xfc   : > { %v4418_v24 = vpack.c.bf16 %v2556_v21, %v2556_v21  ;;  %v3589_v25 = vmul.f32 %v2556_v21, %v2556_v21  ;;  %v2554_v26 = vsel %vm2298_vm4, %v2170_v13, %v2426_v20  ;;  %v3327_v29 = vsel %vm1514_vm1, %v2556_v21, 0.0 }
  0xfd   : > { %v4416_v27 = vpack.c.bf16 %v2554_v26, %v2554_v26  ;;  %v2557_v28 = vsel %vm2301_vm5, %v2173_v17, %v2429_v22  ;;  %v3324_v33 = vsel %vm1514_vm1, %v2554_v26, 0.0  ;;  %vm2299_vm6 = vcmp.ge.f32.partialorder %v2171_v23, 0.0 }
  0xfe   : > { %3197 = vst.msk [vmem:[%s5206_s26 + $0x8] sm:$0xf] %vm3194_vm3, %v4418_v24  ;;  %v4419_v30 = vpack.c.bf16 %v2557_v28, %v2557_v28  ;;  %v2041_v31 = vld [vmem:[#allocation2 + $0x30] sm:$0xff]  ;;  %v4627_v32 = vpop.f32.mrb[8].mxu0  ;;  %v2427_v34 = vmul.f32 0.2, %v2171_v23  ;;  %v3587_v39 = vmul.f32 %v2554_v26, %v2554_v26  ;;  %v3590_v51 = vmul.f32 %v2557_v28, %v2557_v28 }
  0xff   : > { %3195 = vst.msk [vmem:[%s5206_s26] sm:$0xf] %vm3194_vm3, %v4416_v27  ;;  %v2176_v35 = vadd.f32 %v5192_v7, %v2041_v31  ;;  %v2039_v36 = vld [vmem:[#allocation2 + $0x20] sm:$0xff]  ;;  %v1031_v37 = vpop.f32.mrb[9].mxu0  ;;  %v3718_v38 = vsel %vm1514_vm1, %v3589_v25, 0.0  ;;  %v3329_v40 = vsel %vm1514_vm1, %v2557_v28, 0.0 }
 0x100   : > { %1525 = vst.msk [vmem:[#allocation2 + $0x50] sm:$0xff] %vm1514_vm1, %v4627_v32  ;;  %v2174_v41 = vadd.f32 %v5192_v7, %v2039_v36  ;;  %v2042_v42 = vld [vmem:[#allocation2 + $0x38] sm:$0xff]  ;;  %1523 = vst.msk [vmem:[#allocation2 + $0x40] sm:$0xff] %vm1514_vm1, %v1031_v37  ;;  %v4628_v43 = vpop.f32.mrb[10].mxu0  ;;  %v2555_v44 = vsel %vm2299_vm6, %v2171_v23, %v2427_v34  ;;  %v3715_v55 = vsel %vm1514_vm1, %v3587_v39, 0.0  ;;  %v3720_v12 = vsel %vm1514_vm1, %v3590_v51, 0.0 }
 0x101   : > { %3198 = vst.msk [vmem:[%s5206_s26 + $0xc] sm:$0xf] %vm3194_vm3, %v4419_v30  ;;  %vm2304_vm7 = vcmp.ge.f32.partialorder %v2176_v35, 0.0  ;;  %v2432_v45 = vmul.f32 0.2, %v2176_v35  ;;  %v2177_v46 = vadd.f32 %v5192_v7, %v2042_v42  ;;  %v1034_v47 = vpop.f32.mrb[11].mxu0  ;;  %v4417_v48 = vpack.c.bf16 %v2555_v44, %v2555_v44 }
 0x102   : > { %1526 = vst.msk [vmem:[#allocation2 + $0x58] sm:$0xff] %vm1514_vm1, %v4628_v43  ;;  %v3325_v49 = vsel %vm1514_vm1, %v2555_v44, 0.0  ;;  %v3588_v50 = vmul.f32 %v2555_v44, %v2555_v44  ;;  %vm2302_vm8 = vcmp.ge.f32.partialorder %v2174_v41, 0.0  ;;  %1524 = vst.msk [vmem:[#allocation2 + $0x48] sm:$0xff] %vm1514_vm1, %v1034_v47  ;;  %v2430_v54 = vmul.f32 0.2, %v2174_v41 }
 0x103   : > { %v3326_v52 = vadd.f32 %v3325_v49, %v3324_v33  ;;  %v2560_v53 = vsel %vm2304_vm7, %v2176_v35, %v2432_v45  ;;  %3196 = vst.msk [vmem:[%s5206_s26 + $0x4] sm:$0xf] %vm3194_vm3, %v4417_v48  ;;  %vm2305_vm9 = vcmp.ge.f32.partialorder %v2177_v46, 0.0  ;;  %v2040_v58 = vld [vmem:[#allocation2 + $0x28] sm:$0xff]  ;;  %v2433_v62 = vmul.f32 0.2, %v2177_v46 }
 0x104   : > { %v3716_v56 = vsel %vm1514_vm1, %v3588_v50, 0.0  ;;  %v4422_v57 = vpack.c.bf16 %v2560_v53, %v2560_v53  ;;  %v2558_v61 = vsel %vm2302_vm8, %v2174_v41, %v2430_v54  ;;  %v3593_v63 = vmul.f32 %v2560_v53, %v2560_v53  ;;  %v4683_v27 = vpop.f32.mrb[0].mxu1 }
 0x105   : > { %v3328_v59 = vadd.f32 %v3327_v29, %v3326_v52  ;;  %v3717_v60 = vadd.f32 %v3716_v56, %v3715_v55  ;;  %v4420_v0 = vpack.c.bf16 %v2558_v61, %v2558_v61  ;;  %v3331_v1 = vsel %vm1514_vm1, %v2558_v61, 0.0  ;;  %1581 = vst.msk [vmem:[#allocation2 + $0x210] sm:$0xff] %vm1514_vm1, %v4683_v27  ;;  %v1255_v32 = vpop.f32.mrb[1].mxu1 }
 0x106   : > { %3201 = vst.msk [vmem:[%s5206_s26 + $0x18] sm:$0xf] %vm3194_vm3, %v4422_v57  ;;  %v3591_v2 = vmul.f32 %v2558_v61, %v2558_v61  ;;  %v4631_v3 = vpop.f32.mrb[12].mxu0  ;;  %v2561_v6 = vsel %vm2305_vm9, %v2177_v46, %v2433_v62  ;;  %v2175_v8 = vadd.f32 %v5192_v7, %v2040_v58  ;;  %v3335_v13 = vsel %vm1514_vm1, %v2560_v53, 0.0  ;;  %v4684_v48 = vpop.f32.mrb[2].mxu1 }
 0x107   : > { %v3330_v4 = vadd.f32 %v3329_v40, %v3328_v59  ;;  %v3719_v5 = vadd.f32 %v3718_v38, %v3717_v60  ;;  %v2045_v9 = vld [vmem:[#allocation2 + $0x50] sm:$0xff]  ;;  %v2043_v10 = vld [vmem:[#allocation2 + $0x40] sm:$0xff]  ;;  %1529 = vst.msk [vmem:[#allocation2 + $0x70] sm:$0xff] %vm1514_vm1, %v4631_v3  ;;  %v1047_v11 = vpop.f32.mrb[13].mxu0  ;;  %v4423_v15 = vpack.c.bf16 %v2561_v6, %v2561_v6  ;;  %v3726_v23 = vsel %vm1514_vm1, %v3593_v63, 0.0  ;;  %1579 = vst.msk [vmem:[#allocation2 + $0x200] sm:$0xff] %vm1514_vm1, %v1255_v32 }
 0x108   : > { %3199 = vst.msk [vmem:[%s5206_s26 + $0x10] sm:$0xf] %vm3194_vm3, %v4420_v0  ;;  %v3722_v14 = vsel %vm1514_vm1, %v3591_v2, 0.0  ;;  %v4632_v17 = vpop.f32.mrb[14].mxu0  ;;  %vm2303_vm10 = vcmp.ge.f32.partialorder %v2175_v8, 0.0  ;;  %v2180_v24 = vadd.f32 %v5192_v7, %v2045_v9  ;;  %v2178_v25 = vadd.f32 %v5192_v7, %v2043_v10  ;;  %v1258_v63 = vpop.f32.mrb[3].mxu1 }
 0x109   : > { %v2046_v16 = vld [vmem:[#allocation2 + $0x58] sm:$0xff]  ;;  %1527 = vst.msk [vmem:[#allocation2 + $0x60] sm:$0xff] %vm1514_vm1, %v1047_v11  ;;  %v3721_v18 = vadd.f32 %v3720_v12, %v3719_v5  ;;  %v3332_v19 = vadd.f32 %v3331_v1, %v3330_v4  ;;  %v2431_v20 = vmul.f32 0.2, %v2175_v8  ;;  %v2044_v21 = vld [vmem:[#allocation2 + $0x48] sm:$0xff]  ;;  %1530 = vst.msk [vmem:[#allocation2 + $0x78] sm:$0xff] %vm1514_vm1, %v4632_v17  ;;  %v3594_v29 = vmul.f32 %v2561_v6, %v2561_v6 }
 0x10a   : > { %v1050_v22 = vpop.f32.mrb[15].mxu0  ;;  %3202 = vst.msk [vmem:[%s5206_s26 + $0x1c] sm:$0xf] %vm3194_vm3, %v4423_v15  ;;  %v2181_v26 = vadd.f32 %v5192_v7, %v2046_v16  ;;  %v2179_v31 = vadd.f32 %v5192_v7, %v2044_v21  ;;  %vm2308_vm11 = vcmp.ge.f32.partialorder %v2180_v24, 0.0  ;;  %v2436_v37 = vmul.f32 0.2, %v2180_v24 }
 0x10b   : > { %1528 = vst.msk [vmem:[#allocation2 + $0x68] sm:$0xff] %vm1514_vm1, %v1050_v22  ;;  %v3723_v28 = vadd.f32 %v3722_v14, %v3721_v18  ;;  %v2559_v30 = vsel %vm2303_vm10, %v2175_v8, %v2431_v20  ;;  %vm2306_vm12 = vcmp.ge.f32.partialorder %v2178_v25, 0.0  ;;  %v2434_v38 = vmul.f32 0.2, %v2178_v25  ;;  %1582 = vst.msk [vmem:[#allocation2 + $0x218] sm:$0xff] %vm1514_vm1, %v4684_v48 }
 0x10c   : > { %v4421_v33 = vpack.c.bf16 %v2559_v30, %v2559_v30  ;;  %v3333_v34 = vsel %vm1514_vm1, %v2559_v30, 0.0  ;;  %v3592_v35 = vmul.f32 %v2559_v30, %v2559_v30  ;;  %v3337_v39 = vsel %vm1514_vm1, %v2561_v6, 0.0  ;;  %1580 = vst.msk [vmem:[#allocation2 + $0x208] sm:$0xff] %vm1514_vm1, %v1258_v63  ;;  %v2101_v20 = vld [vmem:[#allocation2 + $0x210] sm:$0xff]  ;;  %v4687_v30 = vpop.f32.mrb[4].mxu1 }
 0x10d   : > { %v3334_v36 = vadd.f32 %v3333_v34, %v3332_v19  ;;  %vm2309_vm13 = vcmp.ge.f32.partialorder %v2181_v26, 0.0  ;;  %v2437_v41 = vmul.f32 0.2, %v2181_v26  ;;  %v2564_v44 = vsel %vm2308_vm11, %v2180_v24, %v2436_v37  ;;  %1585 = vst.msk [vmem:[#allocation2 + $0x230] sm:$0xff] %vm1514_vm1, %v4687_v30 }
 0x10e   : > { %3200 = vst.msk [vmem:[%s5206_s26 + $0x14] sm:$0xf] %vm3194_vm3, %v4421_v33  ;;  %v3724_v40 = vsel %vm1514_vm1, %v3592_v35, 0.0  ;;  %v2562_v45 = vsel %vm2306_vm12, %v2178_v25, %v2434_v38  ;;  %v2049_v46 = vld [vmem:[#allocation2 + $0x70] sm:$0xff]  ;;  %v4635_v47 = vpop.f32.mrb[16].mxu0  ;;  %v3728_v49 = vsel %vm1514_vm1, %v3594_v29, 0.0  ;;  %v4426_v50 = vpack.c.bf16 %v2564_v44, %v2564_v44 }
 0x10f   : > { %v3336_v42 = vadd.f32 %v3335_v13, %v3334_v36  ;;  %v3725_v43 = vadd.f32 %v3724_v40, %v3723_v28  ;;  %v4424_v51 = vpack.c.bf16 %v2562_v45, %v2562_v45  ;;  %vm2307_vm14 = vcmp.ge.f32.partialorder %v2179_v31, 0.0  ;;  %1533 = vst.msk [vmem:[#allocation2 + $0x90] sm:$0xff] %vm1514_vm1, %v4635_v47  ;;  %v1063_v52 = vpop.f32.mrb[17].mxu0  ;;  %v1271_v36 = vpop.f32.mrb[5].mxu1 }
 0x110   : > { %v3339_v55 = vsel %vm1514_vm1, %v2562_v45, 0.0  ;;  %v3595_v56 = vmul.f32 %v2562_v45, %v2562_v45  ;;  %1531 = vst.msk [vmem:[#allocation2 + $0x80] sm:$0xff] %vm1514_vm1, %v1063_v52  ;;  %v4636_v57 = vpop.f32.mrb[18].mxu0  ;;  %v3597_v58 = vmul.f32 %v2564_v44, %v2564_v44  ;;  %v2565_v59 = vsel %vm2309_vm13, %v2181_v26, %v2437_v41  ;;  %v2047_v4 = vld [vmem:[#allocation2 + $0x60] sm:$0xff]  ;;  %v2050_v9 = vld [vmem:[#allocation2 + $0x78] sm:$0xff]  ;;  %1583 = vst.msk [vmem:[#allocation2 + $0x220] sm:$0xff] %vm1514_vm1, %v1271_v36 }
 0x111   : > { %v3338_v53 = vadd.f32 %v3337_v39, %v3336_v42  ;;  %v3727_v54 = vadd.f32 %v3726_v23, %v3725_v43  ;;  %3205 = vst.msk [vmem:[%s5206_s26 + $0x28] sm:$0xf] %vm3194_vm3, %v4426_v50  ;;  %3203 = vst.msk [vmem:[%s5206_s26 + $0x20] sm:$0xf] %vm3194_vm3, %v4424_v51  ;;  %v2435_v60 = vmul.f32 0.2, %v2179_v31  ;;  %v2184_v61 = vadd.f32 %v5192_v7, %v2049_v46 }
 0x112   : > { %1534 = vst.msk [vmem:[#allocation2 + $0x98] sm:$0xff] %vm1514_vm1, %v4636_v57  ;;  %v1066_v62 = vpop.f32.mrb[19].mxu0  ;;  %v3730_v2 = vsel %vm1514_vm1, %v3595_v56, 0.0  ;;  %v4427_v3 = vpack.c.bf16 %v2565_v59, %v2565_v59  ;;  %v3343_v5 = vsel %vm1514_vm1, %v2564_v44, 0.0  ;;  %v3598_v6 = vmul.f32 %v2565_v59, %v2565_v59  ;;  %v2048_v10 = vld [vmem:[#allocation2 + $0x68] sm:$0xff]  ;;  %v4688_v41 = vpop.f32.mrb[6].mxu1 }
 0x113   : > { %v3729_v0 = vadd.f32 %v3728_v49, %v3727_v54  ;;  %v3340_v1 = vadd.f32 %v3339_v55, %v3338_v53  ;;  %1532 = vst.msk [vmem:[#allocation2 + $0x88] sm:$0xff] %vm1514_vm1, %v1066_v62  ;;  %v2563_v8 = vsel %vm2307_vm14, %v2179_v31, %v2435_v60  ;;  %vm2312_vm15 = vcmp.ge.f32.partialorder %v2184_v61, 0.0  ;;  %1586 = vst.msk [vmem:[#allocation2 + $0x238] sm:$0xff] %vm1514_vm1, %v4688_v41  ;;  %v1274_v49 = vpop.f32.mrb[7].mxu1 }
 0x114   : > { %3206 = vst.msk [vmem:[%s5206_s26 + $0x2c] sm:$0xf] %vm3194_vm3, %v4427_v3  ;;  %v4425_v12 = vpack.c.bf16 %v2563_v8, %v2563_v8  ;;  %v3341_v13 = vsel %vm1514_vm1, %v2563_v8, 0.0  ;;  %v3596_v14 = vmul.f32 %v2563_v8, %v2563_v8  ;;  %v3734_v15 = vsel %vm1514_vm1, %v3597_v58, 0.0 }
 0x115   : > { %v3731_v11 = vadd.f32 %v3730_v2, %v3729_v0  ;;  %v3342_v16 = vadd.f32 %v3341_v13, %v3340_v1  ;;  %v2440_v17 = vmul.f32 0.2, %v2184_v61  ;;  %v2182_v18 = vadd.f32 %v5192_v7, %v2047_v4  ;;  %1584 = vst.msk [vmem:[#allocation2 + $0x228] sm:$0xff] %vm1514_vm1, %v1274_v49 }
 0x116   : > { %v4639_v19 = vpop.f32.mrb[20].mxu0  ;;  %v3345_v21 = vsel %vm1514_vm1, %v2565_v59, 0.0  ;;  %3204 = vst.msk [vmem:[%s5206_s26 + $0x24] sm:$0xf] %vm3194_vm3, %v4425_v12  ;;  %v3732_v22 = vsel %vm1514_vm1, %v3596_v14, 0.0  ;;  %v2185_v23 = vadd.f32 %v5192_v7, %v2050_v9  ;;  %v2183_v24 = vadd.f32 %v5192_v7, %v2048_v10  ;;  %v2053_v40 = vld [vmem:[#allocation2 + $0x90] sm:$0xff] }
 0x117   : > { %1537 = vst.msk [vmem:[#allocation2 + $0xb0] sm:$0xff] %vm1514_vm1, %v4639_v19  ;;  %v1079_v25 = vpop.f32.mrb[21].mxu0  ;;  %v3344_v26 = vadd.f32 %v3343_v5, %v3342_v16  ;;  %v3733_v27 = vadd.f32 %v3732_v22, %v3731_v11  ;;  %v2568_v28 = vsel %vm2312_vm15, %v2184_v61, %v2440_v17  ;;  %vm2310_vm0 = vcmp.ge.f32.partialorder %v2182_v18, 0.0  ;;  %v2051_v58 = vld [vmem:[#allocation2 + $0x80] sm:$0xff] }
 0x118   : > { %1535 = vst.msk [vmem:[#allocation2 + $0xa0] sm:$0xff] %vm1514_vm1, %v1079_v25  ;;  %v4640_v29 = vpop.f32.mrb[22].mxu0  ;;  %v3736_v31 = vsel %vm1514_vm1, %v3598_v6, 0.0  ;;  %v4430_v32 = vpack.c.bf16 %v2568_v28, %v2568_v28  ;;  %v2438_v33 = vmul.f32 0.2, %v2182_v18  ;;  %v5292_v35 = vadd.f32 %v5192_v7, %v2101_v20 }
 0x119   : > { %1538 = vst.msk [vmem:[#allocation2 + $0xb8] sm:$0xff] %vm1514_vm1, %v4640_v29  ;;  %v1082_v34 = vpop.f32.mrb[23].mxu0  ;;  %v3346_v37 = vadd.f32 %v3345_v21, %v3344_v26  ;;  %v3735_v38 = vadd.f32 %v3734_v15, %v3733_v27  ;;  %vm2313_vm2 = vcmp.ge.f32.partialorder %v2185_v23, 0.0  ;;  %v2441_v39 = vmul.f32 0.2, %v2185_v23  ;;  %v2054_v59 = vld [vmem:[#allocation2 + $0x98] sm:$0xff] }
 0x11a   : > { %1536 = vst.msk [vmem:[#allocation2 + $0xa8] sm:$0xff] %vm1514_vm1, %v1082_v34  ;;  %v3601_v42 = vmul.f32 %v2568_v28, %v2568_v28  ;;  %v2566_v43 = vsel %vm2310_vm0, %v2182_v18, %v2438_v33  ;;  %vm2311_vm4 = vcmp.ge.f32.partialorder %v2183_v24, 0.0  ;;  %v2439_v44 = vmul.f32 0.2, %v2183_v24  ;;  %v2052_v60 = vld [vmem:[#allocation2 + $0x88] sm:$0xff]  ;;  %v4691_v18 = vpop.f32.mrb[8].mxu1 }
 0x11b   : > { %3209 = vst.msk [vmem:[%s5206_s26 + $0x38] sm:$0xf] %vm3194_vm3, %v4430_v32  ;;  %v3737_v45 = vadd.f32 %v3736_v31, %v3735_v38  ;;  %v4428_v46 = vpack.c.bf16 %v2566_v43, %v2566_v43  ;;  %v3347_v47 = vsel %vm1514_vm1, %v2566_v43, 0.0  ;;  %v3599_v48 = vmul.f32 %v2566_v43, %v2566_v43  ;;  %v1287_v22 = vpop.f32.mrb[9].mxu1 }
 0x11c   : > { %v3348_v50 = vadd.f32 %v3347_v47, %v3346_v37  ;;  %v2569_v51 = vsel %vm2313_vm2, %v2185_v23, %v2441_v39  ;;  %v2567_v52 = vsel %vm2311_vm4, %v2183_v24, %v2439_v44  ;;  %v2188_v53 = vadd.f32 %v5192_v7, %v2053_v40  ;;  %1589 = vst.msk [vmem:[#allocation2 + $0x250] sm:$0xff] %vm1514_vm1, %v4691_v18  ;;  %v4692_v26 = vpop.f32.mrb[10].mxu1 }
 0x11d   : > { %v3351_v54 = vsel %vm1514_vm1, %v2568_v28, 0.0  ;;  %3207 = vst.msk [vmem:[%s5206_s26 + $0x30] sm:$0xf] %vm3194_vm3, %v4428_v46  ;;  %v3738_v55 = vsel %vm1514_vm1, %v3599_v48, 0.0  ;;  %v4431_v56 = vpack.c.bf16 %v2569_v51, %v2569_v51  ;;  %v3602_v57 = vmul.f32 %v2569_v51, %v2569_v51  ;;  %v1290_v36 = vpop.f32.mrb[11].mxu1 }
 0x11e   : > { %v4643_v61 = vpop.f32.mrb[24].mxu0  ;;  %v3739_v62 = vadd.f32 %v3738_v55, %v3737_v45  ;;  %v4429_v63 = vpack.c.bf16 %v2567_v52, %v2567_v52  ;;  %v3349_v0 = vsel %vm1514_vm1, %v2567_v52, 0.0  ;;  %v3600_v1 = vmul.f32 %v2567_v52, %v2567_v52  ;;  %v2057_v2 = vld [vmem:[#allocation2 + $0xb0] sm:$0xff]  ;;  %1587 = vst.msk [vmem:[#allocation2 + $0x240] sm:$0xff] %vm1514_vm1, %v1287_v22  ;;  %1590 = vst.msk [vmem:[#allocation2 + $0x258] sm:$0xff] %vm1514_vm1, %v4692_v26 }
 0x11f   : > { %1541 = vst.msk [vmem:[#allocation2 + $0xd0] sm:$0xff] %vm1514_vm1, %v4643_v61  ;;  %v1095_v3 = vpop.f32.mrb[25].mxu0  ;;  %v3742_v4 = vsel %vm1514_vm1, %v3601_v42, 0.0  ;;  %v3350_v5 = vadd.f32 %v3349_v0, %v3348_v50  ;;  %vm2316_vm5 = vcmp.ge.f32.partialorder %v2188_v53, 0.0  ;;  %v2444_v6 = vmul.f32 0.2, %v2188_v53 }
 0x120   : > { %3210 = vst.msk [vmem:[%s5206_s26 + $0x3c] sm:$0xf] %vm3194_vm3, %v4431_v56  ;;  %v4644_v8 = vpop.f32.mrb[26].mxu0  ;;  %3208 = vst.msk [vmem:[%s5206_s26 + $0x34] sm:$0xf] %vm3194_vm3, %v4429_v63  ;;  %v3740_v9 = vsel %vm1514_vm1, %v3600_v1, 0.0  ;;  %v2186_v10 = vadd.f32 %v5192_v7, %v2051_v58  ;;  %v2189_v11 = vadd.f32 %v5192_v7, %v2054_v59  ;;  %v2187_v12 = vadd.f32 %v5192_v7, %v2052_v60 }
 0x121   : > { %1539 = vst.msk [vmem:[#allocation2 + $0xc0] sm:$0xff] %vm1514_vm1, %v1095_v3  ;;  %1542 = vst.msk [vmem:[#allocation2 + $0xd8] sm:$0xff] %vm1514_vm1, %v4644_v8  ;;  %v1098_v13 = vpop.f32.mrb[27].mxu0  ;;  %v3352_v14 = vadd.f32 %v3351_v54, %v3350_v5  ;;  %v3741_v15 = vadd.f32 %v3740_v9, %v3739_v62  ;;  %v2572_v16 = vsel %vm2316_vm5, %v2188_v53, %v2444_v6  ;;  %v3353_v19 = vsel %vm1514_vm1, %v2569_v51, 0.0  ;;  %v2055_v33 = vld [vmem:[#allocation2 + $0xa0] sm:$0xff]  ;;  %v2058_v51 = vld [vmem:[#allocation2 + $0xb8] sm:$0xff] }
 0x122   : > { %v2192_v17 = vadd.f32 %v5192_v7, %v2057_v2  ;;  %1540 = vst.msk [vmem:[#allocation2 + $0xc8] sm:$0xff] %vm1514_vm1, %v1098_v13  ;;  %v3744_v20 = vsel %vm1514_vm1, %v3602_v57, 0.0  ;;  %v4434_v21 = vpack.c.bf16 %v2572_v16, %v2572_v16  ;;  %vm2314_vm6 = vcmp.ge.f32.partialorder %v2186_v10, 0.0  ;;  %1588 = vst.msk [vmem:[#allocation2 + $0x248] sm:$0xff] %vm1514_vm1, %v1290_v36  ;;  %v2056_v57 = vld [vmem:[#allocation2 + $0xa8] sm:$0xff]  ;;  %v4695_v2 = vpop.f32.mrb[12].mxu1 }
 0x123   : > { %v3354_v23 = vadd.f32 %v3353_v19, %v3352_v14  ;;  %v3743_v24 = vadd.f32 %v3742_v4, %v3741_v15  ;;  %v2442_v25 = vmul.f32 0.2, %v2186_v10  ;;  %vm2317_vm7 = vcmp.ge.f32.partialorder %v2189_v11, 0.0  ;;  %1593 = vst.msk [vmem:[#allocation2 + $0x270] sm:$0xff] %vm1514_vm1, %v4695_v2  ;;  %v1303_v8 = vpop.f32.mrb[13].mxu1 }
 0x124   : > { %3213 = vst.msk [vmem:[%s5206_s26 + $0x48] sm:$0xf] %vm3194_vm3, %v4434_v21  ;;  %v3605_v27 = vmul.f32 %v2572_v16, %v2572_v16  ;;  %v2445_v28 = vmul.f32 0.2, %v2189_v11  ;;  %vm2315_vm8 = vcmp.ge.f32.partialorder %v2187_v12, 0.0  ;;  %vm2320_vm9 = vcmp.ge.f32.partialorder %v2192_v17, 0.0 }
 0x125   : > { %v2443_v29 = vmul.f32 0.2, %v2187_v12  ;;  %v3745_v30 = vadd.f32 %v3744_v20, %v3743_v24  ;;  %v2570_v31 = vsel %vm2314_vm6, %v2186_v10, %v2442_v25  ;;  %v2448_v32 = vmul.f32 0.2, %v2192_v17  ;;  %1591 = vst.msk [vmem:[#allocation2 + $0x260] sm:$0xff] %vm1514_vm1, %v1303_v8  ;;  %v4696_v13 = vpop.f32.mrb[14].mxu1 }
 0x126   : > { %v4647_v34 = vpop.f32.mrb[28].mxu0  ;;  %v4432_v37 = vpack.c.bf16 %v2570_v31, %v2570_v31  ;;  %v3355_v38 = vsel %vm1514_vm1, %v2570_v31, 0.0  ;;  %v3603_v39 = vmul.f32 %v2570_v31, %v2570_v31  ;;  %v2573_v40 = vsel %vm2317_vm7, %v2189_v11, %v2445_v28  ;;  %v2061_v58 = vld [vmem:[#allocation2 + $0xd0] sm:$0xff]  ;;  %1594 = vst.msk [vmem:[#allocation2 + $0x278] sm:$0xff] %vm1514_vm1, %v4696_v13 }
 0x127   : > { %1545 = vst.msk [vmem:[#allocation2 + $0xf0] sm:$0xff] %vm1514_vm1, %v4647_v34  ;;  %v1111_v41 = vpop.f32.mrb[29].mxu0  ;;  %v3359_v42 = vsel %vm1514_vm1, %v2572_v16, 0.0  ;;  %v3356_v43 = vadd.f32 %v3355_v38, %v3354_v23  ;;  %v4435_v44 = vpack.c.bf16 %v2573_v40, %v2573_v40  ;;  %v3606_v45 = vmul.f32 %v2573_v40, %v2573_v40 }
 0x128   : > { %1543 = vst.msk [vmem:[#allocation2 + $0xe0] sm:$0xff] %vm1514_vm1, %v1111_v41  ;;  %v4648_v46 = vpop.f32.mrb[30].mxu0  ;;  %v3746_v47 = vsel %vm1514_vm1, %v3603_v39, 0.0  ;;  %v2571_v48 = vsel %vm2315_vm8, %v2187_v12, %v2443_v29  ;;  %v5343_v49 = vsel %vm2320_vm9, %v2192_v17, %v2448_v32  ;;  %v2190_v50 = vadd.f32 %v5192_v7, %v2055_v33  ;;  %v2059_v18 = vld [vmem:[#allocation2 + $0xc0] sm:$0xff]  ;;  %v1306_v32 = vpop.f32.mrb[15].mxu1 }
 0x129   : > { %3211 = vst.msk [vmem:[%s5206_s26 + $0x40] sm:$0xf] %vm3194_vm3, %v4432_v37  ;;  %v1114_v52 = vpop.f32.mrb[31].mxu0  ;;  %v3750_v53 = vsel %vm1514_vm1, %v3605_v27, 0.0  ;;  %v3747_v54 = vadd.f32 %v3746_v47, %v3745_v30  ;;  %3214 = vst.msk [vmem:[%s5206_s26 + $0x4c] sm:$0xf] %vm3194_vm3, %v4435_v44  ;;  %v4433_v55 = vpack.c.bf16 %v2571_v48, %v2571_v48  ;;  %v3604_v61 = vmul.f32 %v2571_v48, %v2571_v48 }
 0x12a   : > { %1546 = vst.msk [vmem:[#allocation2 + $0xf8] sm:$0xff] %vm1514_vm1, %v4648_v46  ;;  %v3357_v56 = vsel %vm1514_vm1, %v2571_v48, 0.0  ;;  %1544 = vst.msk [vmem:[#allocation2 + $0xe8] sm:$0xff] %vm1514_vm1, %v1114_v52  ;;  %v3361_v59 = vsel %vm1514_vm1, %v2573_v40, 0.0  ;;  %v4438_v62 = vpack.c.bf16 %v5343_v49, %v5343_v49  ;;  %v3752_v63 = vsel %vm1514_vm1, %v3606_v45, 0.0 }
 0x12b   : > { %v3358_v60 = vadd.f32 %v3357_v56, %v3356_v43  ;;  %3212 = vst.msk [vmem:[%s5206_s26 + $0x44] sm:$0xf] %vm3194_vm3, %v4433_v55  ;;  %vm2318_vm10 = vcmp.ge.f32.partialorder %v2190_v50, 0.0  ;;  %v2446_v0 = vmul.f32 0.2, %v2190_v50  ;;  %v2193_v1 = vadd.f32 %v5192_v7, %v2058_v51  ;;  %v2060_v43 = vld [vmem:[#allocation2 + $0xc8] sm:$0xff] }
 0x12c   : > { %v3748_v4 = vsel %vm1514_vm1, %v3604_v61, 0.0  ;;  %3217 = vst.msk [vmem:[%s5206_s26 + $0x58] sm:$0xf] %vm3194_vm3, %v4438_v62  ;;  %v2191_v5 = vadd.f32 %v5192_v7, %v2056_v57  ;;  %v2196_v6 = vadd.f32 %v5192_v7, %v2061_v58  ;;  %v3609_v10 = vmul.f32 %v5343_v49, %v5343_v49 }
 0x12d   : > { %v3360_v3 = vadd.f32 %v3359_v42, %v3358_v60  ;;  %v3749_v9 = vadd.f32 %v3748_v4, %v3747_v54  ;;  %v2574_v11 = vsel %vm2318_vm10, %v2190_v50, %v2446_v0  ;;  %vm2321_vm11 = vcmp.ge.f32.partialorder %v2193_v1, 0.0  ;;  %1592 = vst.msk [vmem:[#allocation2 + $0x268] sm:$0xff] %vm1514_vm1, %v1306_v32  ;;  %v2062_v42 = vld [vmem:[#allocation2 + $0xd8] sm:$0xff] }
 0x12e   : > { %v4651_v12 = vpop.f32.mrb[32].mxu0  ;;  %v4436_v15 = vpack.c.bf16 %v2574_v11, %v2574_v11  ;;  %v3363_v16 = vsel %vm1514_vm1, %v2574_v11, 0.0  ;;  %v3607_v17 = vmul.f32 %v2574_v11, %v2574_v11  ;;  %v2449_v21 = vmul.f32 0.2, %v2193_v1  ;;  %v2065_v48 = vld [vmem:[#allocation2 + $0xf0] sm:$0xff] }
 0x12f   : > { %v3362_v14 = vadd.f32 %v3361_v59, %v3360_v3  ;;  %1549 = vst.msk [vmem:[#allocation2 + $0x110] sm:$0xff] %vm1514_vm1, %v4651_v12  ;;  %v1127_v19 = vpop.f32.mrb[33].mxu0  ;;  %v3751_v20 = vadd.f32 %v3750_v53, %v3749_v9  ;;  %vm2319_vm12 = vcmp.ge.f32.partialorder %v2191_v5, 0.0  ;;  %v2447_v22 = vmul.f32 0.2, %v2191_v5  ;;  %v4699_v59 = vpop.f32.mrb[16].mxu1 }
 0x130   : > { %1547 = vst.msk [vmem:[#allocation2 + $0x100] sm:$0xff] %vm1514_vm1, %v1127_v19  ;;  %v3754_v24 = vsel %vm1514_vm1, %v3607_v17, 0.0  ;;  %vm2324_vm13 = vcmp.ge.f32.partialorder %v2196_v6, 0.0  ;;  %v2452_v25 = vmul.f32 0.2, %v2196_v6  ;;  %v4652_v26 = vpop.f32.mrb[34].mxu0  ;;  %v2577_v28 = vsel %vm2321_vm11, %v2193_v1, %v2449_v21 }
 0x131   : > { %3215 = vst.msk [vmem:[%s5206_s26 + $0x50] sm:$0xf] %vm3194_vm3, %v4436_v15  ;;  %v3364_v23 = vadd.f32 %v3363_v16, %v3362_v14  ;;  %v3753_v27 = vadd.f32 %v3752_v63, %v3751_v20  ;;  %v2575_v29 = vsel %vm2319_vm12, %v2191_v5, %v2447_v22  ;;  %v2194_v30 = vadd.f32 %v5192_v7, %v2059_v18  ;;  %v1130_v31 = vpop.f32.mrb[35].mxu0  ;;  %v1319_v1 = vpop.f32.mrb[17].mxu1  ;;  %v2066_v14 = vld [vmem:[#allocation2 + $0xf8] sm:$0xff] }
 0x132   : > { %1550 = vst.msk [vmem:[#allocation2 + $0x118] sm:$0xff] %vm1514_vm1, %v4652_v26  ;;  %v3367_v33 = vsel %vm1514_vm1, %v5343_v49, 0.0  ;;  %v4439_v34 = vpack.c.bf16 %v2577_v28, %v2577_v28  ;;  %v3610_v36 = vmul.f32 %v2577_v28, %v2577_v28  ;;  %v4437_v37 = vpack.c.bf16 %v2575_v29, %v2575_v29  ;;  %1548 = vst.msk [vmem:[#allocation2 + $0x108] sm:$0xff] %vm1514_vm1, %v1130_v31  ;;  %v2063_v49 = vld [vmem:[#allocation2 + $0xe0] sm:$0xff]  ;;  %v4700_v8 = vpop.f32.mrb[18].mxu1 }
 0x133   : > { %v3755_v38 = vadd.f32 %v3754_v24, %v3753_v27  ;;  %v3365_v39 = vsel %vm1514_vm1, %v2575_v29, 0.0  ;;  %v3608_v40 = vmul.f32 %v2575_v29, %v2575_v29  ;;  %v2580_v41 = vsel %vm2324_vm13, %v2196_v6, %v2452_v25  ;;  %1597 = vst.msk [vmem:[#allocation2 + $0x290] sm:$0xff] %vm1514_vm1, %v4699_v59  ;;  %1595 = vst.msk [vmem:[#allocation2 + $0x280] sm:$0xff] %vm1514_vm1, %v1319_v1  ;;  %v1322_v15 = vpop.f32.mrb[19].mxu1 }
 0x134   : > { %v3758_v44 = vsel %vm1514_vm1, %v3609_v10, 0.0  ;;  %3218 = vst.msk [vmem:[%s5206_s26 + $0x5c] sm:$0xf] %vm3194_vm3, %v4439_v34  ;;  %v3369_v45 = vsel %vm1514_vm1, %v2577_v28, 0.0  ;;  %3216 = vst.msk [vmem:[%s5206_s26 + $0x54] sm:$0xf] %vm3194_vm3, %v4437_v37  ;;  %v3366_v46 = vadd.f32 %v3365_v39, %v3364_v23  ;;  %v4442_v47 = vpack.c.bf16 %v2580_v41, %v2580_v41 }
 0x135   : > { %v3760_v50 = vsel %vm1514_vm1, %v3610_v36, 0.0  ;;  %v3756_v51 = vsel %vm1514_vm1, %v3608_v40, 0.0  ;;  %vm2322_vm14 = vcmp.ge.f32.partialorder %v2194_v30, 0.0  ;;  %v2450_v52 = vmul.f32 0.2, %v2194_v30  ;;  %1598 = vst.msk [vmem:[#allocation2 + $0x298] sm:$0xff] %vm1514_vm1, %v4700_v8 }
 0x136   : > { %v4655_v53 = vpop.f32.mrb[36].mxu0  ;;  %v3368_v54 = vadd.f32 %v3367_v33, %v3366_v46  ;;  %v3757_v55 = vadd.f32 %v3756_v51, %v3755_v38  ;;  %3221 = vst.msk [vmem:[%s5206_s26 + $0x68] sm:$0xf] %vm3194_vm3, %v4442_v47  ;;  %v2197_v56 = vadd.f32 %v5192_v7, %v2062_v42  ;;  %v2195_v57 = vadd.f32 %v5192_v7, %v2060_v43  ;;  %v2064_v38 = vld [vmem:[#allocation2 + $0xe8] sm:$0xff]  ;;  %v4703_v40 = vpop.f32.mrb[20].mxu1 }
 0x137   : > { %1553 = vst.msk [vmem:[#allocation2 + $0x130] sm:$0xff] %vm1514_vm1, %v4655_v53  ;;  %v1143_v58 = vpop.f32.mrb[37].mxu0  ;;  %v5398_v60 = vsel %vm1514_vm1, %v2580_v41, 0.0  ;;  %v2578_v61 = vsel %vm2322_vm14, %v2194_v30, %v2450_v52  ;;  %v2200_v62 = vadd.f32 %v5192_v7, %v2065_v48  ;;  %v2198_v63 = vadd.f32 %v5192_v7, %v2063_v49  ;;  %1596 = vst.msk [vmem:[#allocation2 + $0x288] sm:$0xff] %vm1514_vm1, %v1322_v15  ;;  %v1335_v49 = vpop.f32.mrb[21].mxu1 }
 0x138   : > { %1551 = vst.msk [vmem:[#allocation2 + $0x120] sm:$0xff] %vm1514_vm1, %v1143_v58  ;;  %v4656_v0 = vpop.f32.mrb[38].mxu0  ;;  %v3370_v2 = vadd.f32 %v3369_v45, %v3368_v54  ;;  %v3759_v3 = vadd.f32 %v3758_v44, %v3757_v55  ;;  %v4440_v4 = vpack.c.bf16 %v2578_v61, %v2578_v61  ;;  %v3371_v5 = vsel %vm1514_vm1, %v2578_v61, 0.0  ;;  %1601 = vst.msk [vmem:[#allocation2 + $0x2b0] sm:$0xff] %vm1514_vm1, %v4703_v40  ;;  %v2069_v54 = vld [vmem:[#allocation2 + $0x110] sm:$0xff]  ;;  %v2067_v55 = vld [vmem:[#allocation2 + $0x100] sm:$0xff] }
 0x139   : > { %1554 = vst.msk [vmem:[#allocation2 + $0x138] sm:$0xff] %vm1514_vm1, %v4656_v0  ;;  %v1146_v6 = vpop.f32.mrb[39].mxu0  ;;  %v3613_v9 = vmul.f32 %v2580_v41, %v2580_v41  ;;  %v3611_v10 = vmul.f32 %v2578_v61, %v2578_v61  ;;  %vm2325_vm15 = vcmp.ge.f32.partialorder %v2197_v56, 0.0  ;;  %v2453_v11 = vmul.f32 0.2, %v2197_v56  ;;  %1599 = vst.msk [vmem:[#allocation2 + $0x2a0] sm:$0xff] %vm1514_vm1, %v1335_v49 }
 0x13a   : > { %1552 = vst.msk [vmem:[#allocation2 + $0x128] sm:$0xff] %vm1514_vm1, %v1146_v6  ;;  %v3761_v12 = vadd.f32 %v3760_v50, %v3759_v3  ;;  %vm2323_vm0 = vcmp.ge.f32.partialorder %v2195_v57, 0.0  ;;  %v2451_v13 = vmul.f32 0.2, %v2195_v57  ;;  %vm2328_vm2 = vcmp.ge.f32.partialorder %v2200_v62, 0.0  ;;  %v2070_v61 = vld [vmem:[#allocation2 + $0x118] sm:$0xff] }
 0x13b   : > { %3219 = vst.msk [vmem:[%s5206_s26 + $0x60] sm:$0xf] %vm3194_vm3, %v4440_v4  ;;  %v3372_v16 = vadd.f32 %v3371_v5, %v3370_v2  ;;  %v3762_v17 = vsel %vm1514_vm1, %v3611_v10, 0.0  ;;  %v2581_v18 = vsel %vm2325_vm15, %v2197_v56, %v2453_v11  ;;  %v2456_v19 = vmul.f32 0.2, %v2200_v62  ;;  %v4704_v56 = vpop.f32.mrb[22].mxu1 }
 0x13c   : > { %v3763_v20 = vadd.f32 %v3762_v17, %v3761_v12  ;;  %v4443_v21 = vpack.c.bf16 %v2581_v18, %v2581_v18  ;;  %v3614_v22 = vmul.f32 %v2581_v18, %v2581_v18  ;;  %vm2326_vm4 = vcmp.ge.f32.partialorder %v2198_v63, 0.0  ;;  %1602 = vst.msk [vmem:[#allocation2 + $0x2b8] sm:$0xff] %vm1514_vm1, %v4704_v56 }
 0x13d   : > { %v2579_v23 = vsel %vm2323_vm0, %v2195_v57, %v2451_v13  ;;  %v2584_v24 = vsel %vm2328_vm2, %v2200_v62, %v2456_v19  ;;  %v2454_v25 = vmul.f32 0.2, %v2198_v63  ;;  %v2201_v26 = vadd.f32 %v5192_v7, %v2066_v14  ;;  %v2068_v62 = vld [vmem:[#allocation2 + $0x108] sm:$0xff] }
 0x13e   : > { %v4659_v27 = vpop.f32.mrb[40].mxu0  ;;  %v3766_v28 = vsel %vm1514_vm1, %v3613_v9, 0.0  ;;  %3222 = vst.msk [vmem:[%s5206_s26 + $0x6c] sm:$0xf] %vm3194_vm3, %v4443_v21  ;;  %v4441_v29 = vpack.c.bf16 %v2579_v23, %v2579_v23  ;;  %v3373_v30 = vsel %vm1514_vm1, %v2579_v23, 0.0  ;;  %v3612_v31 = vmul.f32 %v2579_v23, %v2579_v23 }
 0x13f   : > { %1557 = vst.msk [vmem:[#allocation2 + $0x150] sm:$0xff] %vm1514_vm1, %v4659_v27  ;;  %v1159_v32 = vpop.f32.mrb[41].mxu0  ;;  %v3377_v33 = vsel %vm1514_vm1, %v2581_v18, 0.0  ;;  %v3374_v34 = vadd.f32 %v3373_v30, %v3372_v16  ;;  %v4446_v36 = vpack.c.bf16 %v2584_v24, %v2584_v24  ;;  %v3617_v37 = vmul.f32 %v2584_v24, %v2584_v24  ;;  %v2071_v56 = vld [vmem:[#allocation2 + $0x120] sm:$0xff] }
 0x140   : > { %1555 = vst.msk [vmem:[#allocation2 + $0x140] sm:$0xff] %vm1514_vm1, %v1159_v32  ;;  %v4660_v39 = vpop.f32.mrb[42].mxu0  ;;  %v3764_v41 = vsel %vm1514_vm1, %v3612_v31, 0.0  ;;  %v2582_v42 = vsel %vm2326_vm4, %v2198_v63, %v2454_v25  ;;  %vm2329_vm5 = vcmp.ge.f32.partialorder %v2201_v26, 0.0  ;;  %v2457_v43 = vmul.f32 0.2, %v2201_v26 }
 0x141   : > { %3220 = vst.msk [vmem:[%s5206_s26 + $0x64] sm:$0xf] %vm3194_vm3, %v4441_v29  ;;  %v1162_v44 = vpop.f32.mrb[43].mxu0  ;;  %v3768_v45 = vsel %vm1514_vm1, %v3614_v22, 0.0  ;;  %v3376_v46 = vadd.f32 %v5398_v60, %v3374_v34  ;;  %v3765_v47 = vadd.f32 %v3764_v41, %v3763_v20  ;;  %3225 = vst.msk [vmem:[%s5206_s26 + $0x78] sm:$0xf] %vm3194_vm3, %v4446_v36  ;;  %v4444_v48 = vpack.c.bf16 %v2582_v42, %v2582_v42 }
 0x142   : > { %1558 = vst.msk [vmem:[#allocation2 + $0x158] sm:$0xff] %vm1514_vm1, %v4660_v39  ;;  %1556 = vst.msk [vmem:[#allocation2 + $0x148] sm:$0xff] %vm1514_vm1, %v1162_v44  ;;  %v3379_v50 = vsel %vm1514_vm1, %v2582_v42, 0.0  ;;  %v3615_v51 = vmul.f32 %v2582_v42, %v2582_v42  ;;  %v2585_v52 = vsel %vm2329_vm5, %v2201_v26, %v2457_v43  ;;  %v2199_v53 = vadd.f32 %v5192_v7, %v2064_v38  ;;  %v1338_v63 = vpop.f32.mrb[23].mxu1  ;;  %v2073_v38 = vld [vmem:[#allocation2 + $0x130] sm:$0xff] }
 0x143   : > { %v3378_v57 = vadd.f32 %v3377_v33, %v3376_v46  ;;  %v3767_v58 = vadd.f32 %v3766_v28, %v3765_v47  ;;  %v3383_v59 = vsel %vm1514_vm1, %v2584_v24, 0.0  ;;  %3223 = vst.msk [vmem:[%s5206_s26 + $0x70] sm:$0xf] %vm3194_vm3, %v4444_v48  ;;  %v4447_v60 = vpack.c.bf16 %v2585_v52, %v2585_v52  ;;  %v4707_v28 = vpop.f32.mrb[24].mxu1 }
 0x144   : > { %v3774_v0 = vsel %vm1514_vm1, %v3617_v37, 0.0  ;;  %v3770_v1 = vsel %vm1514_vm1, %v3615_v51, 0.0  ;;  %vm2327_vm6 = vcmp.ge.f32.partialorder %v2199_v53, 0.0  ;;  %v2455_v2 = vmul.f32 0.2, %v2199_v53  ;;  %1600 = vst.msk [vmem:[#allocation2 + $0x2a8] sm:$0xff] %vm1514_vm1, %v1338_v63 }
 0x145   : > { %v3769_v3 = vadd.f32 %v3768_v45, %v3767_v58  ;;  %v3380_v4 = vadd.f32 %v3379_v50, %v3378_v57  ;;  %3226 = vst.msk [vmem:[%s5206_s26 + $0x7c] sm:$0xf] %vm3194_vm3, %v4447_v60  ;;  %v2204_v5 = vadd.f32 %v5192_v7, %v2069_v54  ;;  %v2202_v6 = vadd.f32 %v5192_v7, %v2067_v55  ;;  %v1351_v32 = vpop.f32.mrb[25].mxu1  ;;  %v5476_v54 = vld [vmem:[%s6188_s2] ss:$0 sm:$0xff]  ;;  %v2074_v57 = vld [vmem:[#allocation2 + $0x138] sm:$0xff] }
 0x146   : > { %v4663_v8 = vpop.f32.mrb[44].mxu0  ;;  %v3618_v9 = vmul.f32 %v2585_v52, %v2585_v52  ;;  %v2583_v10 = vsel %vm2327_vm6, %v2199_v53, %v2455_v2  ;;  %v2205_v11 = vadd.f32 %v5192_v7, %v2070_v61  ;;  %v2203_v12 = vadd.f32 %v5192_v7, %v2068_v62  ;;  %1605 = vst.msk [vmem:[#allocation2 + $0x2d0] sm:$0xff] %vm1514_vm1, %v4707_v28  ;;  %v4708_v39 = vpop.f32.mrb[26].mxu1  ;;  %v2072_v58 = vld [vmem:[#allocation2 + $0x128] sm:$0xff] }
 0x147   : > { %1561 = vst.msk [vmem:[#allocation2 + $0x170] sm:$0xff] %vm1514_vm1, %v4663_v8  ;;  %v1175_v13 = vpop.f32.mrb[45].mxu0  ;;  %v3771_v14 = vadd.f32 %v3770_v1, %v3769_v3  ;;  %v4445_v15 = vpack.c.bf16 %v2583_v10, %v2583_v10  ;;  %v3381_v16 = vsel %vm1514_vm1, %v2583_v10, 0.0  ;;  %v3616_v17 = vmul.f32 %v2583_v10, %v2583_v10  ;;  %1603 = vst.msk [vmem:[#allocation2 + $0x2c0] sm:$0xff] %vm1514_vm1, %v1351_v32  ;;  %v1354_v45 = vpop.f32.mrb[27].mxu1  ;;  %v2075_v28 = vld [vmem:[#allocation2 + $0x140] sm:$0xff] }
 0x148   : > { %1559 = vst.msk [vmem:[#allocation2 + $0x160] sm:$0xff] %vm1514_vm1, %v1175_v13  ;;  %v4664_v18 = vpop.f32.mrb[46].mxu0  ;;  %v3382_v19 = vadd.f32 %v3381_v16, %v3380_v4  ;;  %vm2332_vm7 = vcmp.ge.f32.partialorder %v2204_v5, 0.0  ;;  %v2460_v20 = vmul.f32 0.2, %v2204_v5  ;;  %vm2330_vm8 = vcmp.ge.f32.partialorder %v2202_v6, 0.0 }
 0x149   : > { %1562 = vst.msk [vmem:[#allocation2 + $0x178] sm:$0xff] %vm1514_vm1, %v4664_v18  ;;  %v1178_v21 = vpop.f32.mrb[47].mxu0  ;;  %v3385_v7 = vsel %vm1514_vm1, %v2585_v52, 0.0  ;;  %v3772_v22 = vsel %vm1514_vm1, %v3616_v17, 0.0  ;;  %v2458_v23 = vmul.f32 0.2, %v2202_v6  ;;  %v2208_v55 = vadd.f32 %v5476_v54, %v2073_v38 }
 0x14a   : > { %3224 = vst.msk [vmem:[%s5206_s26 + $0x74] sm:$0xf] %vm3194_vm3, %v4445_v15  ;;  %v2461_v24 = vmul.f32 0.2, %v2205_v11  ;;  %v3384_v25 = vadd.f32 %v3383_v59, %v3382_v19  ;;  %v3773_v26 = vadd.f32 %v3772_v22, %v3771_v14  ;;  %v2588_v27 = vsel %vm2332_vm7, %v2204_v5, %v2460_v20  ;;  %v4711_v14 = vpop.f32.mrb[28].mxu1 }
 0x14b   : > { %1560 = vst.msk [vmem:[#allocation2 + $0x168] sm:$0xff] %vm1514_vm1, %v1178_v21  ;;  %vm2333_vm9 = vcmp.ge.f32.partialorder %v2205_v11, 0.0  ;;  %v3776_v29 = vsel %vm1514_vm1, %v3618_v9, 0.0  ;;  %v4450_v30 = vpack.c.bf16 %v2588_v27, %v2588_v27  ;;  %v2586_v31 = vsel %vm2330_vm8, %v2202_v6, %v2458_v23  ;;  %1606 = vst.msk [vmem:[#allocation2 + $0x2d8] sm:$0xff] %vm1514_vm1, %v4708_v39  ;;  %v1367_v18 = vpop.f32.mrb[29].mxu1 }
 0x14c   : > { %vm2331_vm10 = vcmp.ge.f32.partialorder %v2203_v12, 0.0  ;;  %v3386_v33 = vadd.f32 %v3385_v7, %v3384_v25  ;;  %v3775_v34 = vadd.f32 %v3774_v0, %v3773_v26  ;;  %v4448_v36 = vpack.c.bf16 %v2586_v31, %v2586_v31  ;;  %1604 = vst.msk [vmem:[#allocation2 + $0x2c8] sm:$0xff] %vm1514_vm1, %v1354_v45  ;;  %v2077_v0 = vld [vmem:[#allocation2 + $0x150] sm:$0xff]  ;;  %1609 = vst.msk [vmem:[#allocation2 + $0x2f0] sm:$0xff] %vm1514_vm1, %v4711_v14 }
 0x14d   : > { %v3387_v37 = vsel %vm1514_vm1, %v2586_v31, 0.0  ;;  %3229 = vst.msk [vmem:[%s5206_s26 + $0x88] sm:$0xf] %vm3194_vm3, %v4450_v30  ;;  %v3621_v40 = vmul.f32 %v2588_v27, %v2588_v27  ;;  %v3619_v41 = vmul.f32 %v2586_v31, %v2586_v31  ;;  %v2589_v42 = vsel %vm2333_vm9, %v2205_v11, %v2461_v24 }
 0x14e   : > { %v2459_v43 = vmul.f32 0.2, %v2203_v12  ;;  %v4667_v44 = vpop.f32.mrb[48].mxu0  ;;  %v3777_v46 = vadd.f32 %v3776_v29, %v3775_v34  ;;  %v3391_v47 = vsel %vm1514_vm1, %v2588_v27, 0.0  ;;  %3227 = vst.msk [vmem:[%s5206_s26 + $0x80] sm:$0xf] %vm3194_vm3, %v4448_v36  ;;  %v3388_v48 = vadd.f32 %v3387_v37, %v3386_v33 }
 0x14f   : > { %v4451_v49 = vpack.c.bf16 %v2589_v42, %v2589_v42  ;;  %1565 = vst.msk [vmem:[#allocation2 + $0x190] sm:$0xff] %vm1514_vm1, %v4667_v44  ;;  %v1191_v50 = vpop.f32.mrb[49].mxu0  ;;  %v3778_v51 = vsel %vm1514_vm1, %v3619_v41, 0.0  ;;  %v3622_v52 = vmul.f32 %v2589_v42, %v2589_v42  ;;  %v3782_v2 = vsel %vm1514_vm1, %v3621_v40, 0.0  ;;  %1607 = vst.msk [vmem:[#allocation2 + $0x2e0] sm:$0xff] %vm1514_vm1, %v1367_v18  ;;  %v4712_v36 = vpop.f32.mrb[30].mxu1 }
 0x150   : > { %v2587_v53 = vsel %vm2331_vm10, %v2203_v12, %v2459_v43  ;;  %1563 = vst.msk [vmem:[#allocation2 + $0x180] sm:$0xff] %vm1514_vm1, %v1191_v50  ;;  %v4668_v59 = vpop.f32.mrb[50].mxu0  ;;  %v3779_v60 = vadd.f32 %v3778_v51, %v3777_v46  ;;  %vm2336_vm11 = vcmp.ge.f32.partialorder %v2208_v55, 0.0  ;;  %v2464_v4 = vmul.f32 0.2, %v2208_v55  ;;  %1610 = vst.msk [vmem:[#allocation2 + $0x2f8] sm:$0xff] %vm1514_vm1, %v4712_v36 }
 0x151   : > { %3230 = vst.msk [vmem:[%s5206_s26 + $0x8c] sm:$0xf] %vm3194_vm3, %v4451_v49  ;;  %v4449_v61 = vpack.c.bf16 %v2587_v53, %v2587_v53  ;;  %v3389_v62 = vsel %vm1514_vm1, %v2587_v53, 0.0  ;;  %v3620_v63 = vmul.f32 %v2587_v53, %v2587_v53  ;;  %v1194_v1 = vpop.f32.mrb[51].mxu0  ;;  %v2206_v6 = vadd.f32 %v5476_v54, %v2071_v56  ;;  %v2081_v53 = vld [vmem:[#allocation2 + $0x170] sm:$0xff] }
 0x152   : > { %1566 = vst.msk [vmem:[#allocation2 + $0x198] sm:$0xff] %vm1514_vm1, %v4668_v59  ;;  %v3390_v3 = vadd.f32 %v3389_v62, %v3388_v48  ;;  %1564 = vst.msk [vmem:[#allocation2 + $0x188] sm:$0xff] %vm1514_vm1, %v1194_v1  ;;  %v2209_v8 = vadd.f32 %v5476_v54, %v2074_v57  ;;  %v2207_v9 = vadd.f32 %v5476_v54, %v2072_v58  ;;  %v3393_v15 = vsel %vm1514_vm1, %v2589_v42, 0.0  ;;  %v1370_v42 = vpop.f32.mrb[31].mxu1 }
 0x153   : > { %3228 = vst.msk [vmem:[%s5206_s26 + $0x84] sm:$0xf] %vm3194_vm3, %v4449_v61  ;;  %v3780_v5 = vsel %vm1514_vm1, %v3620_v63, 0.0  ;;  %v2592_v12 = vsel %vm2336_vm11, %v2208_v55, %v2464_v4  ;;  %v2212_v13 = vadd.f32 %v5476_v54, %v2077_v0  ;;  %v3784_v16 = vsel %vm1514_vm1, %v3622_v52, 0.0  ;;  %v2076_v52 = vld [vmem:[#allocation2 + $0x148] sm:$0xff]  ;;  %v4715_v63 = vpop.f32.mrb[32].mxu1 }
 0x154   : > { %v3392_v10 = vadd.f32 %v3391_v47, %v3390_v3  ;;  %v3781_v11 = vadd.f32 %v3780_v5, %v3779_v60  ;;  %v4454_v17 = vpack.c.bf16 %v2592_v12, %v2592_v12  ;;  %vm2334_vm12 = vcmp.ge.f32.partialorder %v2206_v6, 0.0  ;;  %v2078_v47 = vld [vmem:[#allocation2 + $0x158] sm:$0xff]  ;;  %1608 = vst.msk [vmem:[#allocation2 + $0x2e8] sm:$0xff] %vm1514_vm1, %v1370_v42  ;;  %1613 = vst.msk [vmem:[#allocation2 + $0x310] sm:$0xff] %vm1514_vm1, %v4715_v63  ;;  %v1383_v5 = vpop.f32.mrb[33].mxu1 }
 0x155   : > { %v2462_v21 = vmul.f32 0.2, %v2206_v6  ;;  %vm2337_vm13 = vcmp.ge.f32.partialorder %v2209_v8, 0.0  ;;  %v3625_v22 = vmul.f32 %v2592_v12, %v2592_v12  ;;  %v2465_v23 = vmul.f32 0.2, %v2209_v8  ;;  %1611 = vst.msk [vmem:[#allocation2 + $0x300] sm:$0xff] %vm1514_vm1, %v1383_v5 }
 0x156   : > { %v3394_v19 = vadd.f32 %v3393_v15, %v3392_v10  ;;  %v3783_v20 = vadd.f32 %v3782_v2, %v3781_v11  ;;  %v4671_v7 = vpop.f32.mrb[52].mxu0  ;;  %3233 = vst.msk [vmem:[%s5206_s26 + $0x98] sm:$0xf] %vm3194_vm3, %v4454_v17  ;;  %vm2335_vm14 = vcmp.ge.f32.partialorder %v2207_v9, 0.0  ;;  %v2463_v24 = vmul.f32 0.2, %v2207_v9 }
 0x157   : > { %1569 = vst.msk [vmem:[#allocation2 + $0x1b0] sm:$0xff] %vm1514_vm1, %v4671_v7  ;;  %v2590_v26 = vsel %vm2334_vm12, %v2206_v6, %v2462_v21  ;;  %vm2340_vm15 = vcmp.ge.f32.partialorder %v2212_v13, 0.0  ;;  %v2468_v27 = vmul.f32 0.2, %v2212_v13  ;;  %v1207_v29 = vpop.f32.mrb[53].mxu0  ;;  %v2593_v33 = vsel %vm2337_vm13, %v2209_v8, %v2465_v23  ;;  %v4716_v11 = vpop.f32.mrb[34].mxu1 }
 0x158   : > { %v3785_v25 = vadd.f32 %v3784_v16, %v3783_v20  ;;  %v4452_v30 = vpack.c.bf16 %v2590_v26, %v2590_v26  ;;  %v3395_v31 = vsel %vm1514_vm1, %v2590_v26, 0.0  ;;  %v3623_v32 = vmul.f32 %v2590_v26, %v2590_v26  ;;  %1567 = vst.msk [vmem:[#allocation2 + $0x1a0] sm:$0xff] %vm1514_vm1, %v1207_v29  ;;  %v4672_v34 = vpop.f32.mrb[54].mxu0  ;;  %v2079_v16 = vld [vmem:[#allocation2 + $0x160] sm:$0xff]  ;;  %1614 = vst.msk [vmem:[#allocation2 + $0x318] sm:$0xff] %vm1514_vm1, %v4716_v11  ;;  %v1386_v23 = vpop.f32.mrb[35].mxu1 }
 0x159   : > { %v3399_v37 = vsel %vm1514_vm1, %v2592_v12, 0.0  ;;  %v3396_v38 = vadd.f32 %v3395_v31, %v3394_v19  ;;  %v4455_v39 = vpack.c.bf16 %v2593_v33, %v2593_v33  ;;  %v3626_v40 = vmul.f32 %v2593_v33, %v2593_v33  ;;  %1570 = vst.msk [vmem:[#allocation2 + $0x1b8] sm:$0xff] %vm1514_vm1, %v4672_v34  ;;  %v1210_v41 = vpop.f32.mrb[55].mxu0  ;;  %1612 = vst.msk [vmem:[#allocation2 + $0x308] sm:$0xff] %vm1514_vm1, %v1386_v23  ;;  %v2086_v11 = vld [vmem:[#allocation2 + $0x198] sm:$0xff] }
 0x15a   : > { %3231 = vst.msk [vmem:[%s5206_s26 + $0x90] sm:$0xf] %vm3194_vm3, %v4452_v30  ;;  %v3786_v43 = vsel %vm1514_vm1, %v3623_v32, 0.0  ;;  %v2591_v44 = vsel %vm2335_vm14, %v2207_v9, %v2463_v24  ;;  %v5512_v45 = vsel %vm2340_vm15, %v2212_v13, %v2468_v27  ;;  %v2210_v46 = vadd.f32 %v5476_v54, %v2075_v28 }
 0x15b   : > { %1568 = vst.msk [vmem:[#allocation2 + $0x1a8] sm:$0xff] %vm1514_vm1, %v1210_v41  ;;  %v3790_v48 = vsel %vm1514_vm1, %v3625_v22, 0.0  ;;  %v3787_v49 = vadd.f32 %v3786_v43, %v3785_v25  ;;  %v4453_v50 = vpack.c.bf16 %v2591_v44, %v2591_v44  ;;  %v3397_v51 = vsel %vm1514_vm1, %v2591_v44, 0.0 }
 0x15c   : > { %3234 = vst.msk [vmem:[%s5206_s26 + $0x9c] sm:$0xf] %vm3194_vm3, %v4455_v39  ;;  %v3401_v55 = vsel %vm1514_vm1, %v2593_v33, 0.0  ;;  %v3398_v56 = vadd.f32 %v3397_v51, %v3396_v38  ;;  %v3624_v57 = vmul.f32 %v2591_v44, %v2591_v44  ;;  %v4458_v58 = vpack.c.bf16 %v5512_v45, %v5512_v45  ;;  %v2080_v38 = vld [vmem:[#allocation2 + $0x168] sm:$0xff]  ;;  %v2085_v44 = vld [vmem:[#allocation2 + $0x190] sm:$0xff] }
 0x15d   : > { %v3792_v59 = vsel %vm1514_vm1, %v3626_v40, 0.0  ;;  %3232 = vst.msk [vmem:[%s5206_s26 + $0x94] sm:$0xf] %vm3194_vm3, %v4453_v50  ;;  %vm2338_vm0 = vcmp.ge.f32.partialorder %v2210_v46, 0.0  ;;  %v2466_v60 = vmul.f32 0.2, %v2210_v46  ;;  %v2213_v61 = vadd.f32 %v5476_v54, %v2078_v47 }
 0x15e   : > { %v4675_v62 = vpop.f32.mrb[56].mxu0  ;;  %v3400_v0 = vadd.f32 %v3399_v37, %v3398_v56  ;;  %v3788_v1 = vsel %vm1514_vm1, %v3624_v57, 0.0  ;;  %3237 = vst.msk [vmem:[%s5206_s26 + $0xa8] sm:$0xf] %vm3194_vm3, %v4458_v58  ;;  %v2211_v2 = vadd.f32 %v5476_v54, %v2076_v52  ;;  %v2216_v3 = vadd.f32 %v5476_v54, %v2081_v53  ;;  %v2082_v37 = vld [vmem:[#allocation2 + $0x178] sm:$0xff]  ;;  %v4719_v57 = vpop.f32.mrb[36].mxu1 }
 0x15f   : > { %1573 = vst.msk [vmem:[#allocation2 + $0x1d0] sm:$0xff] %vm1514_vm1, %v4675_v62  ;;  %v1223_v4 = vpop.f32.mrb[57].mxu0  ;;  %v3789_v6 = vadd.f32 %v3788_v1, %v3787_v49  ;;  %v3629_v8 = vmul.f32 %v5512_v45, %v5512_v45  ;;  %v2594_v9 = vsel %vm2338_vm0, %v2210_v46, %v2466_v60  ;;  %vm2341_vm2 = vcmp.ge.f32.partialorder %v2213_v61, 0.0  ;;  %1617 = vst.msk [vmem:[#allocation2 + $0x330] sm:$0xff] %vm1514_vm1, %v4719_v57  ;;  %v1399_v62 = vpop.f32.mrb[37].mxu1 }
 0x160   : > { %1571 = vst.msk [vmem:[#allocation2 + $0x1c0] sm:$0xff] %vm1514_vm1, %v1223_v4  ;;  %v4676_v10 = vpop.f32.mrb[58].mxu0  ;;  %v3402_v12 = vadd.f32 %v3401_v55, %v3400_v0  ;;  %v4456_v13 = vpack.c.bf16 %v2594_v9, %v2594_v9  ;;  %v3403_v14 = vsel %vm1514_vm1, %v2594_v9, 0.0  ;;  %v3627_v15 = vmul.f32 %v2594_v9, %v2594_v9  ;;  %1615 = vst.msk [vmem:[#allocation2 + $0x320] sm:$0xff] %vm1514_vm1, %v1399_v62 }
 0x161   : > { %1574 = vst.msk [vmem:[#allocation2 + $0x1d8] sm:$0xff] %vm1514_vm1, %v4676_v10  ;;  %v1226_v17 = vpop.f32.mrb[59].mxu0  ;;  %v3791_v18 = vadd.f32 %v3790_v48, %v3789_v6  ;;  %v2469_v19 = vmul.f32 0.2, %v2213_v61  ;;  %vm2339_vm4 = vcmp.ge.f32.partialorder %v2211_v2, 0.0  ;;  %vm2344_vm5 = vcmp.ge.f32.partialorder %v2216_v3, 0.0 }
 0x162   : > { %v2467_v20 = vmul.f32 0.2, %v2211_v2  ;;  %1572 = vst.msk [vmem:[#allocation2 + $0x1c8] sm:$0xff] %vm1514_vm1, %v1226_v17  ;;  %v3404_v21 = vadd.f32 %v3403_v14, %v3402_v12  ;;  %v3794_v7 = vsel %vm1514_vm1, %v3627_v15, 0.0  ;;  %v2472_v22 = vmul.f32 0.2, %v2216_v3 }
 0x163   : > { %3235 = vst.msk [vmem:[%s5206_s26 + $0xa0] sm:$0xf] %vm3194_vm3, %v4456_v13  ;;  %v3793_v24 = vadd.f32 %v3792_v59, %v3791_v18  ;;  %v2597_v25 = vsel %vm2341_vm2, %v2213_v61, %v2469_v19  ;;  %v2214_v27 = vadd.f32 %v5476_v54, %v2079_v16  ;;  %v3407_v28 = vsel %vm1514_vm1, %v5512_v45, 0.0  ;;  %v2083_v45 = vld [vmem:[#allocation2 + $0x180] sm:$0xff] }
 0x164   : > { %v2595_v26 = vsel %vm2339_vm4, %v2211_v2, %v2467_v20  ;;  %v4459_v29 = vpack.c.bf16 %v2597_v25, %v2597_v25  ;;  %v3630_v30 = vmul.f32 %v2597_v25, %v2597_v25  ;;  %v2600_v36 = vsel %vm2344_vm5, %v2216_v3, %v2472_v22  ;;  %v4720_v3 = vpop.f32.mrb[38].mxu1 }
 0x165   : > { %v4457_v31 = vpack.c.bf16 %v2595_v26, %v2595_v26  ;;  %v3795_v32 = vadd.f32 %v3794_v7, %v3793_v24  ;;  %v3405_v33 = vsel %vm1514_vm1, %v2595_v26, 0.0  ;;  %v3628_v34 = vmul.f32 %v2595_v26, %v2595_v26  ;;  %1618 = vst.msk [vmem:[#allocation2 + $0x338] sm:$0xff] %vm1514_vm1, %v4720_v3 }
 0x166   : > { %v4679_v39 = vpop.f32.mrb[60].mxu0  ;;  %v3798_v40 = vsel %vm1514_vm1, %v3629_v8, 0.0  ;;  %3238 = vst.msk [vmem:[%s5206_s26 + $0xac] sm:$0xf] %vm3194_vm3, %v4459_v29  ;;  %v3409_v41 = vsel %vm1514_vm1, %v2597_v25, 0.0  ;;  %v3406_v42 = vadd.f32 %v3405_v33, %v3404_v21  ;;  %v4462_v43 = vpack.c.bf16 %v2600_v36, %v2600_v36  ;;  %v1402_v8 = vpop.f32.mrb[39].mxu1 }
 0x167   : > { %3236 = vst.msk [vmem:[%s5206_s26 + $0xa4] sm:$0xf] %vm3194_vm3, %v4457_v31  ;;  %v1239_v46 = vpop.f32.mrb[61].mxu0  ;;  %v3800_v47 = vsel %vm1514_vm1, %v3630_v30, 0.0  ;;  %v3796_v48 = vsel %vm1514_vm1, %v3628_v34, 0.0  ;;  %vm2342_vm6 = vcmp.ge.f32.partialorder %v2214_v27, 0.0  ;;  %v2217_v53 = vadd.f32 %v5476_v54, %v2082_v37 }
 0x168   : > { %1577 = vst.msk [vmem:[#allocation2 + $0x1f0] sm:$0xff] %vm1514_vm1, %v4679_v39  ;;  %v2470_v49 = vmul.f32 0.2, %v2214_v27  ;;  %1575 = vst.msk [vmem:[#allocation2 + $0x1e0] sm:$0xff] %vm1514_vm1, %v1239_v46  ;;  %v4680_v50 = vpop.f32.mrb[62].mxu0  ;;  %v3408_v51 = vadd.f32 %v3407_v28, %v3406_v42  ;;  %v3797_v52 = vadd.f32 %v3796_v48, %v3795_v32  ;;  %v2215_v55 = vadd.f32 %v5476_v54, %v2080_v38  ;;  %v2084_v30 = vld [vmem:[#allocation2 + $0x188] sm:$0xff] }
 0x169   : > { %3241 = vst.msk [vmem:[%s5206_s26 + $0xb8] sm:$0xf] %vm3194_vm3, %v4462_v43  ;;  %v1242_v56 = vpop.f32.mrb[63].mxu0  ;;  %v3415_v58 = vsel %vm1514_vm1, %v2600_v36, 0.0  ;;  %v2220_v60 = vadd.f32 %v5476_v54, %v2085_v44  ;;  %v2218_v61 = vadd.f32 %v5476_v54, %v2083_v45  ;;  %v3633_v4 = vmul.f32 %v2600_v36, %v2600_v36  ;;  %v4723_v31 = vpop.f32.mrb[40].mxu1  ;;  %v2089_v45 = vld [vmem:[#allocation2 + $0x1b0] sm:$0xff] }
 0x16a   : > { %1578 = vst.msk [vmem:[#allocation2 + $0x1f8] sm:$0xff] %vm1514_vm1, %v4680_v50  ;;  %v2598_v59 = vsel %vm2342_vm6, %v2214_v27, %v2470_v49  ;;  %1576 = vst.msk [vmem:[#allocation2 + $0x1e8] sm:$0xff] %vm1514_vm1, %v1242_v56  ;;  %v3410_v63 = vadd.f32 %v3409_v41, %v3408_v51  ;;  %v3799_v0 = vadd.f32 %v3798_v40, %v3797_v52  ;;  %vm2345_vm7 = vcmp.ge.f32.partialorder %v2217_v53, 0.0  ;;  %v1415_v40 = vpop.f32.mrb[41].mxu1  ;;  %v2087_v46 = vld [vmem:[#allocation2 + $0x1a0] sm:$0xff]  ;;  %v2090_v52 = vld [vmem:[#allocation2 + $0x1b8] sm:$0xff] }
 0x16b   : > { %v4460_v1 = vpack.c.bf16 %v2598_v59, %v2598_v59  ;;  %v3411_v2 = vsel %vm1514_vm1, %v2598_v59, 0.0  ;;  %v3631_v5 = vmul.f32 %v2598_v59, %v2598_v59  ;;  %v2473_v6 = vmul.f32 0.2, %v2217_v53  ;;  %1616 = vst.msk [vmem:[#allocation2 + $0x328] sm:$0xff] %vm1514_vm1, %v1402_v8  ;;  %1621 = vst.msk [vmem:[#allocation2 + $0x350] sm:$0xff] %vm1514_vm1, %v4723_v31 }
 0x16c   : > { %v3801_v9 = vadd.f32 %v3800_v47, %v3799_v0  ;;  %vm2343_vm8 = vcmp.ge.f32.partialorder %v2215_v55, 0.0  ;;  %v2471_v10 = vmul.f32 0.2, %v2215_v55  ;;  %vm2348_vm9 = vcmp.ge.f32.partialorder %v2220_v60, 0.0  ;;  %1619 = vst.msk [vmem:[#allocation2 + $0x340] sm:$0xff] %vm1514_vm1, %v1415_v40  ;;  %v4724_v47 = vpop.f32.mrb[42].mxu1 }
 0x16d   : > { %3239 = vst.msk [vmem:[%s5206_s26 + $0xb0] sm:$0xf] %vm3194_vm3, %v4460_v1  ;;  %v3412_v12 = vadd.f32 %v3411_v2, %v3410_v63  ;;  %v3802_v13 = vsel %vm1514_vm1, %v3631_v5, 0.0  ;;  %v2601_v14 = vsel %vm2345_vm7, %v2217_v53, %v2473_v6  ;;  %v2476_v15 = vmul.f32 0.2, %v2220_v60  ;;  %v2088_v53 = vld [vmem:[#allocation2 + $0x1a8] sm:$0xff] }
 0x16e   : > { %v3803_v16 = vadd.f32 %v3802_v13, %v3801_v9  ;;  %v4463_v17 = vpack.c.bf16 %v2601_v14, %v2601_v14  ;;  %v3634_v18 = vmul.f32 %v2601_v14, %v2601_v14  ;;  %vm2346_vm10 = vcmp.ge.f32.partialorder %v2218_v61, 0.0  ;;  %1622 = vst.msk [vmem:[#allocation2 + $0x358] sm:$0xff] %vm1514_vm1, %v4724_v47 }
 0x16f   : > { %v2599_v19 = vsel %vm2343_vm8, %v2215_v55, %v2471_v10  ;;  %v2604_v20 = vsel %vm2348_vm9, %v2220_v60, %v2476_v15  ;;  %v2474_v21 = vmul.f32 0.2, %v2218_v61  ;;  %v2221_v7 = vadd.f32 %v5476_v54, %v2086_v11  ;;  %v1418_v55 = vpop.f32.mrb[43].mxu1 }
 0x170   : > { %v3806_v22 = vsel %vm1514_vm1, %v3633_v4, 0.0  ;;  %3242 = vst.msk [vmem:[%s5206_s26 + $0xbc] sm:$0xf] %vm3194_vm3, %v4463_v17  ;;  %v4461_v23 = vpack.c.bf16 %v2599_v19, %v2599_v19  ;;  %v3413_v24 = vsel %vm1514_vm1, %v2599_v19, 0.0  ;;  %v3632_v25 = vmul.f32 %v2599_v19, %v2599_v19  ;;  %v4727_v17 = vpop.f32.mrb[44].mxu1 }
 0x171   : > { %v3417_v26 = vsel %vm1514_vm1, %v2601_v14, 0.0  ;;  %v3414_v27 = vadd.f32 %v3413_v24, %v3412_v12  ;;  %v4466_v28 = vpack.c.bf16 %v2604_v20, %v2604_v20  ;;  %v3637_v29 = vmul.f32 %v2604_v20, %v2604_v20  ;;  %1620 = vst.msk [vmem:[#allocation2 + $0x348] sm:$0xff] %vm1514_vm1, %v1418_v55  ;;  %1625 = vst.msk [vmem:[#allocation2 + $0x370] sm:$0xff] %vm1514_vm1, %v4727_v17 }
 0x172   : > { %3240 = vst.msk [vmem:[%s5206_s26 + $0xb4] sm:$0xf] %vm3194_vm3, %v4461_v23  ;;  %v3804_v32 = vsel %vm1514_vm1, %v3632_v25, 0.0  ;;  %v2602_v33 = vsel %vm2346_vm10, %v2218_v61, %v2474_v21  ;;  %vm2349_vm11 = vcmp.ge.f32.partialorder %v2221_v7, 0.0  ;;  %v2477_v34 = vmul.f32 0.2, %v2221_v7 }
 0x173   : > { %v3808_v36 = vsel %vm1514_vm1, %v3634_v18, 0.0  ;;  %v3416_v37 = vadd.f32 %v3415_v58, %v3414_v27  ;;  %v3805_v38 = vadd.f32 %v3804_v32, %v3803_v16  ;;  %3245 = vst.msk [vmem:[%s5206_s26 + $0xc8] sm:$0xf] %vm3194_vm3, %v4466_v28  ;;  %v4464_v39 = vpack.c.bf16 %v2602_v33, %v2602_v33  ;;  %v1431_v21 = vpop.f32.mrb[45].mxu1  ;;  %v2093_v25 = vld [vmem:[#allocation2 + $0x1d0] sm:$0xff] }
 0x174   : > { %v3419_v41 = vsel %vm1514_vm1, %v2602_v33, 0.0  ;;  %v3635_v42 = vmul.f32 %v2602_v33, %v2602_v33  ;;  %v2605_v43 = vsel %vm2349_vm11, %v2221_v7, %v2477_v34  ;;  %v2219_v44 = vadd.f32 %v5476_v54, %v2084_v30  ;;  %1623 = vst.msk [vmem:[#allocation2 + $0x360] sm:$0xff] %vm1514_vm1, %v1431_v21 }
 0x175   : > { %v3418_v48 = vadd.f32 %v3417_v26, %v3416_v37  ;;  %v3807_v49 = vadd.f32 %v3806_v22, %v3805_v38  ;;  %v3423_v50 = vsel %vm1514_vm1, %v2604_v20, 0.0  ;;  %3243 = vst.msk [vmem:[%s5206_s26 + $0xc0] sm:$0xf] %vm3194_vm3, %v4464_v39  ;;  %v4467_v51 = vpack.c.bf16 %v2605_v43, %v2605_v43  ;;  %v4728_v26 = vpop.f32.mrb[46].mxu1 }
 0x176   : > { %v3814_v56 = vsel %vm1514_vm1, %v3637_v29, 0.0  ;;  %v3810_v57 = vsel %vm1514_vm1, %v3635_v42, 0.0  ;;  %vm2347_vm12 = vcmp.ge.f32.partialorder %v2219_v44, 0.0  ;;  %v2475_v58 = vmul.f32 0.2, %v2219_v44  ;;  %1626 = vst.msk [vmem:[#allocation2 + $0x378] sm:$0xff] %vm1514_vm1, %v4728_v26 }
 0x177   : > { %v3809_v59 = vadd.f32 %v3808_v36, %v3807_v49  ;;  %v3420_v60 = vadd.f32 %v3419_v41, %v3418_v48  ;;  %3246 = vst.msk [vmem:[%s5206_s26 + $0xcc] sm:$0xf] %vm3194_vm3, %v4467_v51  ;;  %v2224_v61 = vadd.f32 %v5476_v54, %v2089_v45  ;;  %v2222_v62 = vadd.f32 %v5476_v54, %v2087_v46  ;;  %v1434_v31 = vpop.f32.mrb[47].mxu1  ;;  %v2091_v41 = vld [vmem:[#allocation2 + $0x1c0] sm:$0xff]  ;;  %v2094_v42 = vld [vmem:[#allocation2 + $0x1d8] sm:$0xff]  ;;  %v2097_v48 = vld [vmem:[#allocation2 + $0x1f0] sm:$0xff] }
 0x178   : > { %v3638_v63 = vmul.f32 %v2605_v43, %v2605_v43  ;;  %v2603_v0 = vsel %vm2347_vm12, %v2219_v44, %v2475_v58  ;;  %v2225_v1 = vadd.f32 %v5476_v54, %v2090_v52  ;;  %v2223_v2 = vadd.f32 %v5476_v54, %v2088_v53  ;;  %1624 = vst.msk [vmem:[#allocation2 + $0x368] sm:$0xff] %vm1514_vm1, %v1434_v31  ;;  %v2098_v26 = vld [vmem:[#allocation2 + $0x1f8] sm:$0xff]  ;;  %v2096_v31 = vld [vmem:[#allocation2 + $0x1e8] sm:$0xff] }
 0x179   : > { %v3811_v3 = vadd.f32 %v3810_v57, %v3809_v59  ;;  %v4465_v4 = vpack.c.bf16 %v2603_v0, %v2603_v0  ;;  %v3421_v5 = vsel %vm1514_vm1, %v2603_v0, 0.0  ;;  %v3636_v6 = vmul.f32 %v2603_v0, %v2603_v0 }
 0x17a   : > { %v3422_v8 = vadd.f32 %v3421_v5, %v3420_v60  ;;  %vm2352_vm13 = vcmp.ge.f32.partialorder %v2224_v61, 0.0  ;;  %v2480_v9 = vmul.f32 0.2, %v2224_v61  ;;  %vm2350_vm14 = vcmp.ge.f32.partialorder %v2222_v62, 0.0 }
 0x17b   : > { %v3425_v10 = vsel %vm1514_vm1, %v2605_v43, 0.0  ;;  %3244 = vst.msk [vmem:[%s5206_s26 + $0xc4] sm:$0xf] %vm3194_vm3, %v4465_v4  ;;  %v3812_v11 = vsel %vm1514_vm1, %v3636_v6, 0.0  ;;  %v2478_v12 = vmul.f32 0.2, %v2222_v62  ;;  %v2228_v40 = vadd.f32 %v5476_v54, %v2093_v25 }
 0x17c   : > { %v2481_v13 = vmul.f32 0.2, %v2225_v1  ;;  %v3424_v14 = vadd.f32 %v3423_v50, %v3422_v8  ;;  %v3813_v15 = vadd.f32 %v3812_v11, %v3811_v3  ;;  %v2608_v16 = vsel %vm2352_vm13, %v2224_v61, %v2480_v9  ;;  %v2092_v43 = vld [vmem:[#allocation2 + $0x1c8] sm:$0xff]  ;;  %v4731_v61 = vpop.f32.mrb[48].mxu1 }
 0x17d   : > { %vm2353_vm15 = vcmp.ge.f32.partialorder %v2225_v1, 0.0  ;;  %v3816_v18 = vsel %vm1514_vm1, %v3638_v63, 0.0  ;;  %v4470_v19 = vpack.c.bf16 %v2608_v16, %v2608_v16  ;;  %v2606_v20 = vsel %vm2350_vm14, %v2222_v62, %v2478_v12  ;;  %1629 = vst.msk [vmem:[#allocation2 + $0x390] sm:$0xff] %vm1514_vm1, %v4731_v61 }
 0x17e   : > { %vm2351_vm0 = vcmp.ge.f32.partialorder %v2223_v2, 0.0  ;;  %v3426_v7 = vadd.f32 %v3425_v10, %v3424_v14  ;;  %v3815_v22 = vadd.f32 %v3814_v56, %v3813_v15  ;;  %v4468_v23 = vpack.c.bf16 %v2606_v20, %v2606_v20 }
 0x17f   : > { %v3427_v24 = vsel %vm1514_vm1, %v2606_v20, 0.0  ;;  %3249 = vst.msk [vmem:[%s5206_s26 + $0xd8] sm:$0xf] %vm3194_vm3, %v4470_v19  ;;  %v3641_v27 = vmul.f32 %v2608_v16, %v2608_v16  ;;  %v3639_v28 = vmul.f32 %v2606_v20, %v2606_v20  ;;  %v2609_v29 = vsel %vm2353_vm15, %v2225_v1, %v2481_v13  ;;  %v1447_v1 = vpop.f32.mrb[49].mxu1  ;;  %v2095_v13 = vld [vmem:[#allocation2 + $0x1e0] sm:$0xff] }
 0x180   : > { %v2479_v30 = vmul.f32 0.2, %v2223_v2  ;;  %v3817_v32 = vadd.f32 %v3816_v18, %v3815_v22  ;;  %v3431_v33 = vsel %vm1514_vm1, %v2608_v16, 0.0  ;;  %3247 = vst.msk [vmem:[%s5206_s26 + $0xd0] sm:$0xf] %vm3194_vm3, %v4468_v23  ;;  %v3428_v34 = vadd.f32 %v3427_v24, %v3426_v7  ;;  %v4732_v5 = vpop.f32.mrb[50].mxu1 }
 0x181   : > { %v4471_v36 = vpack.c.bf16 %v2609_v29, %v2609_v29  ;;  %v3818_v37 = vsel %vm1514_vm1, %v3639_v28, 0.0  ;;  %v3642_v38 = vmul.f32 %v2609_v29, %v2609_v29  ;;  %v3822_v49 = vsel %vm1514_vm1, %v3641_v27, 0.0  ;;  %1627 = vst.msk [vmem:[#allocation2 + $0x380] sm:$0xff] %vm1514_vm1, %v1447_v1  ;;  %1630 = vst.msk [vmem:[#allocation2 + $0x398] sm:$0xff] %vm1514_vm1, %v4732_v5  ;;  %v1450_v14 = vpop.f32.mrb[51].mxu1 }
 0x182   : > { %v2607_v39 = vsel %vm2351_vm0, %v2223_v2, %v2479_v30  ;;  %v3819_v44 = vadd.f32 %v3818_v37, %v3817_v32  ;;  %vm2356_vm2 = vcmp.ge.f32.partialorder %v2228_v40, 0.0  ;;  %v2484_v51 = vmul.f32 0.2, %v2228_v40  ;;  %1628 = vst.msk [vmem:[#allocation2 + $0x388] sm:$0xff] %vm1514_vm1, %v1450_v14 }
 0x183   : > { %3250 = vst.msk [vmem:[%s5206_s26 + $0xdc] sm:$0xf] %vm3194_vm3, %v4471_v36  ;;  %v4469_v45 = vpack.c.bf16 %v2607_v39, %v2607_v39  ;;  %v3429_v46 = vsel %vm1514_vm1, %v2607_v39, 0.0  ;;  %v3640_v47 = vmul.f32 %v2607_v39, %v2607_v39  ;;  %v2226_v53 = vadd.f32 %v5476_v54, %v2091_v41 }
 0x184   : > { %v3430_v50 = vadd.f32 %v3429_v46, %v3428_v34  ;;  %v2229_v55 = vadd.f32 %v5476_v54, %v2094_v42  ;;  %v2227_v56 = vadd.f32 %v5476_v54, %v2092_v43  ;;  %v2612_v59 = vsel %vm2356_vm2, %v2228_v40, %v2484_v51  ;;  %v4735_v40 = vpop.f32.mrb[52].mxu1 }
 0x185   : > { %3248 = vst.msk [vmem:[%s5206_s26 + $0xd4] sm:$0xf] %vm3194_vm3, %v4469_v45  ;;  %v3820_v52 = vsel %vm1514_vm1, %v3640_v47, 0.0  ;;  %v2232_v60 = vadd.f32 %v5476_v54, %v2097_v48  ;;  %v3433_v62 = vsel %vm1514_vm1, %v2609_v29, 0.0  ;;  %v3824_v63 = vsel %vm1514_vm1, %v3642_v38, 0.0  ;;  %v1463_v45 = vpop.f32.mrb[53].mxu1 }
 0x186   : > { %v3432_v57 = vadd.f32 %v3431_v33, %v3430_v50  ;;  %v3821_v58 = vadd.f32 %v3820_v52, %v3819_v44  ;;  %v4474_v0 = vpack.c.bf16 %v2612_v59, %v2612_v59  ;;  %vm2354_vm4 = vcmp.ge.f32.partialorder %v2226_v53, 0.0  ;;  %1633 = vst.msk [vmem:[#allocation2 + $0x3b0] sm:$0xff] %vm1514_vm1, %v4735_v40  ;;  %1631 = vst.msk [vmem:[#allocation2 + $0x3a0] sm:$0xff] %vm1514_vm1, %v1463_v45 }
 0x187   : > { %v2482_v3 = vmul.f32 0.2, %v2226_v53  ;;  %vm2357_vm5 = vcmp.ge.f32.partialorder %v2229_v55, 0.0  ;;  %v3645_v6 = vmul.f32 %v2612_v59, %v2612_v59  ;;  %v2485_v8 = vmul.f32 0.2, %v2229_v55 }
 0x188   : > { %v3823_v2 = vadd.f32 %v3822_v49, %v3821_v58  ;;  %v3434_v4 = vadd.f32 %v3433_v62, %v3432_v57  ;;  %3253 = vst.msk [vmem:[%s5206_s26 + $0xe8] sm:$0xf] %vm3194_vm3, %v4474_v0  ;;  %vm2355_vm6 = vcmp.ge.f32.partialorder %v2227_v56, 0.0  ;;  %v2483_v9 = vmul.f32 0.2, %v2227_v56  ;;  %v4736_v49 = vpop.f32.mrb[54].mxu1 }
 0x189   : > { %v2610_v10 = vsel %vm2354_vm4, %v2226_v53, %v2482_v3  ;;  %vm2360_vm7 = vcmp.ge.f32.partialorder %v2232_v60, 0.0  ;;  %v2488_v12 = vmul.f32 0.2, %v2232_v60  ;;  %v2613_v18 = vsel %vm2357_vm5, %v2229_v55, %v2485_v8  ;;  %v2099_v55 = vld [vmem:[#allocation2 + $0x200] sm:$0xff]  ;;  %1634 = vst.msk [vmem:[#allocation2 + $0x3b8] sm:$0xff] %vm1514_vm1, %v4736_v49 }
 0x18a   : > { %v3825_v11 = vadd.f32 %v3824_v63, %v3823_v2  ;;  %v4472_v15 = vpack.c.bf16 %v2610_v10, %v2610_v10  ;;  %v3435_v16 = vsel %vm1514_vm1, %v2610_v10, 0.0  ;;  %v3643_v17 = vmul.f32 %v2610_v10, %v2610_v10 }
 0x18b   : > { %v3439_v19 = vsel %vm1514_vm1, %v2612_v59, 0.0  ;;  %v3436_v20 = vadd.f32 %v3435_v16, %v3434_v4  ;;  %v4475_v21 = vpack.c.bf16 %v2613_v18, %v2613_v18  ;;  %v3646_v7 = vmul.f32 %v2613_v18, %v2613_v18 }
 0x18c   : > { %3251 = vst.msk [vmem:[%s5206_s26 + $0xe0] sm:$0xf] %vm3194_vm3, %v4472_v15  ;;  %v3826_v22 = vsel %vm1514_vm1, %v3643_v17, 0.0  ;;  %v2611_v23 = vsel %vm2355_vm6, %v2227_v56, %v2483_v9  ;;  %v2616_v24 = vsel %vm2360_vm7, %v2232_v60, %v2488_v12  ;;  %v2230_v25 = vadd.f32 %v5476_v54, %v2095_v13  ;;  %v1466_v56 = vpop.f32.mrb[55].mxu1  ;;  %v2102_v60 = vld [vmem:[#allocation2 + $0x218] sm:$0xff] }
 0x18d   : > { %v3830_v27 = vsel %vm1514_vm1, %v3645_v6, 0.0  ;;  %v3827_v28 = vadd.f32 %v3826_v22, %v3825_v11  ;;  %3254 = vst.msk [vmem:[%s5206_s26 + $0xec] sm:$0xf] %vm3194_vm3, %v4475_v21  ;;  %v4473_v29 = vpack.c.bf16 %v2611_v23, %v2611_v23  ;;  %v3437_v30 = vsel %vm1514_vm1, %v2611_v23, 0.0  ;;  %v4739_v13 = vpop.f32.mrb[56].mxu1 }
 0x18e   : > { %v3441_v32 = vsel %vm1514_vm1, %v2613_v18, 0.0  ;;  %v3438_v33 = vadd.f32 %v3437_v30, %v3436_v20  ;;  %v3644_v34 = vmul.f32 %v2611_v23, %v2611_v23  ;;  %v4478_v36 = vpack.c.bf16 %v2616_v24, %v2616_v24  ;;  %1632 = vst.msk [vmem:[#allocation2 + $0x3a8] sm:$0xff] %vm1514_vm1, %v1466_v56  ;;  %v2100_v18 = vld [vmem:[#allocation2 + $0x208] sm:$0xff]  ;;  %1637 = vst.msk [vmem:[#allocation2 + $0x3d0] sm:$0xff] %vm1514_vm1, %v4739_v13  ;;  %v1479_v20 = vpop.f32.mrb[57].mxu1 }
 0x18f   : > { %v3832_v37 = vsel %vm1514_vm1, %v3646_v7, 0.0  ;;  %3252 = vst.msk [vmem:[%s5206_s26 + $0xe4] sm:$0xf] %vm3194_vm3, %v4473_v29  ;;  %vm2358_vm8 = vcmp.ge.f32.partialorder %v2230_v25, 0.0  ;;  %v2486_v38 = vmul.f32 0.2, %v2230_v25  ;;  %v2233_v39 = vadd.f32 %v5476_v54, %v2098_v26 }
 0x190   : > { %v3440_v41 = vadd.f32 %v3439_v19, %v3438_v33  ;;  %v3828_v42 = vsel %vm1514_vm1, %v3644_v34, 0.0  ;;  %3257 = vst.msk [vmem:[%s5206_s26 + $0xf8] sm:$0xf] %vm3194_vm3, %v4478_v36  ;;  %v3447_v43 = vsel %vm1514_vm1, %v2616_v24, 0.0  ;;  %v2231_v44 = vadd.f32 %v5476_v54, %v2096_v31  ;;  %v2105_v19 = vld [vmem:[#allocation2 + $0x230] sm:$0xff]  ;;  %v4740_v22 = vpop.f32.mrb[58].mxu1 }
 0x191   : > { %v3829_v46 = vadd.f32 %v3828_v42, %v3827_v28  ;;  %v3649_v47 = vmul.f32 %v2616_v24, %v2616_v24  ;;  %v2614_v48 = vsel %vm2358_vm8, %v2230_v25, %v2486_v38  ;;  %vm2361_vm9 = vcmp.ge.f32.partialorder %v2233_v39, 0.0  ;;  %1635 = vst.msk [vmem:[#allocation2 + $0x3c0] sm:$0xff] %vm1514_vm1, %v1479_v20  ;;  %1638 = vst.msk [vmem:[#allocation2 + $0x3d8] sm:$0xff] %vm1514_vm1, %v4740_v22  ;;  %v1482_v30 = vpop.f32.mrb[59].mxu1  ;;  %v2107_v22 = vld [vmem:[#allocation2 + $0x240] sm:$0xff] }
 0x192   : > { %v4476_v50 = vpack.c.bf16 %v2614_v48, %v2614_v48  ;;  %v3442_v51 = vadd.f32 %v3441_v32, %v3440_v41  ;;  %v3443_v52 = vsel %vm1514_vm1, %v2614_v48, 0.0  ;;  %v3647_v53 = vmul.f32 %v2614_v48, %v2614_v48  ;;  %1636 = vst.msk [vmem:[#allocation2 + $0x3c8] sm:$0xff] %vm1514_vm1, %v1482_v30  ;;  %v2104_v48 = vld [vmem:[#allocation2 + $0x228] sm:$0xff]  ;;  %v4743_v49 = vpop.f32.mrb[60].mxu1 }
 0x193   : > { %v3831_v57 = vadd.f32 %v3830_v27, %v3829_v46  ;;  %v2489_v58 = vmul.f32 0.2, %v2233_v39  ;;  %vm2359_vm10 = vcmp.ge.f32.partialorder %v2231_v44, 0.0  ;;  %v2487_v59 = vmul.f32 0.2, %v2231_v44  ;;  %1641 = vst.msk [vmem:[#allocation2 + $0x3f0] sm:$0xff] %vm1514_vm1, %v4743_v49 }
 0x194   : > { %3255 = vst.msk [vmem:[%s5206_s26 + $0xf0] sm:$0xf] %vm3194_vm3, %v4476_v50  ;;  %v3444_v61 = vadd.f32 %v3443_v52, %v3442_v51  ;;  %v3834_v62 = vsel %vm1514_vm1, %v3647_v53, 0.0  ;;  %vm2364_vm11 = vcmp.ge.f32.partialorder %v5292_v35, 0.0  ;;  %v2492_v63 = vmul.f32 0.2, %v5292_v35 }
 0x195   : > { %v3833_v0 = vadd.f32 %v3832_v37, %v3831_v57  ;;  %v2617_v1 = vsel %vm2361_vm9, %v2233_v39, %v2489_v58  ;;  %v2615_v2 = vsel %vm2359_vm10, %v2231_v44, %v2487_v59  ;;  %v2234_v3 = vadd.f32 %v5476_v54, %v2099_v55  ;;  %v1495_v55 = vpop.f32.mrb[61].mxu1 }
 0x196   : > { %v4479_v4 = vpack.c.bf16 %v2617_v1, %v2617_v1  ;;  %v3650_v5 = vmul.f32 %v2617_v1, %v2617_v1  ;;  %v4477_v6 = vpack.c.bf16 %v2615_v2, %v2615_v2  ;;  %v2237_v8 = vadd.f32 %v5476_v54, %v2102_v60  ;;  %v2109_v60 = vld [vmem:[#allocation2 + $0x250] sm:$0xff]  ;;  %1639 = vst.msk [vmem:[#allocation2 + $0x3e0] sm:$0xff] %vm1514_vm1, %v1495_v55 }
 0x197   : > { %v3835_v9 = vadd.f32 %v3834_v62, %v3833_v0  ;;  %v3445_v10 = vsel %vm1514_vm1, %v2615_v2, 0.0  ;;  %v3648_v11 = vmul.f32 %v2615_v2, %v2615_v2  ;;  %v2620_v12 = vsel %vm2364_vm11, %v5292_v35, %v2492_v63 }
 0x198   : > { %v3838_v14 = vsel %vm1514_vm1, %v3649_v47, 0.0  ;;  %3258 = vst.msk [vmem:[%s5206_s26 + $0xfc] sm:$0xf] %vm3194_vm3, %v4479_v4  ;;  %v3449_v15 = vsel %vm1514_vm1, %v2617_v1, 0.0  ;;  %3256 = vst.msk [vmem:[%s5206_s26 + $0xf4] sm:$0xf] %vm3194_vm3, %v4477_v6  ;;  %v3446_v16 = vadd.f32 %v3445_v10, %v3444_v61  ;;  %v4482_v17 = vpack.c.bf16 %v2620_v12, %v2620_v12 }
 0x199   : > { %v3840_v21 = vsel %vm1514_vm1, %v3650_v5, 0.0  ;;  %v3836_v35 = vsel %vm1514_vm1, %v3648_v11, 0.0  ;;  %vm2362_vm12 = vcmp.ge.f32.partialorder %v2234_v3, 0.0  ;;  %v2490_v7 = vmul.f32 0.2, %v2234_v3  ;;  %v2106_v47 = vld [vmem:[#allocation2 + $0x238] sm:$0xff] }
 0x19a   : > { %v3448_v23 = vadd.f32 %v3447_v43, %v3446_v16  ;;  %v3837_v24 = vadd.f32 %v3836_v35, %v3835_v9  ;;  %3261 = vst.msk [vmem:[%s5206_s26 + $0x108] sm:$0xf] %vm3194_vm3, %v4482_v17  ;;  %vm2365_vm13 = vcmp.ge.f32.partialorder %v2237_v8, 0.0  ;;  %v2493_v25 = vmul.f32 0.2, %v2237_v8  ;;  %v2103_v43 = vld [vmem:[#allocation2 + $0x220] sm:$0xff] }
 0x19b   : > { %v3653_v26 = vmul.f32 %v2620_v12, %v2620_v12  ;;  %v2618_v27 = vsel %vm2362_vm12, %v2234_v3, %v2490_v7  ;;  %v2235_v28 = vadd.f32 %v5476_v54, %v2100_v18  ;;  %v2240_v29 = vadd.f32 %v5476_v54, %v2105_v19  ;;  %v4744_v1 = vpop.f32.mrb[62].mxu1 }
 0x19c   : > { %v3839_v31 = vadd.f32 %v3838_v14, %v3837_v24  ;;  %v4480_v32 = vpack.c.bf16 %v2618_v27, %v2618_v27  ;;  %v3450_v33 = vadd.f32 %v3449_v15, %v3448_v23  ;;  %v3451_v34 = vsel %vm1514_vm1, %v2618_v27, 0.0  ;;  %1642 = vst.msk [vmem:[#allocation2 + $0x3f8] sm:$0xff] %vm1514_vm1, %v4744_v1  ;;  %v1498_v5 = vpop.f32.mrb[63].mxu1  ;;  %v2111_v1 = vld [vmem:[#allocation2 + $0x260] sm:$0xff] }
 0x19d   : > { %v3651_v36 = vmul.f32 %v2618_v27, %v2618_v27  ;;  %v2621_v37 = vsel %vm2365_vm13, %v2237_v8, %v2493_v25  ;;  %vm2363_vm14 = vcmp.ge.f32.partialorder %v2235_v28, 0.0  ;;  %v2491_v38 = vmul.f32 0.2, %v2235_v28  ;;  %1640 = vst.msk [vmem:[#allocation2 + $0x3e8] sm:$0xff] %vm1514_vm1, %v1498_v5  ;;  %v2108_v27 = vld [vmem:[#allocation2 + $0x248] sm:$0xff]  ;;  %v2114_v5 = vld [vmem:[#allocation2 + $0x278] sm:$0xff] }
 0x19e   : > { %v3455_v39 = vsel %vm1514_vm1, %v2620_v12, 0.0  ;;  %3259 = vst.msk [vmem:[%s5206_s26 + $0x100] sm:$0xf] %vm3194_vm3, %v4480_v32  ;;  %v3452_v40 = vadd.f32 %v3451_v34, %v3450_v33  ;;  %v3841_v41 = vadd.f32 %v3840_v21, %v3839_v31  ;;  %v4483_v42 = vpack.c.bf16 %v2621_v37, %v2621_v37 }
 0x19f   : > { %v3842_v44 = vsel %vm1514_vm1, %v3651_v36, 0.0  ;;  %v3654_v45 = vmul.f32 %v2621_v37, %v2621_v37  ;;  %v2619_v46 = vsel %vm2363_vm14, %v2235_v28, %v2491_v38  ;;  %vm2368_vm15 = vcmp.ge.f32.partialorder %v2240_v29, 0.0  ;;  %v5740_v36 = vld [vmem:[%s6188_s2] ss:$0 sm:$0xff]  ;;  %v2113_v38 = vld [vmem:[#allocation2 + $0x270] sm:$0xff] }
 0x1a0   : > { %v3843_v50 = vadd.f32 %v3842_v44, %v3841_v41  ;;  %3262 = vst.msk [vmem:[%s5206_s26 + $0x10c] sm:$0xf] %vm3194_vm3, %v4483_v42  ;;  %v4481_v51 = vpack.c.bf16 %v2619_v46, %v2619_v46  ;;  %v3453_v52 = vsel %vm1514_vm1, %v2619_v46, 0.0  ;;  %v3652_v53 = vmul.f32 %v2619_v46, %v2619_v46 }
 0x1a1   : > { %v3846_v56 = vsel %vm1514_vm1, %v3653_v26, 0.0  ;;  %v3454_v57 = vadd.f32 %v3453_v52, %v3452_v40  ;;  %v2496_v58 = vmul.f32 0.2, %v2240_v29  ;;  %v2238_v59 = vadd.f32 %v5476_v54, %v2103_v43  ;;  %v2110_v26 = vld [vmem:[#allocation2 + $0x258] sm:$0xff] }
 0x1a2   : > { %v3457_v61 = vsel %vm1514_vm1, %v2621_v37, 0.0  ;;  %3260 = vst.msk [vmem:[%s5206_s26 + $0x104] sm:$0xf] %vm3194_vm3, %v4481_v51  ;;  %v3844_v62 = vsel %vm1514_vm1, %v3652_v53, 0.0  ;;  %v2241_v63 = vadd.f32 %v5476_v54, %v2106_v47  ;;  %v2239_v0 = vadd.f32 %v5476_v54, %v2104_v48 }
 0x1a3   : > { %v3456_v2 = vadd.f32 %v3455_v39, %v3454_v57  ;;  %v3845_v3 = vadd.f32 %v3844_v62, %v3843_v50  ;;  %v2624_v4 = vsel %vm2368_vm15, %v2240_v29, %v2496_v58  ;;  %vm2366_vm0 = vcmp.ge.f32.partialorder %v2238_v59, 0.0 }
 0x1a4   : > { %v3848_v6 = vsel %vm1514_vm1, %v3654_v45, 0.0  ;;  %v4486_v8 = vpack.c.bf16 %v2624_v4, %v2624_v4  ;;  %v2494_v9 = vmul.f32 0.2, %v2238_v59  ;;  %v2244_v10 = vadd.f32 %v5476_v54, %v2109_v60 }
 0x1a5   : > { %v3847_v11 = vadd.f32 %v3846_v56, %v3845_v3  ;;  %v3458_v12 = vadd.f32 %v3457_v61, %v3456_v2  ;;  %vm2369_vm2 = vcmp.ge.f32.partialorder %v2241_v63, 0.0  ;;  %v2497_v13 = vmul.f32 0.2, %v2241_v63 }
 0x1a6   : > { %3265 = vst.msk [vmem:[%s5206_s26 + $0x118] sm:$0xf] %vm3194_vm3, %v4486_v8  ;;  %v3657_v14 = vmul.f32 %v2624_v4, %v2624_v4  ;;  %v2622_v15 = vsel %vm2366_vm0, %v2238_v59, %v2494_v9  ;;  %vm2367_vm4 = vcmp.ge.f32.partialorder %v2239_v0, 0.0  ;;  %v2495_v16 = vmul.f32 0.2, %v2239_v0 }
 0x1a7   : > { %v4484_v17 = vpack.c.bf16 %v2622_v15, %v2622_v15  ;;  %v3459_v18 = vsel %vm1514_vm1, %v2622_v15, 0.0  ;;  %v3655_v19 = vmul.f32 %v2622_v15, %v2622_v15  ;;  %v3849_v20 = vadd.f32 %v3848_v6, %v3847_v11  ;;  %v2112_v6 = vld [vmem:[#allocation2 + $0x268] sm:$0xff] }
 0x1a8   : > { %v3463_v54 = vsel %vm1514_vm1, %v2624_v4, 0.0  ;;  %v3460_v21 = vadd.f32 %v3459_v18, %v3458_v12  ;;  %v2625_v35 = vsel %vm2369_vm2, %v2241_v63, %v2497_v13  ;;  %v2623_v7 = vsel %vm2367_vm4, %v2239_v0, %v2495_v16  ;;  %v2117_v16 = vld [vmem:[#allocation2 + $0x290] sm:$0xff] }
 0x1a9   : > { %3263 = vst.msk [vmem:[%s5206_s26 + $0x110] sm:$0xf] %vm3194_vm3, %v4484_v17  ;;  %v3850_v23 = vsel %vm1514_vm1, %v3655_v19, 0.0  ;;  %v4487_v24 = vpack.c.bf16 %v2625_v35, %v2625_v35  ;;  %v3658_v25 = vmul.f32 %v2625_v35, %v2625_v35  ;;  %vm2372_vm5 = vcmp.ge.f32.partialorder %v2244_v10, 0.0 }
 0x1aa   : > { %v3851_v28 = vadd.f32 %v3850_v23, %v3849_v20  ;;  %v4485_v29 = vpack.c.bf16 %v2623_v7, %v2623_v7  ;;  %v3461_v30 = vsel %vm1514_vm1, %v2623_v7, 0.0  ;;  %v3656_v31 = vmul.f32 %v2623_v7, %v2623_v7 }
 0x1ab   : > { %v3854_v32 = vsel %vm1514_vm1, %v3657_v14, 0.0  ;;  %3266 = vst.msk [vmem:[%s5206_s26 + $0x11c] sm:$0xf] %vm3194_vm3, %v4487_v24  ;;  %v3462_v33 = vadd.f32 %v3461_v30, %v3460_v21  ;;  %v2500_v34 = vmul.f32 0.2, %v2244_v10  ;;  %v2242_v37 = vadd.f32 %v5740_v36, %v2107_v22 }
 0x1ac   : > { %v3465_v39 = vsel %vm1514_vm1, %v2625_v35, 0.0  ;;  %3264 = vst.msk [vmem:[%s5206_s26 + $0x114] sm:$0xf] %vm3194_vm3, %v4485_v29  ;;  %v3852_v40 = vsel %vm1514_vm1, %v3656_v31, 0.0  ;;  %v2245_v41 = vadd.f32 %v5740_v36, %v2110_v26  ;;  %v2243_v42 = vadd.f32 %v5740_v36, %v2108_v27 }
 0x1ad   : > { %v3464_v43 = vadd.f32 %v3463_v54, %v3462_v33  ;;  %v3853_v44 = vadd.f32 %v3852_v40, %v3851_v28  ;;  %v2628_v45 = vsel %vm2372_vm5, %v2244_v10, %v2500_v34  ;;  %vm2370_vm6 = vcmp.ge.f32.partialorder %v2242_v37, 0.0 }
 0x1ae   : > { %v3856_v46 = vsel %vm1514_vm1, %v3658_v25, 0.0  ;;  %v4490_v47 = vpack.c.bf16 %v2628_v45, %v2628_v45  ;;  %v2498_v48 = vmul.f32 0.2, %v2242_v37  ;;  %v2248_v49 = vadd.f32 %v5740_v36, %v2113_v38 }
 0x1af   : > { %v3855_v50 = vadd.f32 %v3854_v32, %v3853_v44  ;;  %v3466_v51 = vadd.f32 %v3465_v39, %v3464_v43  ;;  %vm2373_vm7 = vcmp.ge.f32.partialorder %v2245_v41, 0.0  ;;  %v2501_v52 = vmul.f32 0.2, %v2245_v41 }
 0x1b0   : > { %3269 = vst.msk [vmem:[%s5206_s26 + $0x128] sm:$0xf] %vm3194_vm3, %v4490_v47  ;;  %v3661_v53 = vmul.f32 %v2628_v45, %v2628_v45  ;;  %v2626_v55 = vsel %vm2370_vm6, %v2242_v37, %v2498_v48  ;;  %vm2371_vm8 = vcmp.ge.f32.partialorder %v2243_v42, 0.0  ;;  %v2499_v56 = vmul.f32 0.2, %v2243_v42 }
 0x1b1   : > { %v4488_v57 = vpack.c.bf16 %v2626_v55, %v2626_v55  ;;  %v3467_v58 = vsel %vm1514_vm1, %v2626_v55, 0.0  ;;  %v3659_v59 = vmul.f32 %v2626_v55, %v2626_v55  ;;  %v3857_v60 = vadd.f32 %v3856_v46, %v3855_v50  ;;  %v2116_v46 = vld [vmem:[#allocation2 + $0x288] sm:$0xff] }
 0x1b2   : > { %v3471_v61 = vsel %vm1514_vm1, %v2628_v45, 0.0  ;;  %v3468_v62 = vadd.f32 %v3467_v58, %v3466_v51  ;;  %v2629_v63 = vsel %vm2373_vm7, %v2245_v41, %v2501_v52  ;;  %v2627_v0 = vsel %vm2371_vm8, %v2243_v42, %v2499_v56  ;;  %v2115_v41 = vld [vmem:[#allocation2 + $0x280] sm:$0xff]  ;;  %v2118_v45 = vld [vmem:[#allocation2 + $0x298] sm:$0xff]  ;;  %v2121_v56 = vld [vmem:[#allocation2 + $0x2b0] sm:$0xff] }
 0x1b3   : > { %3267 = vst.msk [vmem:[%s5206_s26 + $0x120] sm:$0xf] %vm3194_vm3, %v4488_v57  ;;  %v3858_v2 = vsel %vm1514_vm1, %v3659_v59, 0.0  ;;  %v4491_v3 = vpack.c.bf16 %v2629_v63, %v2629_v63  ;;  %v3662_v4 = vmul.f32 %v2629_v63, %v2629_v63  ;;  %vm2376_vm9 = vcmp.ge.f32.partialorder %v2248_v49, 0.0 }
 0x1b4   : > { %v3859_v8 = vadd.f32 %v3858_v2, %v3857_v60  ;;  %v4489_v9 = vpack.c.bf16 %v2627_v0, %v2627_v0  ;;  %v3469_v10 = vsel %vm1514_vm1, %v2627_v0, 0.0  ;;  %v3660_v11 = vmul.f32 %v2627_v0, %v2627_v0 }
 0x1b5   : > { %v3862_v12 = vsel %vm1514_vm1, %v3661_v53, 0.0  ;;  %3270 = vst.msk [vmem:[%s5206_s26 + $0x12c] sm:$0xf] %vm3194_vm3, %v4491_v3  ;;  %v3470_v13 = vadd.f32 %v3469_v10, %v3468_v62  ;;  %v2504_v14 = vmul.f32 0.2, %v2248_v49  ;;  %v2246_v15 = vadd.f32 %v5740_v36, %v2111_v1 }
 0x1b6   : > { %v3473_v17 = vsel %vm1514_vm1, %v2629_v63, 0.0  ;;  %3268 = vst.msk [vmem:[%s5206_s26 + $0x124] sm:$0xf] %vm3194_vm3, %v4489_v9  ;;  %v3860_v18 = vsel %vm1514_vm1, %v3660_v11, 0.0  ;;  %v2249_v19 = vadd.f32 %v5740_v36, %v2114_v5  ;;  %v2247_v20 = vadd.f32 %v5740_v36, %v2112_v6 }
 0x1b7   : > { %v3472_v54 = vadd.f32 %v3471_v61, %v3470_v13  ;;  %v3861_v21 = vadd.f32 %v3860_v18, %v3859_v8  ;;  %v2632_v35 = vsel %vm2376_vm9, %v2248_v49, %v2504_v14  ;;  %vm2374_vm10 = vcmp.ge.f32.partialorder %v2246_v15, 0.0 }
 0x1b8   : > { %v3864_v7 = vsel %vm1514_vm1, %v3662_v4, 0.0  ;;  %v4494_v22 = vpack.c.bf16 %v2632_v35, %v2632_v35  ;;  %v2502_v23 = vmul.f32 0.2, %v2246_v15  ;;  %v2252_v24 = vadd.f32 %v5740_v36, %v2117_v16 }
 0x1b9   : > { %v3863_v25 = vadd.f32 %v3862_v12, %v3861_v21  ;;  %v3474_v26 = vadd.f32 %v3473_v17, %v3472_v54  ;;  %vm2377_vm11 = vcmp.ge.f32.partialorder %v2249_v19, 0.0  ;;  %v2505_v27 = vmul.f32 0.2, %v2249_v19 }
 0x1ba   : > { %3273 = vst.msk [vmem:[%s5206_s26 + $0x138] sm:$0xf] %vm3194_vm3, %v4494_v22  ;;  %v3665_v28 = vmul.f32 %v2632_v35, %v2632_v35  ;;  %v2630_v29 = vsel %vm2374_vm10, %v2246_v15, %v2502_v23  ;;  %vm2375_vm12 = vcmp.ge.f32.partialorder %v2247_v20, 0.0  ;;  %v2503_v30 = vmul.f32 0.2, %v2247_v20 }
 0x1bb   : > { %v4492_v31 = vpack.c.bf16 %v2630_v29, %v2630_v29  ;;  %v3475_v32 = vsel %vm1514_vm1, %v2630_v29, 0.0  ;;  %v3663_v33 = vmul.f32 %v2630_v29, %v2630_v29  ;;  %v3865_v34 = vadd.f32 %v3864_v7, %v3863_v25  ;;  %v2120_v7 = vld [vmem:[#allocation2 + $0x2a8] sm:$0xff] }
 0x1bc   : > { %v3479_v37 = vsel %vm1514_vm1, %v2632_v35, 0.0  ;;  %v3476_v38 = vadd.f32 %v3475_v32, %v3474_v26  ;;  %v2633_v39 = vsel %vm2377_vm11, %v2249_v19, %v2505_v27  ;;  %v2631_v40 = vsel %vm2375_vm12, %v2247_v20, %v2503_v30  ;;  %v2119_v19 = vld [vmem:[#allocation2 + $0x2a0] sm:$0xff]  ;;  %v2122_v35 = vld [vmem:[#allocation2 + $0x2b8] sm:$0xff]  ;;  %v2125_v30 = vld [vmem:[#allocation2 + $0x2d0] sm:$0xff] }
 0x1bd   : > { %3271 = vst.msk [vmem:[%s5206_s26 + $0x130] sm:$0xf] %vm3194_vm3, %v4492_v31  ;;  %v3866_v42 = vsel %vm1514_vm1, %v3663_v33, 0.0  ;;  %v4495_v43 = vpack.c.bf16 %v2633_v39, %v2633_v39  ;;  %v3666_v44 = vmul.f32 %v2633_v39, %v2633_v39  ;;  %vm2380_vm13 = vcmp.ge.f32.partialorder %v2252_v24, 0.0 }
 0x1be   : > { %v3867_v47 = vadd.f32 %v3866_v42, %v3865_v34  ;;  %v4493_v48 = vpack.c.bf16 %v2631_v40, %v2631_v40  ;;  %v3477_v49 = vsel %vm1514_vm1, %v2631_v40, 0.0  ;;  %v3664_v50 = vmul.f32 %v2631_v40, %v2631_v40 }
 0x1bf   : > { %v3870_v51 = vsel %vm1514_vm1, %v3665_v28, 0.0  ;;  %3274 = vst.msk [vmem:[%s5206_s26 + $0x13c] sm:$0xf] %vm3194_vm3, %v4495_v43  ;;  %v3478_v52 = vadd.f32 %v3477_v49, %v3476_v38  ;;  %v2508_v53 = vmul.f32 0.2, %v2252_v24  ;;  %v2250_v55 = vadd.f32 %v5740_v36, %v2115_v41 }
 0x1c0   : > { %v3481_v57 = vsel %vm1514_vm1, %v2633_v39, 0.0  ;;  %3272 = vst.msk [vmem:[%s5206_s26 + $0x134] sm:$0xf] %vm3194_vm3, %v4493_v48  ;;  %v3868_v58 = vsel %vm1514_vm1, %v3664_v50, 0.0  ;;  %v2253_v59 = vadd.f32 %v5740_v36, %v2118_v45  ;;  %v2251_v60 = vadd.f32 %v5740_v36, %v2116_v46 }
 0x1c1   : > { %v3480_v61 = vadd.f32 %v3479_v37, %v3478_v52  ;;  %v3869_v62 = vadd.f32 %v3868_v58, %v3867_v47  ;;  %v2636_v63 = vsel %vm2380_vm13, %v2252_v24, %v2508_v53  ;;  %vm2378_vm14 = vcmp.ge.f32.partialorder %v2250_v55, 0.0 }
 0x1c2   : > { %v3872_v0 = vsel %vm1514_vm1, %v3666_v44, 0.0  ;;  %v4498_v1 = vpack.c.bf16 %v2636_v63, %v2636_v63  ;;  %v2506_v2 = vmul.f32 0.2, %v2250_v55  ;;  %v2256_v3 = vadd.f32 %v5740_v36, %v2121_v56 }
 0x1c3   : > { %v3871_v4 = vadd.f32 %v3870_v51, %v3869_v62  ;;  %v3482_v5 = vadd.f32 %v3481_v57, %v3480_v61  ;;  %vm2381_vm15 = vcmp.ge.f32.partialorder %v2253_v59, 0.0  ;;  %v2509_v6 = vmul.f32 0.2, %v2253_v59 }
 0x1c4   : > { %3277 = vst.msk [vmem:[%s5206_s26 + $0x148] sm:$0xf] %vm3194_vm3, %v4498_v1  ;;  %v3669_v8 = vmul.f32 %v2636_v63, %v2636_v63  ;;  %v2634_v9 = vsel %vm2378_vm14, %v2250_v55, %v2506_v2  ;;  %vm2379_vm0 = vcmp.ge.f32.partialorder %v2251_v60, 0.0  ;;  %v2507_v10 = vmul.f32 0.2, %v2251_v60 }
 0x1c5   : > { %v4496_v11 = vpack.c.bf16 %v2634_v9, %v2634_v9  ;;  %v3483_v12 = vsel %vm1514_vm1, %v2634_v9, 0.0  ;;  %v3667_v13 = vmul.f32 %v2634_v9, %v2634_v9  ;;  %v3873_v14 = vadd.f32 %v3872_v0, %v3871_v4  ;;  %v2124_v0 = vld [vmem:[#allocation2 + $0x2c8] sm:$0xff] }
 0x1c6   : > { %v3487_v15 = vsel %vm1514_vm1, %v2636_v63, 0.0  ;;  %v3484_v16 = vadd.f32 %v3483_v12, %v3482_v5  ;;  %v2637_v17 = vsel %vm2381_vm15, %v2253_v59, %v2509_v6  ;;  %v2635_v18 = vsel %vm2379_vm0, %v2251_v60, %v2507_v10  ;;  %v2123_v59 = vld [vmem:[#allocation2 + $0x2c0] sm:$0xff]  ;;  %v2126_v63 = vld [vmem:[#allocation2 + $0x2d8] sm:$0xff]  ;;  %v2129_v10 = vld [vmem:[#allocation2 + $0x2f0] sm:$0xff] }
 0x1c7   : > { %3275 = vst.msk [vmem:[%s5206_s26 + $0x140] sm:$0xf] %vm3194_vm3, %v4496_v11  ;;  %v3874_v20 = vsel %vm1514_vm1, %v3667_v13, 0.0  ;;  %v4499_v54 = vpack.c.bf16 %v2637_v17, %v2637_v17  ;;  %v3670_v21 = vmul.f32 %v2637_v17, %v2637_v17  ;;  %vm2384_vm2 = vcmp.ge.f32.partialorder %v2256_v3, 0.0 }
 0x1c8   : > { %v3875_v22 = vadd.f32 %v3874_v20, %v3873_v14  ;;  %v4497_v23 = vpack.c.bf16 %v2635_v18, %v2635_v18  ;;  %v3485_v24 = vsel %vm1514_vm1, %v2635_v18, 0.0  ;;  %v3668_v25 = vmul.f32 %v2635_v18, %v2635_v18 }
 0x1c9   : > { %v3878_v26 = vsel %vm1514_vm1, %v3669_v8, 0.0  ;;  %3278 = vst.msk [vmem:[%s5206_s26 + $0x14c] sm:$0xf] %vm3194_vm3, %v4499_v54  ;;  %v3486_v27 = vadd.f32 %v3485_v24, %v3484_v16  ;;  %v2512_v28 = vmul.f32 0.2, %v2256_v3  ;;  %v2254_v29 = vadd.f32 %v5740_v36, %v2119_v19 }
 0x1ca   : > { %v3489_v31 = vsel %vm1514_vm1, %v2637_v17, 0.0  ;;  %3276 = vst.msk [vmem:[%s5206_s26 + $0x144] sm:$0xf] %vm3194_vm3, %v4497_v23  ;;  %v3876_v32 = vsel %vm1514_vm1, %v3668_v25, 0.0  ;;  %v2257_v33 = vadd.f32 %v5740_v36, %v2122_v35  ;;  %v2255_v34 = vadd.f32 %v5740_v36, %v2120_v7 }
 0x1cb   : > { %v3488_v37 = vadd.f32 %v3487_v15, %v3486_v27  ;;  %v3877_v38 = vadd.f32 %v3876_v32, %v3875_v22  ;;  %v2640_v39 = vsel %vm2384_vm2, %v2256_v3, %v2512_v28  ;;  %vm2382_vm4 = vcmp.ge.f32.partialorder %v2254_v29, 0.0 }
 0x1cc   : > { %v3880_v40 = vsel %vm1514_vm1, %v3670_v21, 0.0  ;;  %v4502_v41 = vpack.c.bf16 %v2640_v39, %v2640_v39  ;;  %v2510_v42 = vmul.f32 0.2, %v2254_v29  ;;  %v2260_v43 = vadd.f32 %v5740_v36, %v2125_v30 }
 0x1cd   : > { %v3879_v44 = vadd.f32 %v3878_v26, %v3877_v38  ;;  %v3490_v45 = vadd.f32 %v3489_v31, %v3488_v37  ;;  %vm2385_vm5 = vcmp.ge.f32.partialorder %v2257_v33, 0.0  ;;  %v2513_v46 = vmul.f32 0.2, %v2257_v33 }
 0x1ce   : > { %3281 = vst.msk [vmem:[%s5206_s26 + $0x158] sm:$0xf] %vm3194_vm3, %v4502_v41  ;;  %v3673_v47 = vmul.f32 %v2640_v39, %v2640_v39  ;;  %v2638_v48 = vsel %vm2382_vm4, %v2254_v29, %v2510_v42  ;;  %vm2383_vm6 = vcmp.ge.f32.partialorder %v2255_v34, 0.0  ;;  %v2511_v49 = vmul.f32 0.2, %v2255_v34 }
 0x1cf   : > { %v4500_v50 = vpack.c.bf16 %v2638_v48, %v2638_v48  ;;  %v3491_v51 = vsel %vm1514_vm1, %v2638_v48, 0.0  ;;  %v3671_v52 = vmul.f32 %v2638_v48, %v2638_v48  ;;  %v3881_v53 = vadd.f32 %v3880_v40, %v3879_v44  ;;  %v2128_v40 = vld [vmem:[#allocation2 + $0x2e8] sm:$0xff] }
 0x1d0   : > { %v3495_v55 = vsel %vm1514_vm1, %v2640_v39, 0.0  ;;  %v3492_v56 = vadd.f32 %v3491_v51, %v3490_v45  ;;  %v2641_v57 = vsel %vm2385_vm5, %v2257_v33, %v2513_v46  ;;  %v2639_v58 = vsel %vm2383_vm6, %v2255_v34, %v2511_v49  ;;  %v2127_v33 = vld [vmem:[#allocation2 + $0x2e0] sm:$0xff]  ;;  %v2130_v39 = vld [vmem:[#allocation2 + $0x2f8] sm:$0xff]  ;;  %v2133_v49 = vld [vmem:[#allocation2 + $0x310] sm:$0xff] }
 0x1d1   : > { %3279 = vst.msk [vmem:[%s5206_s26 + $0x150] sm:$0xf] %vm3194_vm3, %v4500_v50  ;;  %v3882_v60 = vsel %vm1514_vm1, %v3671_v52, 0.0  ;;  %v4503_v61 = vpack.c.bf16 %v2641_v57, %v2641_v57  ;;  %v3674_v62 = vmul.f32 %v2641_v57, %v2641_v57  ;;  %vm2388_vm7 = vcmp.ge.f32.partialorder %v2260_v43, 0.0 }
 0x1d2   : > { %v3883_v1 = vadd.f32 %v3882_v60, %v3881_v53  ;;  %v4501_v2 = vpack.c.bf16 %v2639_v58, %v2639_v58  ;;  %v3493_v3 = vsel %vm1514_vm1, %v2639_v58, 0.0  ;;  %v3672_v4 = vmul.f32 %v2639_v58, %v2639_v58 }
 0x1d3   : > { %v3886_v5 = vsel %vm1514_vm1, %v3673_v47, 0.0  ;;  %3282 = vst.msk [vmem:[%s5206_s26 + $0x15c] sm:$0xf] %vm3194_vm3, %v4503_v61  ;;  %v3494_v6 = vadd.f32 %v3493_v3, %v3492_v56  ;;  %v2516_v8 = vmul.f32 0.2, %v2260_v43  ;;  %v2258_v9 = vadd.f32 %v5740_v36, %v2123_v59 }
 0x1d4   : > { %v3497_v11 = vsel %vm1514_vm1, %v2641_v57, 0.0  ;;  %3280 = vst.msk [vmem:[%s5206_s26 + $0x154] sm:$0xf] %vm3194_vm3, %v4501_v2  ;;  %v3884_v12 = vsel %vm1514_vm1, %v3672_v4, 0.0  ;;  %v2261_v13 = vadd.f32 %v5740_v36, %v2126_v63  ;;  %v2259_v14 = vadd.f32 %v5740_v36, %v2124_v0 }
 0x1d5   : > { %v3496_v15 = vadd.f32 %v3495_v55, %v3494_v6  ;;  %v3885_v16 = vadd.f32 %v3884_v12, %v3883_v1  ;;  %v2644_v17 = vsel %vm2388_vm7, %v2260_v43, %v2516_v8  ;;  %vm2386_vm8 = vcmp.ge.f32.partialorder %v2258_v9, 0.0 }
 0x1d6   : > { %v3888_v18 = vsel %vm1514_vm1, %v3674_v62, 0.0  ;;  %v4506_v19 = vpack.c.bf16 %v2644_v17, %v2644_v17  ;;  %v2514_v20 = vmul.f32 0.2, %v2258_v9  ;;  %v2264_v54 = vadd.f32 %v5740_v36, %v2129_v10 }
 0x1d7   : > { %v3887_v21 = vadd.f32 %v3886_v5, %v3885_v16  ;;  %v3498_v35 = vadd.f32 %v3497_v11, %v3496_v15  ;;  %vm2389_vm9 = vcmp.ge.f32.partialorder %v2261_v13, 0.0  ;;  %v2517_v7 = vmul.f32 0.2, %v2261_v13 }
 0x1d8   : > { %3285 = vst.msk [vmem:[%s5206_s26 + $0x168] sm:$0xf] %vm3194_vm3, %v4506_v19  ;;  %v3677_v22 = vmul.f32 %v2644_v17, %v2644_v17  ;;  %v2642_v23 = vsel %vm2386_vm8, %v2258_v9, %v2514_v20  ;;  %vm2387_vm10 = vcmp.ge.f32.partialorder %v2259_v14, 0.0  ;;  %v2515_v24 = vmul.f32 0.2, %v2259_v14 }
 0x1d9   : > { %v4504_v25 = vpack.c.bf16 %v2642_v23, %v2642_v23  ;;  %v3499_v26 = vsel %vm1514_vm1, %v2642_v23, 0.0  ;;  %v3675_v27 = vmul.f32 %v2642_v23, %v2642_v23  ;;  %v3889_v28 = vadd.f32 %v3888_v18, %v3887_v21  ;;  %v2132_v18 = vld [vmem:[#allocation2 + $0x308] sm:$0xff] }
 0x1da   : > { %v3503_v29 = vsel %vm1514_vm1, %v2644_v17, 0.0  ;;  %v3500_v30 = vadd.f32 %v3499_v26, %v3498_v35  ;;  %v2645_v31 = vsel %vm2389_vm9, %v2261_v13, %v2517_v7  ;;  %v2643_v32 = vsel %vm2387_vm10, %v2259_v14, %v2515_v24  ;;  %v2131_v13 = vld [vmem:[#allocation2 + $0x300] sm:$0xff]  ;;  %v2134_v17 = vld [vmem:[#allocation2 + $0x318] sm:$0xff]  ;;  %v2137_v24 = vld [vmem:[#allocation2 + $0x330] sm:$0xff] }
 0x1db   : > { %3283 = vst.msk [vmem:[%s5206_s26 + $0x160] sm:$0xf] %vm3194_vm3, %v4504_v25  ;;  %v3890_v34 = vsel %vm1514_vm1, %v3675_v27, 0.0  ;;  %v4507_v37 = vpack.c.bf16 %v2645_v31, %v2645_v31  ;;  %v3678_v38 = vmul.f32 %v2645_v31, %v2645_v31  ;;  %vm2392_vm11 = vcmp.ge.f32.partialorder %v2264_v54, 0.0 }
 0x1dc   : > { %v3891_v41 = vadd.f32 %v3890_v34, %v3889_v28  ;;  %v4505_v42 = vpack.c.bf16 %v2643_v32, %v2643_v32  ;;  %v3501_v43 = vsel %vm1514_vm1, %v2643_v32, 0.0  ;;  %v3676_v44 = vmul.f32 %v2643_v32, %v2643_v32 }
 0x1dd   : > { %v3894_v45 = vsel %vm1514_vm1, %v3677_v22, 0.0  ;;  %3286 = vst.msk [vmem:[%s5206_s26 + $0x16c] sm:$0xf] %vm3194_vm3, %v4507_v37  ;;  %v3502_v46 = vadd.f32 %v3501_v43, %v3500_v30  ;;  %v2520_v47 = vmul.f32 0.2, %v2264_v54  ;;  %v2262_v48 = vadd.f32 %v5740_v36, %v2127_v33 }
 0x1de   : > { %v3505_v50 = vsel %vm1514_vm1, %v2645_v31, 0.0  ;;  %3284 = vst.msk [vmem:[%s5206_s26 + $0x164] sm:$0xf] %vm3194_vm3, %v4505_v42  ;;  %v3892_v51 = vsel %vm1514_vm1, %v3676_v44, 0.0  ;;  %v2265_v52 = vadd.f32 %v5740_v36, %v2130_v39  ;;  %v2263_v53 = vadd.f32 %v5740_v36, %v2128_v40 }
 0x1df   : > { %v3504_v55 = vadd.f32 %v3503_v29, %v3502_v46  ;;  %v3893_v56 = vadd.f32 %v3892_v51, %v3891_v41  ;;  %v2648_v57 = vsel %vm2392_vm11, %v2264_v54, %v2520_v47  ;;  %vm2390_vm12 = vcmp.ge.f32.partialorder %v2262_v48, 0.0 }
 0x1e0   : > { %v3896_v58 = vsel %vm1514_vm1, %v3678_v38, 0.0  ;;  %v4510_v59 = vpack.c.bf16 %v2648_v57, %v2648_v57  ;;  %v2518_v60 = vmul.f32 0.2, %v2262_v48  ;;  %v2268_v61 = vadd.f32 %v5740_v36, %v2133_v49 }
 0x1e1   : > { %v3895_v62 = vadd.f32 %v3894_v45, %v3893_v56  ;;  %v3506_v63 = vadd.f32 %v3505_v50, %v3504_v55  ;;  %vm2393_vm13 = vcmp.ge.f32.partialorder %v2265_v52, 0.0  ;;  %v2521_v0 = vmul.f32 0.2, %v2265_v52 }
 0x1e2   : > { %3289 = vst.msk [vmem:[%s5206_s26 + $0x178] sm:$0xf] %vm3194_vm3, %v4510_v59  ;;  %v3681_v1 = vmul.f32 %v2648_v57, %v2648_v57  ;;  %v2646_v2 = vsel %vm2390_vm12, %v2262_v48, %v2518_v60  ;;  %vm2391_vm14 = vcmp.ge.f32.partialorder %v2263_v53, 0.0  ;;  %v2519_v3 = vmul.f32 0.2, %v2263_v53 }
 0x1e3   : > { %v4508_v4 = vpack.c.bf16 %v2646_v2, %v2646_v2  ;;  %v3507_v5 = vsel %vm1514_vm1, %v2646_v2, 0.0  ;;  %v3679_v6 = vmul.f32 %v2646_v2, %v2646_v2  ;;  %v3897_v8 = vadd.f32 %v3896_v58, %v3895_v62  ;;  %v2136_v58 = vld [vmem:[#allocation2 + $0x328] sm:$0xff] }
 0x1e4   : > { %v3511_v9 = vsel %vm1514_vm1, %v2648_v57, 0.0  ;;  %v3508_v10 = vadd.f32 %v3507_v5, %v3506_v63  ;;  %v2649_v11 = vsel %vm2393_vm13, %v2265_v52, %v2521_v0  ;;  %v2647_v12 = vsel %vm2391_vm14, %v2263_v53, %v2519_v3  ;;  %v2135_v52 = vld [vmem:[#allocation2 + $0x320] sm:$0xff]  ;;  %v2138_v57 = vld [vmem:[#allocation2 + $0x338] sm:$0xff]  ;;  %v2141_v3 = vld [vmem:[#allocation2 + $0x350] sm:$0xff] }
 0x1e5   : > { %3287 = vst.msk [vmem:[%s5206_s26 + $0x170] sm:$0xf] %vm3194_vm3, %v4508_v4  ;;  %v3898_v14 = vsel %vm1514_vm1, %v3679_v6, 0.0  ;;  %v4511_v15 = vpack.c.bf16 %v2649_v11, %v2649_v11  ;;  %v3682_v16 = vmul.f32 %v2649_v11, %v2649_v11  ;;  %vm2396_vm15 = vcmp.ge.f32.partialorder %v2268_v61, 0.0 }
 0x1e6   : > { %v3899_v19 = vadd.f32 %v3898_v14, %v3897_v8  ;;  %v4509_v20 = vpack.c.bf16 %v2647_v12, %v2647_v12  ;;  %v3509_v54 = vsel %vm1514_vm1, %v2647_v12, 0.0  ;;  %v3680_v21 = vmul.f32 %v2647_v12, %v2647_v12 }
 0x1e7   : > { %v3902_v35 = vsel %vm1514_vm1, %v3681_v1, 0.0  ;;  %3290 = vst.msk [vmem:[%s5206_s26 + $0x17c] sm:$0xf] %vm3194_vm3, %v4511_v15  ;;  %v3510_v7 = vadd.f32 %v3509_v54, %v3508_v10  ;;  %v2524_v22 = vmul.f32 0.2, %v2268_v61  ;;  %v2266_v23 = vadd.f32 %v5740_v36, %v2131_v13 }
 0x1e8   : > { %v3513_v25 = vsel %vm1514_vm1, %v2649_v11, 0.0  ;;  %3288 = vst.msk [vmem:[%s5206_s26 + $0x174] sm:$0xf] %vm3194_vm3, %v4509_v20  ;;  %v3900_v26 = vsel %vm1514_vm1, %v3680_v21, 0.0  ;;  %v2269_v27 = vadd.f32 %v5740_v36, %v2134_v17  ;;  %v2267_v28 = vadd.f32 %v5740_v36, %v2132_v18 }
 0x1e9   : > { %v3512_v29 = vadd.f32 %v3511_v9, %v3510_v7  ;;  %v3901_v30 = vadd.f32 %v3900_v26, %v3899_v19  ;;  %v2652_v31 = vsel %vm2396_vm15, %v2268_v61, %v2524_v22  ;;  %vm2394_vm0 = vcmp.ge.f32.partialorder %v2266_v23, 0.0 }
 0x1ea   : > { %v3904_v32 = vsel %vm1514_vm1, %v3682_v16, 0.0  ;;  %v4514_v33 = vpack.c.bf16 %v2652_v31, %v2652_v31  ;;  %v2522_v34 = vmul.f32 0.2, %v2266_v23  ;;  %v2272_v37 = vadd.f32 %v5740_v36, %v2137_v24 }
 0x1eb   : > { %v3903_v38 = vadd.f32 %v3902_v35, %v3901_v30  ;;  %v3514_v39 = vadd.f32 %v3513_v25, %v3512_v29  ;;  %vm2397_vm2 = vcmp.ge.f32.partialorder %v2269_v27, 0.0  ;;  %v2525_v40 = vmul.f32 0.2, %v2269_v27 }
 0x1ec   : > { %3293 = vst.msk [vmem:[%s5206_s26 + $0x188] sm:$0xf] %vm3194_vm3, %v4514_v33  ;;  %v3685_v41 = vmul.f32 %v2652_v31, %v2652_v31  ;;  %v2650_v42 = vsel %vm2394_vm0, %v2266_v23, %v2522_v34  ;;  %vm2395_vm4 = vcmp.ge.f32.partialorder %v2267_v28, 0.0  ;;  %v2523_v43 = vmul.f32 0.2, %v2267_v28 }
 0x1ed   : > { %v4512_v44 = vpack.c.bf16 %v2650_v42, %v2650_v42  ;;  %v3515_v45 = vsel %vm1514_vm1, %v2650_v42, 0.0  ;;  %v3683_v46 = vmul.f32 %v2650_v42, %v2650_v42  ;;  %v3905_v47 = vadd.f32 %v3904_v32, %v3903_v38  ;;  %v2140_v32 = vld [vmem:[#allocation2 + $0x348] sm:$0xff] }
 0x1ee   : > { %v3519_v48 = vsel %vm1514_vm1, %v2652_v31, 0.0  ;;  %v3516_v49 = vadd.f32 %v3515_v45, %v3514_v39  ;;  %v2653_v50 = vsel %vm2397_vm2, %v2269_v27, %v2525_v40  ;;  %v2651_v51 = vsel %vm2395_vm4, %v2267_v28, %v2523_v43  ;;  %v2139_v27 = vld [vmem:[#allocation2 + $0x340] sm:$0xff]  ;;  %v2142_v31 = vld [vmem:[#allocation2 + $0x358] sm:$0xff]  ;;  %v2145_v43 = vld [vmem:[#allocation2 + $0x370] sm:$0xff] }
 0x1ef   : > { %3291 = vst.msk [vmem:[%s5206_s26 + $0x180] sm:$0xf] %vm3194_vm3, %v4512_v44  ;;  %v3906_v53 = vsel %vm1514_vm1, %v3683_v46, 0.0  ;;  %v4515_v55 = vpack.c.bf16 %v2653_v50, %v2653_v50  ;;  %v3686_v56 = vmul.f32 %v2653_v50, %v2653_v50  ;;  %vm2400_vm5 = vcmp.ge.f32.partialorder %v2272_v37, 0.0 }
 0x1f0   : > { %v3907_v59 = vadd.f32 %v3906_v53, %v3905_v47  ;;  %v4513_v60 = vpack.c.bf16 %v2651_v51, %v2651_v51  ;;  %v3517_v61 = vsel %vm1514_vm1, %v2651_v51, 0.0  ;;  %v3684_v62 = vmul.f32 %v2651_v51, %v2651_v51 }
 0x1f1   : > { %v3910_v63 = vsel %vm1514_vm1, %v3685_v41, 0.0  ;;  %3294 = vst.msk [vmem:[%s5206_s26 + $0x18c] sm:$0xf] %vm3194_vm3, %v4515_v55  ;;  %v3518_v0 = vadd.f32 %v3517_v61, %v3516_v49  ;;  %v2528_v1 = vmul.f32 0.2, %v2272_v37  ;;  %v2270_v2 = vadd.f32 %v5740_v36, %v2135_v52 }
 0x1f2   : > { %v3521_v4 = vsel %vm1514_vm1, %v2653_v50, 0.0  ;;  %3292 = vst.msk [vmem:[%s5206_s26 + $0x184] sm:$0xf] %vm3194_vm3, %v4513_v60  ;;  %v3908_v5 = vsel %vm1514_vm1, %v3684_v62, 0.0  ;;  %v2273_v6 = vadd.f32 %v5740_v36, %v2138_v57  ;;  %v2271_v8 = vadd.f32 %v5740_v36, %v2136_v58 }
 0x1f3   : > { %v3520_v9 = vadd.f32 %v3519_v48, %v3518_v0  ;;  %v3909_v10 = vadd.f32 %v3908_v5, %v3907_v59  ;;  %v2656_v11 = vsel %vm2400_vm5, %v2272_v37, %v2528_v1  ;;  %vm2398_vm6 = vcmp.ge.f32.partialorder %v2270_v2, 0.0  ;;  %v2143_v5 = vld [vmem:[#allocation2 + $0x360] sm:$0xff] }
 0x1f4   : > { %v3912_v12 = vsel %vm1514_vm1, %v3686_v56, 0.0  ;;  %v4518_v13 = vpack.c.bf16 %v2656_v11, %v2656_v11  ;;  %v2526_v14 = vmul.f32 0.2, %v2270_v2  ;;  %v2276_v15 = vadd.f32 %v5740_v36, %v2141_v3 }
 0x1f5   : > { %v3911_v16 = vadd.f32 %v3910_v63, %v3909_v10  ;;  %v3522_v17 = vadd.f32 %v3521_v4, %v3520_v9  ;;  %vm2401_vm7 = vcmp.ge.f32.partialorder %v2273_v6, 0.0  ;;  %v2529_v18 = vmul.f32 0.2, %v2273_v6  ;;  %v2146_v10 = vld [vmem:[#allocation2 + $0x378] sm:$0xff] }
 0x1f6   : > { %3297 = vst.msk [vmem:[%s5206_s26 + $0x198] sm:$0xf] %vm3194_vm3, %v4518_v13  ;;  %v3689_v19 = vmul.f32 %v2656_v11, %v2656_v11  ;;  %v2654_v20 = vsel %vm2398_vm6, %v2270_v2, %v2526_v14  ;;  %vm2399_vm8 = vcmp.ge.f32.partialorder %v2271_v8, 0.0  ;;  %v2527_v54 = vmul.f32 0.2, %v2271_v8 }
 0x1f7   : > { %v4516_v21 = vpack.c.bf16 %v2654_v20, %v2654_v20  ;;  %v3523_v35 = vsel %vm1514_vm1, %v2654_v20, 0.0  ;;  %v3687_v7 = vmul.f32 %v2654_v20, %v2654_v20  ;;  %v3913_v22 = vadd.f32 %v3912_v12, %v3911_v16  ;;  %v2149_v20 = vld [vmem:[#allocation2 + $0x390] sm:$0xff] }
 0x1f8   : > { %v3527_v23 = vsel %vm1514_vm1, %v2656_v11, 0.0  ;;  %v3524_v24 = vadd.f32 %v3523_v35, %v3522_v17  ;;  %v2657_v25 = vsel %vm2401_vm7, %v2273_v6, %v2529_v18  ;;  %v2655_v26 = vsel %vm2399_vm8, %v2271_v8, %v2527_v54  ;;  %v2144_v11 = vld [vmem:[#allocation2 + $0x368] sm:$0xff] }
 0x1f9   : > { %3295 = vst.msk [vmem:[%s5206_s26 + $0x190] sm:$0xf] %vm3194_vm3, %v4516_v21  ;;  %v3914_v28 = vsel %vm1514_vm1, %v3687_v7, 0.0  ;;  %v4519_v29 = vpack.c.bf16 %v2657_v25, %v2657_v25  ;;  %v3690_v30 = vmul.f32 %v2657_v25, %v2657_v25  ;;  %vm2404_vm9 = vcmp.ge.f32.partialorder %v2276_v15, 0.0 }
 0x1fa   : > { %v3915_v33 = vadd.f32 %v3914_v28, %v3913_v22  ;;  %v4517_v34 = vpack.c.bf16 %v2655_v26, %v2655_v26  ;;  %v3525_v37 = vsel %vm1514_vm1, %v2655_v26, 0.0  ;;  %v3688_v38 = vmul.f32 %v2655_v26, %v2655_v26 }
 0x1fb   : > { %v3918_v39 = vsel %vm1514_vm1, %v3689_v19, 0.0  ;;  %3298 = vst.msk [vmem:[%s5206_s26 + $0x19c] sm:$0xf] %vm3194_vm3, %v4519_v29  ;;  %v3526_v40 = vadd.f32 %v3525_v37, %v3524_v24  ;;  %v2532_v41 = vmul.f32 0.2, %v2276_v15  ;;  %v2274_v42 = vadd.f32 %v5740_v36, %v2139_v27 }
 0x1fc   : > { %v3529_v44 = vsel %vm1514_vm1, %v2657_v25, 0.0  ;;  %3296 = vst.msk [vmem:[%s5206_s26 + $0x194] sm:$0xf] %vm3194_vm3, %v4517_v34  ;;  %v3916_v45 = vsel %vm1514_vm1, %v3688_v38, 0.0  ;;  %v2277_v46 = vadd.f32 %v5740_v36, %v2142_v31  ;;  %v2275_v47 = vadd.f32 %v5740_v36, %v2140_v32 }
 0x1fd   : > { %v3528_v48 = vadd.f32 %v3527_v23, %v3526_v40  ;;  %v3917_v49 = vadd.f32 %v3916_v45, %v3915_v33  ;;  %v2660_v50 = vsel %vm2404_vm9, %v2276_v15, %v2532_v41  ;;  %vm2402_vm10 = vcmp.ge.f32.partialorder %v2274_v42, 0.0  ;;  %v2147_v45 = vld [vmem:[#allocation2 + $0x380] sm:$0xff] }
 0x1fe   : > { %v3920_v51 = vsel %vm1514_vm1, %v3690_v30, 0.0  ;;  %v4522_v52 = vpack.c.bf16 %v2660_v50, %v2660_v50  ;;  %v2530_v53 = vmul.f32 0.2, %v2274_v42  ;;  %v2280_v55 = vadd.f32 %v5740_v36, %v2145_v43 }
 0x1ff   : > { %v3919_v56 = vadd.f32 %v3918_v39, %v3917_v49  ;;  %v3530_v57 = vadd.f32 %v3529_v44, %v3528_v48  ;;  %vm2405_vm11 = vcmp.ge.f32.partialorder %v2277_v46, 0.0  ;;  %v2533_v58 = vmul.f32 0.2, %v2277_v46  ;;  %v2150_v49 = vld [vmem:[#allocation2 + $0x398] sm:$0xff] }
 0x200   : > { %3301 = vst.msk [vmem:[%s5206_s26 + $0x1a8] sm:$0xf] %vm3194_vm3, %v4522_v52  ;;  %v3693_v59 = vmul.f32 %v2660_v50, %v2660_v50  ;;  %v2658_v60 = vsel %vm2402_vm10, %v2274_v42, %v2530_v53  ;;  %vm2403_vm12 = vcmp.ge.f32.partialorder %v2275_v47, 0.0  ;;  %v2531_v61 = vmul.f32 0.2, %v2275_v47 }
 0x201   : > { %v4520_v62 = vpack.c.bf16 %v2658_v60, %v2658_v60  ;;  %v3531_v63 = vsel %vm1514_vm1, %v2658_v60, 0.0  ;;  %v3691_v0 = vmul.f32 %v2658_v60, %v2658_v60  ;;  %v3921_v1 = vadd.f32 %v3920_v51, %v3919_v56 }
 0x202   : > { %v3532_v2 = vadd.f32 %v3531_v63, %v3530_v57  ;;  %v2661_v3 = vsel %vm2405_vm11, %v2277_v46, %v2533_v58  ;;  %v2659_v4 = vsel %vm2403_vm12, %v2275_v47, %v2531_v61  ;;  %v3535_v6 = vsel %vm1514_vm1, %v2660_v50, 0.0  ;;  %v2148_v50 = vld [vmem:[#allocation2 + $0x388] sm:$0xff] }
 0x203   : > { %3299 = vst.msk [vmem:[%s5206_s26 + $0x1a0] sm:$0xf] %vm3194_vm3, %v4520_v62  ;;  %v3922_v8 = vsel %vm1514_vm1, %v3691_v0, 0.0  ;;  %v4523_v9 = vpack.c.bf16 %v2661_v3, %v2661_v3  ;;  %vm2408_vm13 = vcmp.ge.f32.partialorder %v2280_v55, 0.0  ;;  %v4521_v13 = vpack.c.bf16 %v2659_v4, %v2659_v4 }
 0x204   : > { %v3923_v12 = vadd.f32 %v3922_v8, %v3921_v1  ;;  %v3533_v14 = vsel %vm1514_vm1, %v2659_v4, 0.0  ;;  %v3692_v15 = vmul.f32 %v2659_v4, %v2659_v4  ;;  %v3926_v16 = vsel %vm1514_vm1, %v3693_v59, 0.0 }
 0x205   : > { %3302 = vst.msk [vmem:[%s5206_s26 + $0x1ac] sm:$0xf] %vm3194_vm3, %v4523_v9  ;;  %v3534_v17 = vadd.f32 %v3533_v14, %v3532_v2  ;;  %v2536_v18 = vmul.f32 0.2, %v2280_v55  ;;  %v2278_v19 = vadd.f32 %v5740_v36, %v2143_v5  ;;  %v3694_v54 = vmul.f32 %v2661_v3, %v2661_v3  ;;  %3300 = vst.msk [vmem:[%s5206_s26 + $0x1a4] sm:$0xf] %vm3194_vm3, %v4521_v13 }
 0x206   : > { %v3924_v21 = vsel %vm1514_vm1, %v3692_v15, 0.0  ;;  %v2281_v35 = vadd.f32 %v5740_v36, %v2146_v10  ;;  %v2279_v7 = vadd.f32 %v5740_v36, %v2144_v11  ;;  %v3537_v25 = vsel %vm1514_vm1, %v2661_v3, 0.0  ;;  %v2153_v3 = vld [vmem:[#allocation2 + $0x3b0] sm:$0xff] }
 0x207   : > { %v3536_v22 = vadd.f32 %v3535_v6, %v3534_v17  ;;  %v3925_v23 = vadd.f32 %v3924_v21, %v3923_v12  ;;  %v2664_v24 = vsel %vm2408_vm13, %v2280_v55, %v2536_v18  ;;  %vm2406_vm14 = vcmp.ge.f32.partialorder %v2278_v19, 0.0  ;;  %v2151_v21 = vld [vmem:[#allocation2 + $0x3a0] sm:$0xff] }
 0x208   : > { %v4526_v26 = vpack.c.bf16 %v2664_v24, %v2664_v24  ;;  %v2534_v27 = vmul.f32 0.2, %v2278_v19  ;;  %v2284_v28 = vadd.f32 %v5740_v36, %v2149_v20  ;;  %vm2409_vm15 = vcmp.ge.f32.partialorder %v2281_v35, 0.0 }
 0x209   : > { %v3927_v29 = vadd.f32 %v3926_v16, %v3925_v23  ;;  %v3538_v30 = vadd.f32 %v3537_v25, %v3536_v22  ;;  %v2537_v31 = vmul.f32 0.2, %v2281_v35  ;;  %v3928_v32 = vsel %vm1514_vm1, %v3694_v54, 0.0  ;;  %v2157_v25 = vld [vmem:[#allocation2 + $0x3d0] sm:$0xff] }
 0x20a   : > { %3305 = vst.msk [vmem:[%s5206_s26 + $0x1b8] sm:$0xf] %vm3194_vm3, %v4526_v26  ;;  %v2662_v33 = vsel %vm2406_vm14, %v2278_v19, %v2534_v27  ;;  %vm2407_vm0 = vcmp.ge.f32.partialorder %v2279_v7, 0.0  ;;  %v2535_v34 = vmul.f32 0.2, %v2279_v7  ;;  %v3697_v41 = vmul.f32 %v2664_v24, %v2664_v24  ;;  %v2155_v26 = vld [vmem:[#allocation2 + $0x3c0] sm:$0xff] }
 0x20b   : > { %v4524_v37 = vpack.c.bf16 %v2662_v33, %v2662_v33  ;;  %v3539_v38 = vsel %vm1514_vm1, %v2662_v33, 0.0  ;;  %v3695_v39 = vmul.f32 %v2662_v33, %v2662_v33  ;;  %v3929_v40 = vadd.f32 %v3928_v32, %v3927_v29  ;;  %v2158_v32 = vld [vmem:[#allocation2 + $0x3d8] sm:$0xff]  ;;  %v2156_v33 = vld [vmem:[#allocation2 + $0x3c8] sm:$0xff] }
 0x20c   : > { %v3540_v42 = vadd.f32 %v3539_v38, %v3538_v30  ;;  %v2665_v43 = vsel %vm2409_vm15, %v2281_v35, %v2537_v31  ;;  %v2663_v44 = vsel %vm2407_vm0, %v2279_v7, %v2535_v34  ;;  %vm2412_vm2 = vcmp.ge.f32.partialorder %v2284_v28, 0.0  ;;  %v2154_v7 = vld [vmem:[#allocation2 + $0x3b8] sm:$0xff]  ;;  %v4875_v30 = vld [vmem:[%s6188_s2] ss:$0 sm:$0xff] }
 0x20d   : > { %3303 = vst.msk [vmem:[%s5206_s26 + $0x1b0] sm:$0xf] %vm3194_vm3, %v4524_v37  ;;  %v3930_v46 = vsel %vm1514_vm1, %v3695_v39, 0.0  ;;  %v4527_v47 = vpack.c.bf16 %v2665_v43, %v2665_v43  ;;  %v3698_v48 = vmul.f32 %v2665_v43, %v2665_v43  ;;  %v4525_v52 = vpack.c.bf16 %v2663_v44, %v2663_v44 }
 0x20e   : > { %v3931_v51 = vadd.f32 %v3930_v46, %v3929_v40  ;;  %v3541_v53 = vsel %vm1514_vm1, %v2663_v44, 0.0  ;;  %v3696_v55 = vmul.f32 %v2663_v44, %v2663_v44  ;;  %v3543_v56 = vsel %vm1514_vm1, %v2664_v24, 0.0  ;;  %v2159_v40 = vld [vmem:[#allocation2 + $0x3e0] sm:$0xff]  ;;  %v2162_v46 = vld [vmem:[#allocation2 + $0x3f8] sm:$0xff] }
 0x20f   : > { %3306 = vst.msk [vmem:[%s5206_s26 + $0x1bc] sm:$0xf] %vm3194_vm3, %v4527_v47  ;;  %v3542_v57 = vadd.f32 %v3541_v53, %v3540_v42  ;;  %v2540_v58 = vmul.f32 0.2, %v2284_v28  ;;  %v2282_v59 = vadd.f32 %v5740_v36, %v2147_v45  ;;  %v3934_v60 = vsel %vm1514_vm1, %v3697_v41, 0.0  ;;  %v2160_v41 = vld [vmem:[#allocation2 + $0x3e8] sm:$0xff] }
 0x210   : > { %3304 = vst.msk [vmem:[%s5206_s26 + $0x1b4] sm:$0xf] %vm3194_vm3, %v4525_v52  ;;  %v3932_v61 = vsel %vm1514_vm1, %v3696_v55, 0.0  ;;  %v2285_v62 = vadd.f32 %v5740_v36, %v2150_v49  ;;  %v2283_v63 = vadd.f32 %v5740_v36, %v2148_v50  ;;  %v3545_v4 = vsel %vm1514_vm1, %v2665_v43, 0.0  ;;  %v2161_v42 = vld [vmem:[#allocation2 + $0x3f0] sm:$0xff] }
 0x211   : > { %v3544_v0 = vadd.f32 %v3543_v56, %v3542_v57  ;;  %v3933_v1 = vadd.f32 %v3932_v61, %v3931_v51  ;;  %v5959_v2 = vsel %vm2412_vm2, %v2284_v28, %v2540_v58  ;;  %vm2410_vm4 = vcmp.ge.f32.partialorder %v2282_v59, 0.0 }
 0x212   : > { %v3936_v5 = vsel %vm1514_vm1, %v3698_v48, 0.0  ;;  %v4530_v6 = vpack.c.bf16 %v5959_v2, %v5959_v2  ;;  %v2538_v8 = vmul.f32 0.2, %v2282_v59  ;;  %vm2413_vm5 = vcmp.ge.f32.partialorder %v2285_v62, 0.0 }
 0x213   : > { %v3935_v9 = vadd.f32 %v3934_v60, %v3933_v1  ;;  %v3546_v10 = vadd.f32 %v3545_v4, %v3544_v0  ;;  %v2541_v11 = vmul.f32 0.2, %v2285_v62  ;;  %vm2411_vm6 = vcmp.ge.f32.partialorder %v2283_v63, 0.0 }
 0x214   : > { %3309 = vst.msk [vmem:[%s5206_s26 + $0x1c8] sm:$0xf] %vm3194_vm3, %v4530_v6  ;;  %v2666_v12 = vsel %vm2410_vm4, %v2282_v59, %v2538_v8  ;;  %v2539_v13 = vmul.f32 0.2, %v2283_v63  ;;  %v5968_v14 = vadd.f32 %v5740_v36, %v2153_v3  ;;  %v2152_v36 = vld [vmem:[#allocation2 + $0x3a8] sm:$0xff]  ;;  %v5979_v22 = vsel %vm1514_vm1, %v5959_v2, 0.0 }
 0x215   : > { %v4528_v15 = vpack.c.bf16 %v2666_v12, %v2666_v12  ;;  %v3547_v16 = vsel %vm1514_vm1, %v2666_v12, 0.0  ;;  %v3699_v17 = vmul.f32 %v2666_v12, %v2666_v12  ;;  %v3937_v18 = vadd.f32 %v3936_v5, %v3935_v9 }
 0x216   : > { %v3548_v19 = vadd.f32 %v3547_v16, %v3546_v10  ;;  %v5971_v20 = vsel %vm2413_vm5, %v2285_v62, %v2541_v11  ;;  %v2667_v54 = vsel %vm2411_vm6, %v2283_v63, %v2539_v13  ;;  %vm2416_vm7 = vcmp.ge.f32.partialorder %v5968_v14, 0.0 }
 0x217   : > { %3307 = vst.msk [vmem:[%s5206_s26 + $0x1c0] sm:$0xf] %vm3194_vm3, %v4528_v15  ;;  %v4531_v35 = vpack.c.bf16 %v5971_v20, %v5971_v20  ;;  %v3938_v23 = vsel %vm1514_vm1, %v3699_v17, 0.0  ;;  %v4529_v24 = vpack.c.bf16 %v2667_v54, %v2667_v54  ;;  %v3549_v28 = vsel %vm1514_vm1, %v2667_v54, 0.0 }
 0x218   : > { %v5983_v27 = vadd.f32 %v3938_v23, %v3937_v18  ;;  %v5988_v29 = vmul.f32 %v2667_v54, %v2667_v54  ;;  %v2286_v31 = vadd.f32 %v4875_v30, %v2151_v21  ;;  %v5995_v34 = vadd.f32 %v3549_v28, %v3548_v19 }
 0x219   : > { %3310 = vst.msk [vmem:[%s5206_s26 + $0x1cc] sm:$0xf] %vm3194_vm3, %v4531_v35  ;;  %3308 = vst.msk [vmem:[%s5206_s26 + $0x1c4] sm:$0xf] %vm3194_vm3, %v4529_v24  ;;  %v2544_v37 = vmul.f32 0.2, %v5968_v14  ;;  %v2289_v38 = vadd.f32 %v4875_v30, %v2154_v7  ;;  %v2287_v39 = vadd.f32 %v4875_v30, %v2152_v36  ;;  %v2292_v44 = vadd.f32 %v4875_v30, %v2157_v25 }
 0x21a   : > { %vm2414_vm8 = vcmp.ge.f32.partialorder %v2286_v31, 0.0  ;;  %v2542_v43 = vmul.f32 0.2, %v2286_v31  ;;  %v2290_v45 = vadd.f32 %v4875_v30, %v2155_v26  ;;  %v2291_v48 = vadd.f32 %v4875_v30, %v2156_v33 }
 0x21b   : > { %vm2415_vm9 = vcmp.ge.f32.partialorder %v2287_v39, 0.0  ;;  %v2543_v47 = vmul.f32 0.2, %v2287_v39  ;;  %v2293_v49 = vadd.f32 %v4875_v30, %v2158_v32  ;;  %v2294_v51 = vadd.f32 %v4875_v30, %v2159_v40 }
 0x21c   : > { %v5998_v50 = vsel %vm2414_vm8, %v2286_v31, %v2542_v43  ;;  %v2295_v52 = vadd.f32 %v4875_v30, %v2160_v41  ;;  %v2296_v53 = vadd.f32 %v4875_v30, %v2161_v42  ;;  %v2545_v56 = vmul.f32 0.2, %v2289_v38 }
 0x21d   : > { %v4532_v55 = vpack.c.bf16 %v5998_v50, %v5998_v50  ;;  %v6002_v57 = vsel %vm2415_vm9, %v2287_v39, %v2543_v47  ;;  %v2297_v58 = vadd.f32 %v4875_v30, %v2162_v46  ;;  %vm2417_vm10 = vcmp.ge.f32.partialorder %v2289_v38, 0.0 }
 0x21e   : > { %v4533_v59 = vpack.c.bf16 %v6002_v57, %v6002_v57  ;;  %vm2418_vm11 = vcmp.ge.f32.partialorder %v2290_v45, 0.0  ;;  %vm2419_vm12 = vcmp.ge.f32.partialorder %v2291_v48, 0.0  ;;  %vm2420_vm13 = vcmp.ge.f32.partialorder %v2292_v44, 0.0 }
 0x21f   : > { %3311 = vst.msk [vmem:[%s5206_s26 + $0x1d0] sm:$0xf] %vm3194_vm3, %v4532_v55  ;;  %vm2421_vm14 = vcmp.ge.f32.partialorder %v2293_v49, 0.0  ;;  %vm2422_vm15 = vcmp.ge.f32.partialorder %v2294_v51, 0.0  ;;  %vm2423_vm0 = vcmp.ge.f32.partialorder %v2295_v52, 0.0  ;;  %vm2424_vm2 = vcmp.ge.f32.partialorder %v2296_v53, 0.0 }
 0x220   : > { %3312 = vst.msk [vmem:[%s5206_s26 + $0x1d4] sm:$0xf] %vm3194_vm3, %v4533_v59  ;;  %vm2425_vm4 = vcmp.ge.f32.partialorder %v2297_v58, 0.0  ;;  %v2546_v60 = vmul.f32 0.2, %v2290_v45  ;;  %v2672_v1 = vsel %vm2416_vm7, %v5968_v14, %v2544_v37  ;;  %v2673_v6 = vsel %vm2417_vm10, %v2289_v38, %v2545_v56 }
 0x221   : > { %v2547_v61 = vmul.f32 0.2, %v2291_v48  ;;  %v2548_v62 = vmul.f32 0.2, %v2292_v44  ;;  %v2549_v63 = vmul.f32 0.2, %v2293_v49  ;;  %v4534_v16 = vpack.c.bf16 %v2672_v1, %v2672_v1 }
 0x222   : > { %v2550_v0 = vmul.f32 0.2, %v2294_v51  ;;  %v2551_v3 = vmul.f32 0.2, %v2295_v52  ;;  %v2552_v4 = vmul.f32 0.2, %v2296_v53  ;;  %v2674_v8 = vsel %vm2418_vm11, %v2290_v45, %v2546_v60 }
 0x223   : > { %v2553_v5 = vmul.f32 0.2, %v2297_v58  ;;  %v6016_v9 = vsel %vm2419_vm12, %v2291_v48, %v2547_v61  ;;  %v6019_v10 = vsel %vm2420_vm13, %v2292_v44, %v2548_v62  ;;  %v6022_v11 = vsel %vm2421_vm14, %v2293_v49, %v2549_v63  ;;  %3313 = vst.msk [vmem:[%s5206_s26 + $0x1d8] sm:$0xf] %vm3194_vm3, %v4534_v16 }
 0x224   : > { %v6025_v12 = vsel %vm2422_vm15, %v2294_v51, %v2550_v0  ;;  %v6028_v13 = vsel %vm2423_vm0, %v2295_v52, %v2551_v3  ;;  %v6031_v14 = vsel %vm2424_vm2, %v2296_v53, %v2552_v4  ;;  %v4535_v17 = vpack.c.bf16 %v2673_v6, %v2673_v6 }
 0x225   : > { %v6034_v15 = vsel %vm2425_vm4, %v2297_v58, %v2553_v5  ;;  %v4536_v18 = vpack.c.bf16 %v2674_v8, %v2674_v8  ;;  %v4537_v19 = vpack.c.bf16 %v6016_v9, %v6016_v9  ;;  %v4538_v54 = vpack.c.bf16 %v6019_v10, %v6019_v10 }
 0x226   : > { %v4539_v21 = vpack.c.bf16 %v6022_v11, %v6022_v11  ;;  %v4540_v35 = vpack.c.bf16 %v6025_v12, %v6025_v12  ;;  %v4541_v7 = vpack.c.bf16 %v6028_v13, %v6028_v13  ;;  %v4542_v36 = vpack.c.bf16 %v6031_v14, %v6031_v14  ;;  %3314 = vst.msk [vmem:[%s5206_s26 + $0x1dc] sm:$0xf] %vm3194_vm3, %v4535_v17 }
 0x227   : > { %v4543_v23 = vpack.c.bf16 %v6034_v15, %v6034_v15  ;;  %3315 = vst.msk [vmem:[%s5206_s26 + $0x1e0] sm:$0xf] %vm3194_vm3, %v4536_v18  ;;  %3316 = vst.msk [vmem:[%s5206_s26 + $0x1e4] sm:$0xf] %vm3194_vm3, %v4537_v19  ;;  %v3552_v24 = vadd.f32 %v5979_v22, %v5995_v34  ;;  %v3553_v25 = vsel %vm1514_vm1, %v5971_v20, 0.0  ;;  %v3701_v26 = vmul.f32 %v5959_v2, %v5959_v2 }
 0x228   : > { %3317 = vst.msk [vmem:[%s5206_s26 + $0x1e8] sm:$0xf] %vm3194_vm3, %v4538_v54  ;;  %3318 = vst.msk [vmem:[%s5206_s26 + $0x1ec] sm:$0xf] %vm3194_vm3, %v4539_v21  ;;  %v3940_v28 = vsel %vm1514_vm1, %v5988_v29, 0.0  ;;  %v3555_v31 = vsel %vm1514_vm1, %v5998_v50, 0.0  ;;  %v3702_v32 = vmul.f32 %v5971_v20, %v5971_v20  ;;  %v3703_v29 = vmul.f32 %v5998_v50, %v5998_v50 }
 0x229   : > { %3319 = vst.msk [vmem:[%s5206_s26 + $0x1f0] sm:$0xf] %vm3194_vm3, %v4540_v35  ;;  %3320 = vst.msk [vmem:[%s5206_s26 + $0x1f4] sm:$0xf] %vm3194_vm3, %v4541_v7  ;;  %v3554_v22 = vadd.f32 %v3553_v25, %v3552_v24  ;;  %v3941_v30 = vadd.f32 %v3940_v28, %v5983_v27  ;;  %v3557_v2 = vsel %vm1514_vm1, %v6002_v57, 0.0  ;;  %v3942_v34 = vsel %vm1514_vm1, %v3701_v26, 0.0 }
 0x22a   : > { %3321 = vst.msk [vmem:[%s5206_s26 + $0x1f8] sm:$0xf] %vm3194_vm3, %v4542_v36  ;;  %3322 = vst.msk [vmem:[%s5206_s26 + $0x1fc] sm:$0xf] %vm3194_vm3, %v4543_v23  ;;  %v3559_v38 = vsel %vm1514_vm1, %v2672_v1, 0.0  ;;  %v3704_v40 = vmul.f32 %v6002_v57, %v6002_v57  ;;  %v3944_v41 = vsel %vm1514_vm1, %v3702_v32, 0.0  ;;  %v3705_v44 = vmul.f32 %v2672_v1, %v2672_v1 }
 0x22b   : > { %v3556_v33 = vadd.f32 %v3555_v31, %v3554_v22  ;;  %v3943_v39 = vadd.f32 %v3942_v34, %v3941_v30  ;;  %v3561_v20 = vsel %vm1514_vm1, %v2673_v6, 0.0  ;;  %v3946_v45 = vsel %vm1514_vm1, %v3703_v29, 0.0  ;;  %s4876_s26 = scalar_lea.vmem %s6141_s13, 32 }
 0x22c   : > { %v3563_v46 = vsel %vm1514_vm1, %v2674_v8, 0.0  ;;  %v3706_v49 = vmul.f32 %v2673_v6, %v2673_v6  ;;  %v3948_v50 = vsel %vm1514_vm1, %v3704_v40, 0.0  ;;  %v3565_v51 = vsel %vm1514_vm1, %v6016_v9, 0.0  ;;  %p4877_p12 = scmp.ne.s32.totalorder %s6141_s13, %s4876_s26  ;;  %p4884_p2 = scmp.lt.s32.totalorder %s4882_s30, %s4876_s26 }
 0x22d   : > { %v3558_v37 = vadd.f32 %v3557_v2, %v3556_v33  ;;  %v3945_v42 = vadd.f32 %v3944_v41, %v3943_v39  ;;  %v3707_v55 = vmul.f32 %v2674_v8, %v2674_v8  ;;  %v3950_v56 = vsel %vm1514_vm1, %v3705_v44, 0.0 }
 0x22e   : > { %v3567_v57 = vsel %vm1514_vm1, %v6019_v10, 0.0  ;;  %v3708_v60 = vmul.f32 %v6016_v9, %v6016_v9  ;;  %v3952_v61 = vsel %vm1514_vm1, %v3706_v49, 0.0  ;;  %v3569_v62 = vsel %vm1514_vm1, %v6022_v11, 0.0  ;;  %p4878_p13 = pnand %p4877_p12, %p5022_p4  ;;  %p4885_p3 = por %p4884_p2, %p4883_p1 }
 0x22f   : > { %v3560_v27 = vadd.f32 %v3559_v38, %v3558_v37  ;;  %v3947_v47 = vadd.f32 %v3946_v45, %v3945_v42  ;;  %v3709_v1 = vmul.f32 %v6019_v10, %v6019_v10  ;;  %v3954_v3 = vsel %vm1514_vm1, %v3707_v55, 0.0 }
 0x230   : > { %v3571_v4 = vsel %vm1514_vm1, %v6025_v12, 0.0  ;;  %v3710_v8 = vmul.f32 %v6022_v11, %v6022_v11  ;;  %v3956_v9 = vsel %vm1514_vm1, %v3708_v60, 0.0  ;;  %v3573_v16 = vsel %vm1514_vm1, %v6028_v13, 0.0  ;;  %p4879_p0 = pneg %p4878_p13 }
 0x231   : > { %v3562_v43 = vadd.f32 %v3561_v20, %v3560_v27  ;;  %v3949_v52 = vadd.f32 %v3948_v50, %v3947_v47  ;;  %v3711_v10 = vmul.f32 %v6025_v12, %v6025_v12  ;;  %v3958_v19 = vsel %vm1514_vm1, %v3709_v1, 0.0 }
 0x232   : > { %v3575_v54 = vsel %vm1514_vm1, %v6031_v14, 0.0  ;;  %v3712_v11 = vmul.f32 %v6028_v13, %v6028_v13  ;;  %v3960_v7 = vsel %vm1514_vm1, %v3710_v8, 0.0  ;;  %v3577_v36 = vsel %vm1514_vm1, %v6034_v15, 0.0  ;;  %p4886_p5 = pnand %p4885_p3, %p4879_p0 }
 0x233   : > { %v3564_v48 = vadd.f32 %v3563_v46, %v3562_v43  ;;  %v3951_v58 = vadd.f32 %v3950_v56, %v3949_v52  ;;  %v3713_v12 = vmul.f32 %v6031_v14, %v6031_v14  ;;  %v3962_v25 = vsel %vm1514_vm1, %v3711_v10, 0.0 }
 0x234   : > { %v3714_v22 = vmul.f32 %v6034_v15, %v6034_v15  ;;  %v3964_v30 = vsel %vm1514_vm1, %v3712_v11, 0.0  ;;  %vm3585_vm3 = vcmask 57344  }
 0x235   : > { %v3566_v53 = vadd.f32 %v3565_v51, %v3564_v48  ;;  %v3953_v63 = vadd.f32 %v3952_v61, %v3951_v58  ;;  %v3966_v32 = vsel %vm1514_vm1, %v3713_v12, 0.0 }
 0x236   : > { %v3968_v34 = vsel %vm1514_vm1, %v3714_v22, 0.0 }
 0x237   : > { %v3568_v59 = vadd.f32 %v3567_v57, %v3566_v53  ;;  %v3955_v5 = vadd.f32 %v3954_v3, %v3953_v63 }
 0x239   : > { %v3570_v0 = vadd.f32 %v3569_v62, %v3568_v59  ;;  %v3957_v17 = vadd.f32 %v3956_v9, %v3955_v5 }
 0x23b   : > { %v3572_v6 = vadd.f32 %v3571_v4, %v3570_v0  ;;  %v3959_v21 = vadd.f32 %v3958_v19, %v3957_v17 }
 0x23d   : > { %v3574_v18 = vadd.f32 %v3573_v16, %v3572_v6  ;;  %v3961_v23 = vadd.f32 %v3960_v7, %v3959_v21 }
 0x23f   : > { %v3576_v35 = vadd.f32 %v3575_v54, %v3574_v18  ;;  %v3963_v26 = vadd.f32 %v3962_v25, %v3961_v23 }
 0x241   : > { %v3578_v24 = vadd.f32 %v3577_v36, %v3576_v35  ;;  %v3965_v13 = vadd.f32 %v3964_v30, %v3963_v26 }
 0x243   : > { %v3579_v28 = vrot.slane %v3578_v24, 4  ;;  %v3967_v33 = vadd.f32 %v3966_v32, %v3965_v13 }
 0x245   : > { %v3580_v31 = vadd.f32 %v3579_v28, %v3578_v24  ;;  %v3969_v14 = vadd.f32 %v3968_v34, %v3967_v33 }
 0x247   : > { %v3581_v2 = vrot.slane %v3580_v31, 2  ;;  %v3970_v37 = vrot.slane %v3969_v14, 4 }
 0x249   : > { %v3582_v29 = vadd.f32 %v3581_v2, %v3580_v31  ;;  %v3971_v39 = vadd.f32 %v3970_v37, %v3969_v14 }
 0x24b   : > { %v3583_v38 = vrot.slane %v3582_v29, 1  ;;  %v3972_v27 = vrot.slane %v3971_v39, 2 }
 0x24d   : > { %v3584_v15 = vadd.f32 %v3583_v38, %v3582_v29  ;;  %v3973_v40 = vadd.f32 %v3972_v27, %v3971_v39 }
 0x24f   : > { %3586 = vst.msk [vmem:[%s268_s11] sm:$0x1] %vm3585_vm3, %v3584_v15  ;;  %v3974_v41 = vrot.slane %v3973_v40, 1 }
 0x251   : > { %v3975_v20 = vadd.f32 %v3974_v41, %v3973_v40 }
 0x253   : > { %3976 = vst.msk [vmem:[%s268_s11 + $0x1] sm:$0x1] %vm3585_vm3, %v3975_v20 }
 0x254   : > { %4889 = shalt.err (!%p4886_p5)
}
 0x255   : > { %s4890_s5 = scalar_lea.hbm %s6139_s22, 32  ;;  %s4894_s8 = scalar_lea.hbm %s6190_s4, 64 }
 0x256   : > { %p4891_p6 = scmp.ne.s32.totalorder %s6139_s22, %s4890_s5  ;;  %p4895_p10 = scmp.lt.u32.totalorder %s6139_s22, %s6190_s4 }
 0x257   : > { %p4896_p11 = scmp.lt.u32.totalorder %s4894_s8, %s4890_s5  ;;  %p4898_p13 = scmp.lt.u32.totalorder %s4890_s5, %s6139_s22 }
 0x258   : > { %p4892_p7 = pnand %p4891_p6, %p5022_p4 }
 0x259   : > { %p4897_p12 = por %p4896_p11, %p4895_p10 }
 0x25a   : > { %p4893_p9 = pneg %p4892_p7 }
 0x25b   : > { %p4899_p0 = por %p4898_p13, %p4897_p12 }
 0x25d   : > { %p4900_p1 = pnand %p4899_p0, %p4893_p9 }
 0x25f   : > { %4903 = shalt.err (!%p4900_p1)
}
 0x260   : > { %4751 = dma.vmem_to_hbm [thread:$0]  (%p5022_p4), %s6141_s13, 32, %s6139_s22, %s3986_s24  }
 0x261 PF: > { %p4757_p2 = scmp.ge.s32.totalorder %s4954_s20, 2  ;;  %s4027_s11 = sand.u32 1, %s4934_s15  }
 0x262   : > { %s4028_s12 = scalar_lea.sflag [#allocation4], %s4027_s11 }
 0x263   : > { %p4754_p3 = pnand %p4757_p2, %p5029_p8 }
 0x265   : > { %4929 = dma.done.wait (!%p4754_p3), %s4028_s12, 32  }
 0x266   : > { %4931 = vsyncadd (!%p4754_p3), %s4028_s12, 4294967264  ;;  %s18_s20 = sadd.s32 1, %s4954_s20   ;;  %s6193_s15 = smov %s4938_s16 }
 0x267   : > { %p15_p5 = scmp.ge.s32.totalorder %s18_s20, 4   ;;  %s6194_s16 = smov %s4942_s17 }
 0x268   : > { %s6195_s17 = smov %s5035_s28  ;;  %s6196_s18 = smov %s4950_s19 }
 0x269   : > { %s6197_s19 = smov %s6199_s23  ;;  %17 = sbr.rel (!%p15_p5) target bundleno = 4 (0x4), region = 97 }
 0x270   :  { %4033 = vsyncpa [#allocation4], 1 }
 0x271   :  { %4035 = vsyncpa [#allocation4 + $0x1], 1 }

// kernel: discriminator_forward.5
= control target key start
LH: loop header
LB: loop body
LE: loop exit
PB: predicated region body
PF: predicated region fallthrough
CT: control target
= control target key end

     0   :  { %s1646_s15 = smov 0   ;;  %s1648_s16 = smov 0   ;;  %s2005_s0 = inlined_call_operand.vmem [shape: bf16[512,128], index: 0, kind: input, shape index: {}]   ;;  %s2006_s1 = inlined_call_operand.vmem [shape: bf16[128,16], index: 1, kind: input, shape index: {}]   ;;  %s2007_s2 = inlined_call_operand.vmem [shape: f32[1,16], index: 2, kind: input, shape index: {}]   ;;  %s2008_s3 = inlined_call_operand.vmem [shape: bf16[512,16], index: 3, kind: output, shape index: {0}]   ;;  %s2009_s4 = inlined_call_operand.vmem [shape: f32[2,2,16], index: 4, kind: output, shape index: {1}]  }
   0x1   :  { %s1650_s17 = smov 0  }
   0x2 LB: > { %s34_s18 = sadd.s32 1, %s1615_s16  ;;  %p1364_p0 = scmp.ge.s32.totalorder %s1619_s17, 1  ;;  %s1619_s17 = sphi %s1650_s17, %s15_s17   ;;  %s1615_s16 = sphi %s1648_s16, %s2011_s16   ;;  %s1611_s15 = sphi %s1646_s15, %s2010_s15  }
   0x3   : > { %p36_p1 = scmp.ge.s32.totalorder %s34_s18, 2  ;;  %p218_p2 = scmp.lt.s32.totalorder %s1619_s17, 3 }
   0x5   : > { %s2013_s18 = smov (%p36_p1, %s34_s18), 0  ;;  %p219_p3 = pnand %p1364_p0, %p218_p2 }
   0x6   : > { %v1573_v0 = vld [vmem:[%s2006_s1] sm:$0xff] (!%p219_p3)   ;;  %s1365_s21 = sshll.u32 (!%p219_p3), %s1611_s15, 5  ;;  %v1574_v1 = vld [vmem:[%s2006_s1 + $0x8] sm:$0xff] (!%p219_p3)   ;;  %v1575_v2 = vld [vmem:[%s2006_s1 + $0x10] sm:$0xff] (!%p219_p3)   ;;  %vm663_vm0 = vcmask (!%p219_p3), 130048   ;;  %vm999_vm1 = vcmask (!%p219_p3), 125952  }
   0x7   : > { %222 = sbr.rel (%p219_p3) target bundleno = 343 (0x157), region = 32  ;;  %p269_p4 = scmp.lt.s32.totalorder (!%p219_p3), %s1365_s21, 63  ;;  %1485 = vmatprep.subr.bf16.mxu0 (!%p219_p3), %v1573_v0  ;;  %1533 = vmatprep.subr.bf16.mxu1 (!%p219_p3), %v1573_v0  ;;  %v1576_v3 = vld [vmem:[%s2006_s1 + $0x18] sm:$0xff] (!%p219_p3)   ;;  %v1577_v5 = vld [vmem:[%s2006_s1 + $0x20] sm:$0xff] (!%p219_p3)   ;;  %v1578_v6 = vld [vmem:[%s2006_s1 + $0x28] sm:$0xff] (!%p219_p3)   ;;  %vm1102_vm2 = vcmask (!%p219_p3), 122880  }
   0x8   : > { %1486 = vmatpush3.bf16.msra.mxu0 (!%p219_p3), %v1573_v0  ;;  %1541 = vmatpush3.bf16.msra.mxu1 (!%p219_p3), %v1573_v0  ;;  %v1579_v8 = vld [vmem:[%s2006_s1 + $0x30] sm:$0xff] (!%p219_p3)   ;;  %v1580_v9 = vld [vmem:[%s2006_s1 + $0x38] sm:$0xff] (!%p219_p3)   ;;  %v1728_v32 = vld [vmem:[%s2007_s2] ss:$0 sm:$0xff] (!%p219_p3)  ;;  %p298_p5 = scmp.lt.s32.totalorder (!%p219_p3), %s1611_s15, 1 }
   0x9   : > { %1487 = vmatprep.subr.bf16.mxu0 (!%p219_p3), %v1574_v1  ;;  %1534 = vmatprep.subr.bf16.mxu1 (!%p219_p3), %v1574_v1 }
   0xc   : > { %1488 = vmatpush3.bf16.msra.mxu0 (!%p219_p3), %v1574_v1  ;;  %1542 = vmatpush3.bf16.msra.mxu1 (!%p219_p3), %v1574_v1 }
   0xd   : > { %1489 = vmatprep.subr.bf16.mxu0 (!%p219_p3), %v1575_v2  ;;  %1535 = vmatprep.subr.bf16.mxu1 (!%p219_p3), %v1575_v2 }
   0xe   : > { %s2015_s21 = smov (!%p269_p4, %s1365_s21), 63  ;;  %s2017_s15 = smov (!%p298_p5, %s1611_s15), 1 }
   0xf   : > { %s1366_s26 = sshll.u32 %s2015_s21, 2  ;;  %s1369_s21 = sshll.u32 %s2017_s15, 1 }
  0x10   : > { %s1684_s29 = scalar_lea.vmem %s2005_s0, %s1366_s26  ;;  %1490 = vmatpush3.bf16.msra.mxu0 %v1575_v2  ;;  %1543 = vmatpush3.bf16.msra.mxu1 %v1575_v2  ;;  %s1738_s23 = scalar_lea.vmem %s2008_s3, %s1366_s26 }
  0x11   : > { %v1581_v4 = vld [vmem:[%s1684_s29] sm:$0xff]   ;;  %1491 = vmatprep.subr.bf16.mxu0 %v1576_v3  ;;  %1536 = vmatprep.subr.bf16.mxu1 %v1576_v3  ;;  %v1582_v10 = vld [vmem:[%s1684_s29 + $0x8] sm:$0xff]   ;;  %v1583_v12 = vld [vmem:[%s1684_s29 + $0x10] sm:$0xff]   ;;  %s304_s26 = scalar_lea.vmem %s2009_s4, %s1369_s21 }
  0x12   : > { %1501 = vmatprep.mubr.bf16.mxu0 %v1581_v4  ;;  %v1589_v7 = vld [vmem:[%s1684_s29 + $0x40] sm:$0xff]   ;;  %v1590_v11 = vld [vmem:[%s1684_s29 + $0x48] sm:$0xff]   ;;  %v1591_v13 = vld [vmem:[%s1684_s29 + $0x50] sm:$0xff]  }
  0x13   : > { %1517 = vmatprep.mubr.bf16.mxu1 %v1589_v7  ;;  %v1584_v14 = vld [vmem:[%s1684_s29 + $0x18] sm:$0xff]   ;;  %v1585_v16 = vld [vmem:[%s1684_s29 + $0x20] sm:$0xff]   ;;  %v1586_v18 = vld [vmem:[%s1684_s29 + $0x28] sm:$0xff]  }
  0x14   : > { %1492 = vmatpush3.bf16.msra.mxu0 %v1576_v3  ;;  %1544 = vmatpush3.bf16.msra.mxu1 %v1576_v3  ;;  %v1592_v15 = vld [vmem:[%s1684_s29 + $0x58] sm:$0xff]   ;;  %v1593_v17 = vld [vmem:[%s1684_s29 + $0x60] sm:$0xff]   ;;  %v1594_v19 = vld [vmem:[%s1684_s29 + $0x68] sm:$0xff]  }
  0x15   : > { %1493 = vmatprep.subr.bf16.mxu0 %v1577_v5  ;;  %1537 = vmatprep.subr.bf16.mxu1 %v1577_v5  ;;  %v1587_v20 = vld [vmem:[%s1684_s29 + $0x30] sm:$0xff]   ;;  %v1588_v22 = vld [vmem:[%s1684_s29 + $0x38] sm:$0xff]  }
  0x16   : > { %v1595_v21 = vld [vmem:[%s1684_s29 + $0x70] sm:$0xff]   ;;  %v1596_v23 = vld [vmem:[%s1684_s29 + $0x78] sm:$0xff]  }
  0x18   : > { %1494 = vmatpush3.bf16.msra.mxu0 %v1577_v5  ;;  %1545 = vmatpush3.bf16.msra.mxu1 %v1577_v5 }
  0x19   : > { %1495 = vmatprep.subr.bf16.mxu0 %v1578_v6  ;;  %1538 = vmatprep.subr.bf16.mxu1 %v1578_v6 }
  0x1c   : > { %1496 = vmatpush3.bf16.msra.mxu0 %v1578_v6  ;;  %1546 = vmatpush3.bf16.msra.mxu1 %v1578_v6 }
  0x1d   : > { %1497 = vmatprep.subr.bf16.mxu0 %v1579_v8  ;;  %1539 = vmatprep.subr.bf16.mxu1 %v1579_v8 }
  0x20   : > { %1498 = vmatpush3.bf16.msra.mxu0 %v1579_v8  ;;  %1547 = vmatpush3.bf16.msra.mxu1 %v1579_v8 }
  0x21   : > { %1499 = vmatprep.subr.bf16.mxu0 %v1580_v9  ;;  %1540 = vmatprep.subr.bf16.mxu1 %v1580_v9 }
  0x24   : > { %1500 = vmatpush3.bf16.msra.mxu0 %v1580_v9  ;;  %1548 = vmatpush3.bf16.msra.mxu1 %v1580_v9 }
  0x27   : > { %1502 = vmatmul.mubr.bf16.vlgmr.msra.gmra.mrb[0].mxu0 %v1582_v10  ;;  %1518 = vmatmul.mubr.bf16.vlgmr.msra.gmra.mrb[0].mxu1 %v1590_v11 }
  0x28   : > { %1505 = vmatprep.mubr.bf16.mxu0 %v1583_v12  ;;  %1521 = vmatprep.mubr.bf16.mxu1 %v1591_v13 }
  0x2f   : > { %1506 = vmatmul.mubr.bf16.gmra.mrb[4].mxu0 %v1584_v14  ;;  %1522 = vmatmul.mubr.bf16.gmra.mrb[4].mxu1 %v1592_v15 }
  0x30   : > { %1509 = vmatprep.mubr.bf16.mxu0 %v1585_v16  ;;  %1525 = vmatprep.mubr.bf16.mxu1 %v1593_v17 }
  0x37   : > { %1510 = vmatmul.mubr.bf16.gmra.mrb[8].mxu0 %v1586_v18  ;;  %1526 = vmatmul.mubr.bf16.gmra.mrb[8].mxu1 %v1594_v19 }
  0x38   : > { %1513 = vmatprep.mubr.bf16.mxu0 %v1587_v20  ;;  %1529 = vmatprep.mubr.bf16.mxu1 %v1595_v21 }
  0x3f   : > { %1514 = vmatmul.mubr.bf16.gmra.mrb[12].mxu0 %v1588_v22  ;;  %1530 = vmatmul.mubr.bf16.gmra.mrb[12].mxu1 %v1596_v23 }
  0xfa   : > { %v1503_v24 = vpop.f32.mrb[0].mxu0  ;;  %v1519_v25 = vpop.f32.mrb[0].mxu1 }
  0xfb   : > { %666 = vst.msk [vmem:[#allocation2 + $0x10] sm:$0xff] %vm663_vm0, %v1503_v24  ;;  %v532_v26 = vpop.f32.mrb[1].mxu0  ;;  %682 = vst.msk [vmem:[#allocation2 + $0x90] sm:$0xff] %vm663_vm0, %v1519_v25  ;;  %v596_v27 = vpop.f32.mrb[1].mxu1 }
  0xfc   : > { %664 = vst.msk [vmem:[#allocation2] sm:$0xff] %vm663_vm0, %v532_v26  ;;  %v1504_v28 = vpop.f32.mrb[2].mxu0  ;;  %680 = vst.msk [vmem:[#allocation2 + $0x80] sm:$0xff] %vm663_vm0, %v596_v27  ;;  %v1520_v29 = vpop.f32.mrb[2].mxu1 }
  0xfd   : > { %667 = vst.msk [vmem:[#allocation2 + $0x18] sm:$0xff] %vm663_vm0, %v1504_v28  ;;  %v535_v30 = vpop.f32.mrb[3].mxu0  ;;  %683 = vst.msk [vmem:[#allocation2 + $0x98] sm:$0xff] %vm663_vm0, %v1520_v29  ;;  %v599_v31 = vpop.f32.mrb[3].mxu1 }
  0xfe   : > { %665 = vst.msk [vmem:[#allocation2 + $0x8] sm:$0xff] %vm663_vm0, %v535_v30  ;;  %681 = vst.msk [vmem:[#allocation2 + $0x88] sm:$0xff] %vm663_vm0, %v599_v31 }
 0x102   : > { %v802_v33 = vld [vmem:[#allocation2 + $0x10] sm:$0xff]  ;;  %v1507_v34 = vpop.f32.mrb[4].mxu0  ;;  %v1523_v36 = vpop.f32.mrb[4].mxu1 }
 0x103   : > { %v818_v35 = vld [vmem:[#allocation2 + $0x90] sm:$0xff]  ;;  %v841_v37 = vadd.f32 %v1728_v32, %v802_v33  ;;  %v800_v38 = vld [vmem:[#allocation2] sm:$0xff]  ;;  %670 = vst.msk [vmem:[#allocation2 + $0x30] sm:$0xff] %vm663_vm0, %v1507_v34  ;;  %v548_v39 = vpop.f32.mrb[5].mxu0  ;;  %686 = vst.msk [vmem:[#allocation2 + $0xb0] sm:$0xff] %vm663_vm0, %v1523_v36  ;;  %v612_v41 = vpop.f32.mrb[5].mxu1 }
 0x104   : > { %v816_v40 = vld [vmem:[#allocation2 + $0x80] sm:$0xff]  ;;  %v839_v42 = vadd.f32 %v1728_v32, %v800_v38  ;;  %v803_v43 = vld [vmem:[#allocation2 + $0x18] sm:$0xff]  ;;  %668 = vst.msk [vmem:[#allocation2 + $0x20] sm:$0xff] %vm663_vm0, %v548_v39  ;;  %v1508_v44 = vpop.f32.mrb[6].mxu0  ;;  %684 = vst.msk [vmem:[#allocation2 + $0xa0] sm:$0xff] %vm663_vm0, %v612_v41  ;;  %v1524_v45 = vpop.f32.mrb[6].mxu1  ;;  %v1746_v50 = vadd.f32 %v1728_v32, %v818_v35 }
 0x105   : > { %v1431_v46 = vpack.c.bf16 %v841_v37, %v841_v37  ;;  %v842_v47 = vadd.f32 %v1728_v32, %v803_v43  ;;  %v801_v48 = vld [vmem:[#allocation2 + $0x8] sm:$0xff]  ;;  %671 = vst.msk [vmem:[#allocation2 + $0x38] sm:$0xff] %vm663_vm0, %v1508_v44  ;;  %v551_v49 = vpop.f32.mrb[7].mxu0  ;;  %687 = vst.msk [vmem:[#allocation2 + $0xb8] sm:$0xff] %vm663_vm0, %v1524_v45  ;;  %v615_v51 = vpop.f32.mrb[7].mxu1  ;;  %v1752_v55 = vadd.f32 %v1728_v32, %v816_v40  ;;  %v819_v1 = vld [vmem:[#allocation2 + $0x98] sm:$0xff] }
 0x106   : > { %v1429_v52 = vpack.c.bf16 %v839_v42, %v839_v42  ;;  %v1104_v53 = vmul.f32 %v839_v42, %v839_v42  ;;  %v840_v54 = vadd.f32 %v1728_v32, %v801_v48  ;;  %669 = vst.msk [vmem:[#allocation2 + $0x28] sm:$0xff] %vm663_vm0, %v551_v49  ;;  %685 = vst.msk [vmem:[#allocation2 + $0xa8] sm:$0xff] %vm663_vm0, %v615_v51  ;;  %v1033_v58 = vsel %vm663_vm0, %v839_v42, 0.0  ;;  %v817_v27 = vld [vmem:[#allocation2 + $0x88] sm:$0xff] }
 0x107   : > { %1002 = vst.msk [vmem:[%s1738_s23 + $0x8] sm:$0xf] %vm999_vm1, %v1431_v46  ;;  %v1106_v56 = vmul.f32 %v841_v37, %v841_v37  ;;  %v1432_v57 = vpack.c.bf16 %v842_v47, %v842_v47  ;;  %v1107_v62 = vmul.f32 %v842_v47, %v842_v47  ;;  %v1447_v0 = vpack.c.bf16 %v1746_v50, %v1746_v50 }
 0x108   : > { %1000 = vst.msk [vmem:[%s1738_s23] sm:$0xf] %vm999_vm1, %v1429_v52  ;;  %v1430_v59 = vpack.c.bf16 %v840_v54, %v840_v54  ;;  %v1034_v60 = vsel %vm663_vm0, %v840_v54, 0.0  ;;  %v1105_v61 = vmul.f32 %v840_v54, %v840_v54  ;;  %v1036_v2 = vsel %vm663_vm0, %v841_v37, 0.0 }
 0x109   : > { %1003 = vst.msk [vmem:[%s1738_s23 + $0xc] sm:$0xf] %vm999_vm1, %v1432_v57  ;;  %v1035_v63 = vadd.f32 %v1034_v60, %v1033_v58  ;;  %v1136_v3 = vsel %vm663_vm0, %v1104_v53, 0.0  ;;  %v1445_v7 = vpack.c.bf16 %v1752_v55, %v1752_v55  ;;  %1018 = vst.msk [vmem:[%s1738_s23 + $0x48] sm:$0xf] %vm999_vm1, %v1447_v0  ;;  %v1139_v15 = vsel %vm663_vm0, %v1106_v56, 0.0 }
 0x10a   : > { %1001 = vst.msk [vmem:[%s1738_s23 + $0x4] sm:$0xf] %vm999_vm1, %v1430_v59  ;;  %v1137_v4 = vsel %vm663_vm0, %v1105_v61, 0.0  ;;  %v806_v5 = vld [vmem:[#allocation2 + $0x30] sm:$0xff]  ;;  %v1511_v6 = vpop.f32.mrb[8].mxu0  ;;  %v1527_v8 = vpop.f32.mrb[8].mxu1  ;;  %v1783_v19 = vadd.f32 %v1728_v32, %v819_v1  ;;  %v1803_v40 = vadd.f32 %v1728_v32, %v817_v27 }
 0x10b   : > { %v1037_v9 = vadd.f32 %v1036_v2, %v1035_v63  ;;  %v1138_v10 = vadd.f32 %v1137_v4, %v1136_v3  ;;  %v845_v11 = vadd.f32 %v1728_v32, %v806_v5  ;;  %v804_v12 = vld [vmem:[#allocation2 + $0x20] sm:$0xff]  ;;  %674 = vst.msk [vmem:[#allocation2 + $0x50] sm:$0xff] %vm663_vm0, %v1511_v6  ;;  %v564_v13 = vpop.f32.mrb[9].mxu0  ;;  %690 = vst.msk [vmem:[#allocation2 + $0xd0] sm:$0xff] %vm663_vm0, %v1527_v8  ;;  %v628_v14 = vpop.f32.mrb[9].mxu1  ;;  %v1038_v21 = vsel %vm663_vm0, %v842_v47, 0.0 }
 0x10c   : > { %v843_v16 = vadd.f32 %v1728_v32, %v804_v12  ;;  %v807_v17 = vld [vmem:[#allocation2 + $0x38] sm:$0xff]  ;;  %672 = vst.msk [vmem:[#allocation2 + $0x40] sm:$0xff] %vm663_vm0, %v564_v13  ;;  %v1512_v18 = vpop.f32.mrb[10].mxu0  ;;  %688 = vst.msk [vmem:[#allocation2 + $0xc0] sm:$0xff] %vm663_vm0, %v628_v14  ;;  %v1528_v20 = vpop.f32.mrb[10].mxu1  ;;  %v1141_v22 = vsel %vm663_vm0, %v1107_v62, 0.0  ;;  %v1448_v39 = vpack.c.bf16 %v1783_v19, %v1783_v19  ;;  %v1446_v63 = vpack.c.bf16 %v1803_v40, %v1803_v40 }
 0x10d   : > { %1016 = vst.msk [vmem:[%s1738_s23 + $0x40] sm:$0xf] %vm999_vm1, %v1445_v7  ;;  %v1140_v23 = vadd.f32 %v1139_v15, %v1138_v10  ;;  %v1435_v24 = vpack.c.bf16 %v845_v11, %v845_v11  ;;  %v805_v25 = vld [vmem:[#allocation2 + $0x28] sm:$0xff]  ;;  %v567_v26 = vpop.f32.mrb[11].mxu0  ;;  %v631_v28 = vpop.f32.mrb[11].mxu1  ;;  %v1039_v30 = vadd.f32 %v1038_v21, %v1037_v9  ;;  %v846_v35 = vadd.f32 %v1728_v32, %v807_v17 }
 0x10e   : > { %675 = vst.msk [vmem:[#allocation2 + $0x58] sm:$0xff] %vm663_vm0, %v1512_v18  ;;  %691 = vst.msk [vmem:[#allocation2 + $0xd8] sm:$0xff] %vm663_vm0, %v1528_v20  ;;  %v1433_v29 = vpack.c.bf16 %v843_v16, %v843_v16  ;;  %v1040_v31 = vsel %vm663_vm0, %v843_v16, 0.0  ;;  %v1108_v33 = vmul.f32 %v843_v16, %v843_v16  ;;  %v844_v36 = vadd.f32 %v1728_v32, %v805_v25 }
 0x10f   : > { %673 = vst.msk [vmem:[#allocation2 + $0x48] sm:$0xff] %vm663_vm0, %v567_v26  ;;  %689 = vst.msk [vmem:[#allocation2 + $0xc8] sm:$0xff] %vm663_vm0, %v631_v28  ;;  %v1142_v34 = vadd.f32 %v1141_v22, %v1140_v23  ;;  %v1041_v37 = vadd.f32 %v1040_v31, %v1039_v30  ;;  %v1110_v41 = vmul.f32 %v845_v11, %v845_v11  ;;  %v1044_v51 = vsel %vm663_vm0, %v845_v11, 0.0  ;;  %v822_v23 = vld [vmem:[#allocation2 + $0xb0] sm:$0xff] }
 0x110   : > { %1006 = vst.msk [vmem:[%s1738_s23 + $0x18] sm:$0xf] %vm999_vm1, %v1435_v24  ;;  %1004 = vst.msk [vmem:[%s1738_s23 + $0x10] sm:$0xf] %vm999_vm1, %v1433_v29  ;;  %v1143_v38 = vsel %vm663_vm0, %v1108_v33, 0.0  ;;  %v1436_v43 = vpack.c.bf16 %v846_v35, %v846_v35  ;;  %v1434_v44 = vpack.c.bf16 %v844_v36, %v844_v36  ;;  %v1042_v45 = vsel %vm663_vm0, %v844_v36, 0.0 }
 0x111   : > { %v1144_v42 = vadd.f32 %v1143_v38, %v1142_v34  ;;  %v1109_v46 = vmul.f32 %v844_v36, %v844_v36  ;;  %1019 = vst.msk [vmem:[%s1738_s23 + $0x4c] sm:$0xf] %vm999_vm1, %v1448_v39  ;;  %v1043_v52 = vadd.f32 %v1042_v45, %v1041_v37  ;;  %v1111_v58 = vmul.f32 %v846_v35, %v846_v35 }
 0x112   : > { %v810_v47 = vld [vmem:[#allocation2 + $0x50] sm:$0xff]  ;;  %v1515_v48 = vpop.f32.mrb[12].mxu0  ;;  %v1531_v49 = vpop.f32.mrb[12].mxu1  ;;  %1007 = vst.msk [vmem:[%s1738_s23 + $0x1c] sm:$0xf] %vm999_vm1, %v1436_v43  ;;  %v1147_v1 = vsel %vm663_vm0, %v1110_v41, 0.0  ;;  %v1849_v38 = vadd.f32 %v1728_v32, %v822_v23 }
 0x113   : > { %v849_v53 = vadd.f32 %v1728_v32, %v810_v47  ;;  %v808_v54 = vld [vmem:[#allocation2 + $0x40] sm:$0xff]  ;;  %678 = vst.msk [vmem:[#allocation2 + $0x70] sm:$0xff] %vm663_vm0, %v1515_v48  ;;  %v580_v56 = vpop.f32.mrb[13].mxu0  ;;  %694 = vst.msk [vmem:[#allocation2 + $0xf0] sm:$0xff] %vm663_vm0, %v1531_v49  ;;  %v644_v57 = vpop.f32.mrb[13].mxu1  ;;  %v1145_v59 = vsel %vm663_vm0, %v1109_v46, 0.0  ;;  %v1045_v2 = vadd.f32 %v1044_v51, %v1043_v52 }
 0x114   : > { %1005 = vst.msk [vmem:[%s1738_s23 + $0x14] sm:$0xf] %vm999_vm1, %v1434_v44  ;;  %v847_v60 = vadd.f32 %v1728_v32, %v808_v54  ;;  %v1516_v62 = vpop.f32.mrb[14].mxu0  ;;  %v1532_v0 = vpop.f32.mrb[14].mxu1  ;;  %v1146_v3 = vadd.f32 %v1145_v59, %v1144_v42  ;;  %v1046_v8 = vsel %vm663_vm0, %v846_v35, 0.0  ;;  %v1149_v16 = vsel %vm663_vm0, %v1111_v58, 0.0 }
 0x115   : > { %v811_v61 = vld [vmem:[#allocation2 + $0x58] sm:$0xff]  ;;  %676 = vst.msk [vmem:[#allocation2 + $0x60] sm:$0xff] %vm663_vm0, %v580_v56  ;;  %692 = vst.msk [vmem:[#allocation2 + $0xe0] sm:$0xff] %vm663_vm0, %v644_v57  ;;  %v1439_v4 = vpack.c.bf16 %v849_v53, %v849_v53  ;;  %v583_v6 = vpop.f32.mrb[15].mxu0  ;;  %v647_v7 = vpop.f32.mrb[15].mxu1  ;;  %v1047_v13 = vadd.f32 %v1046_v8, %v1045_v2  ;;  %v1114_v18 = vmul.f32 %v849_v53, %v849_v53  ;;  %v1052_v28 = vsel %vm663_vm0, %v849_v53, 0.0 }
 0x116   : > { %v809_v5 = vld [vmem:[#allocation2 + $0x48] sm:$0xff]  ;;  %679 = vst.msk [vmem:[#allocation2 + $0x78] sm:$0xff] %vm663_vm0, %v1516_v62  ;;  %695 = vst.msk [vmem:[#allocation2 + $0xf8] sm:$0xff] %vm663_vm0, %v1532_v0  ;;  %v1437_v9 = vpack.c.bf16 %v847_v60, %v847_v60  ;;  %v1048_v10 = vsel %vm663_vm0, %v847_v60, 0.0  ;;  %v1112_v11 = vmul.f32 %v847_v60, %v847_v60  ;;  %v1148_v12 = vadd.f32 %v1147_v1, %v1146_v3  ;;  %v820_v58 = vld [vmem:[#allocation2 + $0xa0] sm:$0xff] }
 0x117   : > { %677 = vst.msk [vmem:[#allocation2 + $0x68] sm:$0xff] %vm663_vm0, %v583_v6  ;;  %693 = vst.msk [vmem:[#allocation2 + $0xe8] sm:$0xff] %vm663_vm0, %v647_v7  ;;  %v850_v14 = vadd.f32 %v1728_v32, %v811_v61  ;;  %v848_v15 = vadd.f32 %v1728_v32, %v809_v5  ;;  %v1049_v20 = vadd.f32 %v1048_v10, %v1047_v13  ;;  %v1155_v39 = vsel %vm663_vm0, %v1114_v18, 0.0  ;;  %v821_v0 = vld [vmem:[#allocation2 + $0xa8] sm:$0xff] }
 0x118   : > { %1017 = vst.msk [vmem:[%s1738_s23 + $0x44] sm:$0xf] %vm999_vm1, %v1446_v63  ;;  %1010 = vst.msk [vmem:[%s1738_s23 + $0x28] sm:$0xf] %vm999_vm1, %v1439_v4  ;;  %v1151_v17 = vsel %vm663_vm0, %v1112_v11, 0.0  ;;  %v1150_v21 = vadd.f32 %v1149_v16, %v1148_v12  ;;  %v1451_v57 = vpack.c.bf16 %v1849_v38, %v1849_v38  ;;  %v1120_v62 = vmul.f32 %v1752_v55, %v1752_v55  ;;  %v823_v63 = vld [vmem:[#allocation2 + $0xb8] sm:$0xff] }
 0x119   : > { %1008 = vst.msk [vmem:[%s1738_s23 + $0x20] sm:$0xf] %vm999_vm1, %v1437_v9  ;;  %v1440_v22 = vpack.c.bf16 %v850_v14, %v850_v14  ;;  %v1438_v24 = vpack.c.bf16 %v848_v15, %v848_v15  ;;  %v1050_v25 = vsel %vm663_vm0, %v848_v15, 0.0  ;;  %v1113_v26 = vmul.f32 %v848_v15, %v848_v15  ;;  %v826_v16 = vld [vmem:[#allocation2 + $0xd0] sm:$0xff] }
 0x11a   : > { %v814_v27 = vld [vmem:[#allocation2 + $0x70] sm:$0xff]  ;;  %v1152_v29 = vadd.f32 %v1151_v17, %v1150_v21  ;;  %v1051_v30 = vadd.f32 %v1050_v25, %v1049_v20  ;;  %v1115_v34 = vmul.f32 %v850_v14, %v850_v14  ;;  %v1054_v45 = vsel %vm663_vm0, %v850_v14, 0.0  ;;  %1022 = vst.msk [vmem:[%s1738_s23 + $0x58] sm:$0xf] %vm999_vm1, %v1451_v57 }
 0x11b   : > { %1011 = vst.msk [vmem:[%s1738_s23 + $0x2c] sm:$0xf] %vm999_vm1, %v1440_v22  ;;  %v853_v31 = vadd.f32 %v1728_v32, %v814_v27  ;;  %1009 = vst.msk [vmem:[%s1738_s23 + $0x24] sm:$0xf] %vm999_vm1, %v1438_v24  ;;  %v1153_v35 = vsel %vm663_vm0, %v1113_v26, 0.0  ;;  %v859_v8 = vadd.f32 %v1728_v32, %v820_v58  ;;  %v1877_v11 = vadd.f32 %v1728_v32, %v823_v63  ;;  %v824_v22 = vld [vmem:[#allocation2 + $0xc0] sm:$0xff] }
 0x11c   : > { %v812_v33 = vld [vmem:[#allocation2 + $0x60] sm:$0xff]  ;;  %v1053_v41 = vadd.f32 %v1052_v28, %v1051_v30  ;;  %v1154_v42 = vadd.f32 %v1153_v35, %v1152_v29  ;;  %v1157_v54 = vsel %vm663_vm0, %v1115_v34, 0.0  ;;  %v1880_v12 = vadd.f32 %v1728_v32, %v821_v0  ;;  %v825_v34 = vld [vmem:[#allocation2 + $0xc8] sm:$0xff] }
 0x11d   : > { %v851_v36 = vadd.f32 %v1728_v32, %v812_v33  ;;  %v815_v37 = vld [vmem:[#allocation2 + $0x78] sm:$0xff]  ;;  %v1443_v43 = vpack.c.bf16 %v853_v31, %v853_v31  ;;  %v1118_v1 = vmul.f32 %v853_v31, %v853_v31  ;;  %v1060_v5 = vsel %vm663_vm0, %v853_v31, 0.0 }
 0x11e   : > { %v813_v44 = vld [vmem:[#allocation2 + $0x68] sm:$0xff]  ;;  %v1156_v49 = vadd.f32 %v1155_v39, %v1154_v42  ;;  %v1055_v51 = vadd.f32 %v1054_v45, %v1053_v41  ;;  %v854_v52 = vadd.f32 %v1728_v32, %v815_v37  ;;  %v1449_v15 = vpack.c.bf16 %v859_v8, %v859_v8  ;;  %v827_v33 = vld [vmem:[#allocation2 + $0xd8] sm:$0xff]  ;;  %v830_v41 = vld [vmem:[#allocation2 + $0xf0] sm:$0xff] }
 0x11f   : > { %v1441_v46 = vpack.c.bf16 %v851_v36, %v851_v36  ;;  %v1056_v47 = vsel %vm663_vm0, %v851_v36, 0.0  ;;  %v1116_v48 = vmul.f32 %v851_v36, %v851_v36  ;;  %1014 = vst.msk [vmem:[%s1738_s23 + $0x38] sm:$0xf] %vm999_vm1, %v1443_v43  ;;  %v852_v53 = vadd.f32 %v1728_v32, %v813_v44  ;;  %v828_v42 = vld [vmem:[#allocation2 + $0xe0] sm:$0xff] }
 0x120   : > { %v1057_v59 = vadd.f32 %v1056_v47, %v1055_v51  ;;  %v1158_v60 = vadd.f32 %v1157_v54, %v1156_v49  ;;  %v1444_v61 = vpack.c.bf16 %v854_v52, %v854_v52  ;;  %v1119_v9 = vmul.f32 %v854_v52, %v854_v52  ;;  %1020 = vst.msk [vmem:[%s1738_s23 + $0x50] sm:$0xf] %vm999_vm1, %v1449_v15 }
 0x121   : > { %1012 = vst.msk [vmem:[%s1738_s23 + $0x30] sm:$0xf] %vm999_vm1, %v1441_v46  ;;  %v1159_v56 = vsel %vm663_vm0, %v1116_v48, 0.0  ;;  %v1442_v2 = vpack.c.bf16 %v852_v53, %v852_v53  ;;  %v1058_v3 = vsel %vm663_vm0, %v852_v53, 0.0  ;;  %v1117_v4 = vmul.f32 %v852_v53, %v852_v53 }
 0x122   : > { %v1160_v6 = vadd.f32 %v1159_v56, %v1158_v60  ;;  %1015 = vst.msk [vmem:[%s1738_s23 + $0x3c] sm:$0xf] %vm999_vm1, %v1444_v61  ;;  %v1059_v7 = vadd.f32 %v1058_v3, %v1057_v59  ;;  %v1163_v17 = vsel %vm663_vm0, %v1118_v1, 0.0  ;;  %v1062_v18 = vsel %vm663_vm0, %v854_v52, 0.0 }
 0x123   : > { %1013 = vst.msk [vmem:[%s1738_s23 + $0x34] sm:$0xf] %vm999_vm1, %v1442_v2  ;;  %v1161_v10 = vsel %vm663_vm0, %v1117_v4, 0.0  ;;  %v1064_v20 = vsel %vm663_vm0, %v1752_v55, 0.0  ;;  %v1452_v21 = vpack.c.bf16 %v1877_v11, %v1877_v11  ;;  %v1450_v25 = vpack.c.bf16 %v1880_v12, %v1880_v12  ;;  %v829_v2 = vld [vmem:[#allocation2 + $0xe8] sm:$0xff] }
 0x124   : > { %v1061_v13 = vadd.f32 %v1060_v5, %v1059_v7  ;;  %v1162_v14 = vadd.f32 %v1161_v10, %v1160_v6  ;;  %v1165_v26 = vsel %vm663_vm0, %v1119_v9, 0.0  ;;  %v1167_v27 = vsel %vm663_vm0, %v1120_v62, 0.0  ;;  %v831_v62 = vld [vmem:[#allocation2 + $0xf8] sm:$0xff] }
 0x125   : > { %v1121_v28 = vmul.f32 %v1803_v40, %v1803_v40  ;;  %1023 = vst.msk [vmem:[%s1738_s23 + $0x5c] sm:$0xf] %vm999_vm1, %v1452_v21  ;;  %v1899_v55 = vadd.f32 %v1728_v32, %v826_v16  ;;  %1021 = vst.msk [vmem:[%s1738_s23 + $0x54] sm:$0xf] %vm999_vm1, %v1450_v25  ;;  %v863_v31 = vadd.f32 %v1728_v32, %v824_v22  ;;  %v1068_v35 = vsel %vm663_vm0, %v1746_v50, 0.0 }
 0x126   : > { %v1164_v23 = vadd.f32 %v1163_v17, %v1162_v14  ;;  %v1063_v24 = vadd.f32 %v1062_v18, %v1061_v13  ;;  %v1122_v36 = vmul.f32 %v1746_v50, %v1746_v50  ;;  %v1066_v37 = vsel %vm663_vm0, %v1803_v40, 0.0 }
 0x127   : > { %v1455_v39 = vpack.c.bf16 %v1899_v55, %v1899_v55  ;;  %v1123_v44 = vmul.f32 %v1783_v19, %v1783_v19  ;;  %v1453_v46 = vpack.c.bf16 %v863_v31, %v863_v31  ;;  %v1169_v47 = vsel %vm663_vm0, %v1121_v28, 0.0 }
 0x128   : > { %v1065_v29 = vadd.f32 %v1064_v20, %v1063_v24  ;;  %v1166_v30 = vadd.f32 %v1165_v26, %v1164_v23  ;;  %v1124_v48 = vmul.f32 %v859_v8, %v859_v8  ;;  %v1918_v50 = vadd.f32 %v1728_v32, %v827_v33 }
 0x129   : > { %1026 = vst.msk [vmem:[%s1738_s23 + $0x68] sm:$0xf] %vm999_vm1, %v1455_v39  ;;  %v864_v40 = vadd.f32 %v1728_v32, %v825_v34  ;;  %1024 = vst.msk [vmem:[%s1738_s23 + $0x60] sm:$0xf] %vm999_vm1, %v1453_v46  ;;  %v1924_v52 = vadd.f32 %v1728_v32, %v830_v41  ;;  %v867_v53 = vadd.f32 %v1728_v32, %v828_v42  ;;  %v1171_v54 = vsel %vm663_vm0, %v1122_v36, 0.0 }
 0x12a   : > { %v1168_v43 = vadd.f32 %v1167_v27, %v1166_v30  ;;  %v1067_v45 = vadd.f32 %v1066_v37, %v1065_v29  ;;  %v1070_v56 = vsel %vm663_vm0, %v1783_v19, 0.0  ;;  %v1072_v57 = vsel %vm663_vm0, %v859_v8, 0.0 }
 0x12b   : > { %v1456_v58 = vpack.c.bf16 %v1918_v50, %v1918_v50  ;;  %v1454_v61 = vpack.c.bf16 %v864_v40, %v864_v40  ;;  %v1173_v63 = vsel %vm663_vm0, %v1123_v44, 0.0  ;;  %v1175_v0 = vsel %vm663_vm0, %v1124_v48, 0.0 }
 0x12c   : > { %v1069_v49 = vadd.f32 %v1068_v35, %v1067_v45  ;;  %v1170_v51 = vadd.f32 %v1169_v47, %v1168_v43  ;;  %v1125_v1 = vmul.f32 %v1880_v12, %v1880_v12  ;;  %v1459_v19 = vpack.c.bf16 %v1924_v52, %v1924_v52 }
 0x12d   : > { %1027 = vst.msk [vmem:[%s1738_s23 + $0x6c] sm:$0xf] %vm999_vm1, %v1456_v58  ;;  %1025 = vst.msk [vmem:[%s1738_s23 + $0x64] sm:$0xf] %vm999_vm1, %v1454_v61  ;;  %v1457_v5 = vpack.c.bf16 %v867_v53, %v867_v53  ;;  %v1126_v6 = vmul.f32 %v1849_v38, %v1849_v38  ;;  %v1074_v7 = vsel %vm663_vm0, %v1880_v12, 0.0  ;;  %v870_v8 = vadd.f32 %v1728_v32, %v831_v62 }
 0x12e   : > { %v1172_v59 = vadd.f32 %v1171_v54, %v1170_v51  ;;  %v1071_v60 = vadd.f32 %v1070_v56, %v1069_v49  ;;  %1030 = vst.msk [vmem:[%s1738_s23 + $0x78] sm:$0xf] %vm999_vm1, %v1459_v19  ;;  %v1076_v9 = vsel %vm663_vm0, %v1849_v38, 0.0  ;;  %v868_v14 = vadd.f32 %v1728_v32, %v829_v2 }
 0x12f   : > { %1028 = vst.msk [vmem:[%s1738_s23 + $0x70] sm:$0xf] %vm999_vm1, %v1457_v5  ;;  %v1127_v15 = vmul.f32 %v1877_v11, %v1877_v11  ;;  %v1177_v12 = vsel %vm663_vm0, %v1125_v1, 0.0  ;;  %v1128_v16 = vmul.f32 %v863_v31, %v863_v31  ;;  %v1460_v17 = vpack.c.bf16 %v870_v8, %v870_v8 }
 0x130   : > { %v1073_v3 = vadd.f32 %v1072_v57, %v1071_v60  ;;  %v1174_v4 = vadd.f32 %v1173_v63, %v1172_v59  ;;  %v1458_v21 = vpack.c.bf16 %v868_v14, %v868_v14  ;;  %v1179_v22 = vsel %vm663_vm0, %v1126_v6, 0.0 }
 0x131   : > { %v1078_v38 = vsel %vm663_vm0, %v1877_v11, 0.0  ;;  %v1080_v23 = vsel %vm663_vm0, %v863_v31, 0.0  ;;  %1031 = vst.msk [vmem:[%s1738_s23 + $0x7c] sm:$0xf] %vm999_vm1, %v1460_v17  ;;  %v1181_v25 = vsel %vm663_vm0, %v1127_v15, 0.0  ;;  %v1183_v26 = vsel %vm663_vm0, %v1128_v16, 0.0 }
 0x132   : > { %v1176_v10 = vadd.f32 %v1175_v0, %v1174_v4  ;;  %v1075_v13 = vadd.f32 %v1074_v7, %v1073_v3  ;;  %1029 = vst.msk [vmem:[%s1738_s23 + $0x74] sm:$0xf] %vm999_vm1, %v1458_v21  ;;  %v1129_v27 = vmul.f32 %v864_v40, %v864_v40  ;;  %v1130_v30 = vmul.f32 %v1899_v55, %v1899_v55 }
 0x133   : > { %v1082_v11 = vsel %vm663_vm0, %v864_v40, 0.0  ;;  %v1084_v34 = vsel %vm663_vm0, %v1899_v55, 0.0  ;;  %v1131_v35 = vmul.f32 %v1918_v50, %v1918_v50  ;;  %v1132_v37 = vmul.f32 %v867_v53, %v867_v53 }
 0x134   : > { %v1077_v18 = vadd.f32 %v1076_v9, %v1075_v13  ;;  %v1178_v20 = vadd.f32 %v1177_v12, %v1176_v10  ;;  %v1185_v36 = vsel %vm663_vm0, %v1129_v27, 0.0  ;;  %v1187_v42 = vsel %vm663_vm0, %v1130_v30, 0.0 }
 0x135   : > { %v1086_v43 = vsel %vm663_vm0, %v1918_v50, 0.0  ;;  %v1088_v44 = vsel %vm663_vm0, %v867_v53, 0.0  ;;  %v1189_v47 = vsel %vm663_vm0, %v1131_v35, 0.0  ;;  %v1191_v55 = vsel %vm663_vm0, %v1132_v37, 0.0 }
 0x136   : > { %v1180_v32 = vadd.f32 %v1179_v22, %v1178_v20  ;;  %v1079_v24 = vadd.f32 %v1078_v38, %v1077_v18  ;;  %v1133_v48 = vmul.f32 %v868_v14, %v868_v14  ;;  %v1134_v51 = vmul.f32 %v1924_v52, %v1924_v52 }
 0x137   : > { %v1090_v54 = vsel %vm663_vm0, %v868_v14, 0.0  ;;  %v1092_v53 = vsel %vm663_vm0, %v1924_v52, 0.0  ;;  %v1135_v57 = vmul.f32 %v870_v8, %v870_v8  ;;  %v1094_v62 = vsel %vm663_vm0, %v870_v8, 0.0 }
 0x138   : > { %v1081_v28 = vadd.f32 %v1080_v23, %v1079_v24  ;;  %v1182_v29 = vadd.f32 %v1181_v25, %v1180_v32  ;;  %v1193_v58 = vsel %vm663_vm0, %v1133_v48, 0.0  ;;  %v1195_v61 = vsel %vm663_vm0, %v1134_v51, 0.0 }
 0x139   : > { %v1197_v1 = vsel %vm663_vm0, %v1135_v57, 0.0 }
 0x13a   : > { %v1184_v33 = vadd.f32 %v1183_v26, %v1182_v29  ;;  %v1083_v31 = vadd.f32 %v1082_v11, %v1081_v28 }
 0x13c   : > { %v1085_v39 = vadd.f32 %v1084_v34, %v1083_v31  ;;  %v1186_v41 = vadd.f32 %v1185_v36, %v1184_v33 }
 0x13e   : > { %v1188_v45 = vadd.f32 %v1187_v42, %v1186_v41  ;;  %v1087_v46 = vadd.f32 %v1086_v43, %v1085_v39 }
 0x140   : > { %v1089_v40 = vadd.f32 %v1088_v44, %v1087_v46  ;;  %v1190_v49 = vadd.f32 %v1189_v47, %v1188_v45 }
 0x142   : > { %v1192_v56 = vadd.f32 %v1191_v55, %v1190_v49  ;;  %v1091_v50 = vadd.f32 %v1090_v54, %v1089_v40 }
 0x144   : > { %v1093_v59 = vadd.f32 %v1092_v53, %v1091_v50  ;;  %v1194_v60 = vadd.f32 %v1193_v58, %v1192_v56 }
 0x146   : > { %v1095_v63 = vadd.f32 %v1094_v62, %v1093_v59  ;;  %v1196_v0 = vadd.f32 %v1195_v61, %v1194_v60 }
 0x148   : > { %v1096_v19 = vrot.slane %v1095_v63, 4  ;;  %v1198_v2 = vadd.f32 %v1197_v1, %v1196_v0 }
 0x14a   : > { %v1097_v3 = vadd.f32 %v1096_v19, %v1095_v63  ;;  %v1199_v4 = vrot.slane %v1198_v2, 4 }
 0x14c   : > { %v1098_v52 = vrot.slane %v1097_v3, 2  ;;  %v1200_v5 = vadd.f32 %v1199_v4, %v1198_v2 }
 0x14e   : > { %v1099_v6 = vadd.f32 %v1098_v52, %v1097_v3  ;;  %v1201_v7 = vrot.slane %v1200_v5, 2 }
 0x150   : > { %v1100_v9 = vrot.slane %v1099_v6, 1  ;;  %v1202_v10 = vadd.f32 %v1201_v7, %v1200_v5 }
 0x152   : > { %v1101_v8 = vadd.f32 %v1100_v9, %v1099_v6  ;;  %v1203_v13 = vrot.slane %v1202_v10, 1 }
 0x154   : > { %1103 = vst.msk [vmem:[%s304_s26] sm:$0x1] %vm1102_vm2, %v1101_v8  ;;  %v1204_v14 = vadd.f32 %v1203_v13, %v1202_v10 }
 0x156   : > { %1205 = vst.msk [vmem:[%s304_s26 + $0x1] sm:$0x1] %vm1102_vm2, %v1204_v14 }
 0x157 PF: > { %s15_s17 = sadd.s32 1, %s1619_s17   ;;  %s2010_s15 = smov %s1615_s16 }
 0x158   : > { %p12_p6 = scmp.ge.s32.totalorder %s15_s17, 4   ;;  %s2011_s16 = smov %s2013_s18 }
 0x15a   :  { %14 = sbr.rel (!%p12_p6) target bundleno = 2 (0x2), region = 92 }

// kernel: discriminator_forward.6
= control target key start
LH: loop header
LB: loop body
LE: loop exit
PB: predicated region body
PF: predicated region fallthrough
CT: control target
= control target key end

     0   :  { %s1087_s15 = smov 0   ;;  %s1089_s16 = smov 0   ;;  %s1245_s0 = inlined_call_operand.vmem [shape: bf16[128,256], index: 0, kind: input, shape index: {}]   ;;  %s1246_s1 = inlined_call_operand.vmem [shape: bf16[256,32], index: 1, kind: input, shape index: {}]   ;;  %s1247_s2 = inlined_call_operand.vmem [shape: f32[1,32], index: 2, kind: input, shape index: {}]   ;;  %s1248_s3 = inlined_call_operand.vmem [shape: bf16[128,32], index: 3, kind: output, shape index: {0}]   ;;  %s1249_s4 = inlined_call_operand.vmem [shape: f32[2,2,32], index: 4, kind: output, shape index: {1}]  }
   0x1   :  { %s1091_s17 = smov 0  }
   0x2 LB: > { %s34_s18 = sadd.s32 1, %s1056_s16  ;;  %p879_p0 = scmp.ge.s32.totalorder %s1060_s17, 1  ;;  %s1060_s17 = sphi %s1091_s17, %s15_s17   ;;  %s1056_s16 = sphi %s1089_s16, %s1251_s16   ;;  %s1052_s15 = sphi %s1087_s15, %s1250_s15  }
   0x3   : > { %p36_p1 = scmp.ge.s32.totalorder %s34_s18, 2  ;;  %p221_p2 = scmp.lt.s32.totalorder %s1060_s17, 3 }
   0x5   : > { %s1253_s18 = smov (%p36_p1, %s34_s18), 0  ;;  %p222_p3 = pnand %p879_p0, %p221_p2 }
   0x6   : > { %v1010_v0 = vld [vmem:[%s1246_s1 + $0x40] sm:$0xff] (!%p222_p3)   ;;  %s880_s21 = sshll.u32 (!%p222_p3), %s1052_s15, 3  ;;  %v1012_v2 = vld [vmem:[%s1246_s1 + $0x48] sm:$0xff] (!%p222_p3)   ;;  %v1014_v4 = vld [vmem:[%s1246_s1 + $0x50] sm:$0xff] (!%p222_p3)   ;;  %vm559_vm0 = vcmask (!%p222_p3), 261120   ;;  %vm655_vm1 = vcmask (!%p222_p3), 257024  }
   0x7   : > { %225 = sbr.rel (%p222_p3) target bundleno = 300 (0x12c), region = 32  ;;  %v1011_v1 = vld [vmem:[%s1246_s1] sm:$0xff] (!%p222_p3)   ;;  %930 = vmatprep.subr.bf16.mxu0 (!%p222_p3), %v1010_v0  ;;  %970 = vmatprep.subr.bf16.mxu1 (!%p222_p3), %v1010_v0  ;;  %v1013_v3 = vld [vmem:[%s1246_s1 + $0x8] sm:$0xff] (!%p222_p3)   ;;  %p275_p4 = scmp.lt.s32.totalorder (!%p222_p3), %s880_s21, 15  ;;  %v1015_v5 = vld [vmem:[%s1246_s1 + $0x10] sm:$0xff] (!%p222_p3)   ;;  %vm686_vm2 = vcmask (!%p222_p3), 253952  }
   0x8   : > { %931 = vmatpush3.bf16.msra.mxu0 (!%p222_p3), %v1011_v1  ;;  %978 = vmatpush3.bf16.msra.mxu1 (!%p222_p3), %v1011_v1  ;;  %v1016_v6 = vld [vmem:[%s1246_s1 + $0x58] sm:$0xff] (!%p222_p3)   ;;  %v1018_v8 = vld [vmem:[%s1246_s1 + $0x60] sm:$0xff] (!%p222_p3)   ;;  %v1020_v10 = vld [vmem:[%s1246_s1 + $0x68] sm:$0xff] (!%p222_p3)   ;;  %p306_p5 = scmp.lt.s32.totalorder (!%p222_p3), %s1052_s15, 1 }
   0x9   : > { %932 = vmatprep.subr.bf16.mxu0 (!%p222_p3), %v1012_v2  ;;  %971 = vmatprep.subr.bf16.mxu1 (!%p222_p3), %v1012_v2  ;;  %v1017_v7 = vld [vmem:[%s1246_s1 + $0x18] sm:$0xff] (!%p222_p3)   ;;  %v1019_v9 = vld [vmem:[%s1246_s1 + $0x20] sm:$0xff] (!%p222_p3)   ;;  %v1021_v13 = vld [vmem:[%s1246_s1 + $0x28] sm:$0xff] (!%p222_p3)  }
   0xa   : > { %v1022_v14 = vld [vmem:[%s1246_s1 + $0x70] sm:$0xff] (!%p222_p3)   ;;  %v1024_v16 = vld [vmem:[%s1246_s1 + $0x78] sm:$0xff] (!%p222_p3)   ;;  %v1179_v38 = vld [vmem:[%s1247_s2] ss:$0 sm:$0xff] (!%p222_p3) }
   0xb   : > { %v1023_v15 = vld [vmem:[%s1246_s1 + $0x30] sm:$0xff] (!%p222_p3)   ;;  %v1025_v17 = vld [vmem:[%s1246_s1 + $0x38] sm:$0xff] (!%p222_p3)  }
   0xc   : > { %933 = vmatpush3.bf16.msra.mxu0 (!%p222_p3), %v1013_v3  ;;  %979 = vmatpush3.bf16.msra.mxu1 (!%p222_p3), %v1013_v3 }
   0xd   : > { %934 = vmatprep.subr.bf16.mxu0 (!%p222_p3), %v1014_v4  ;;  %972 = vmatprep.subr.bf16.mxu1 (!%p222_p3), %v1014_v4 }
   0xe   : > { %s1255_s21 = smov (!%p275_p4, %s880_s21), 15  ;;  %s1257_s15 = smov (!%p306_p5, %s1052_s15), 1 }
   0xf   : > { %s921_s10 = sshll.u32 %s1255_s21, 3  ;;  %s884_s11 = sshll.u32 %s1255_s21, 2 }
  0x10   : > { %935 = vmatpush3.bf16.msra.mxu0 %v1015_v5  ;;  %980 = vmatpush3.bf16.msra.mxu1 %v1015_v5  ;;  %s1141_s19 = scalar_lea.vmem %s1245_s0, %s921_s10  ;;  %s1189_s13 = scalar_lea.vmem %s1248_s3, %s884_s11 }
  0x11   : > { %936 = vmatprep.subr.bf16.mxu0 %v1016_v6  ;;  %973 = vmatprep.subr.bf16.mxu1 %v1016_v6  ;;  %v1028_v11 = vld [vmem:[%s1141_s19 + $0x4] ss:$8 sps:$4 sm:$0xff]   ;;  %v1026_v18 = vld [vmem:[%s1141_s19] ss:$8 sps:$4 sm:$0xff]   ;;  %v1032_v20 = vld [vmem:[%s1141_s19 + $0x14] ss:$8 sps:$4 sm:$0xff]  }
  0x12   : > { %v1031_v12 = vld [vmem:[%s1141_s19 + $0x24] ss:$8 sps:$4 sm:$0xff]   ;;  %522 = vmatprep.mubr.bf16.mxu0 %v1028_v11  ;;  %v1029_v19 = vld [vmem:[%s1141_s19 + $0x20] ss:$8 sps:$4 sm:$0xff]   ;;  %v1035_v21 = vld [vmem:[%s1141_s19 + $0x34] ss:$8 sps:$4 sm:$0xff]  }
  0x13   : > { %538 = vmatprep.mubr.bf16.mxu1 %v1031_v12  ;;  %v1034_v22 = vld [vmem:[%s1141_s19 + $0x10] ss:$8 sps:$4 sm:$0xff]   ;;  %s885_s14 = sshll.u32 %s1257_s15, 1 }
  0x14   : > { %937 = vmatpush3.bf16.msra.mxu0 %v1017_v7  ;;  %981 = vmatpush3.bf16.msra.mxu1 %v1017_v7  ;;  %v1037_v23 = vld [vmem:[%s1141_s19 + $0x30] ss:$8 sps:$4 sm:$0xff]   ;;  %s312_s22 = scalar_lea.vmem %s1249_s4, %s885_s14 }
  0x15   : > { %938 = vmatprep.subr.bf16.mxu0 %v1018_v8  ;;  %974 = vmatprep.subr.bf16.mxu1 %v1018_v8 }
  0x18   : > { %939 = vmatpush3.bf16.msra.mxu0 %v1019_v9  ;;  %982 = vmatpush3.bf16.msra.mxu1 %v1019_v9 }
  0x19   : > { %940 = vmatprep.subr.bf16.mxu0 %v1020_v10  ;;  %975 = vmatprep.subr.bf16.mxu1 %v1020_v10 }
  0x1c   : > { %941 = vmatpush3.bf16.msra.mxu0 %v1021_v13  ;;  %983 = vmatpush3.bf16.msra.mxu1 %v1021_v13 }
  0x1d   : > { %942 = vmatprep.subr.bf16.mxu0 %v1022_v14  ;;  %976 = vmatprep.subr.bf16.mxu1 %v1022_v14 }
  0x20   : > { %943 = vmatpush3.bf16.msra.mxu0 %v1023_v15  ;;  %984 = vmatpush3.bf16.msra.mxu1 %v1023_v15 }
  0x21   : > { %944 = vmatprep.subr.bf16.mxu0 %v1024_v16  ;;  %977 = vmatprep.subr.bf16.mxu1 %v1024_v16 }
  0x24   : > { %945 = vmatpush3.bf16.msra.mxu0 %v1025_v17  ;;  %985 = vmatpush3.bf16.msra.mxu1 %v1025_v17 }
  0x27   : > { %523 = vmatmul.mubr.bf16.vlgmr.msra.gmra.mrb[0].mxu0 %v1026_v18  ;;  %539 = vmatmul.mubr.bf16.vlgmr.msra.gmra.mrb[0].mxu1 %v1029_v19 }
  0x28   : > { %530 = vmatprep.mubr.bf16.mxu0 %v1032_v20  ;;  %546 = vmatprep.mubr.bf16.mxu1 %v1035_v21 }
  0x2f   : > { %531 = vmatmul.mubr.bf16.gmra.mrb[4].mxu0 %v1034_v22  ;;  %547 = vmatmul.mubr.bf16.gmra.mrb[4].mxu1 %v1037_v23 }
  0xfa   : > { %v946_v24 = vpop.f32.mrb[0].mxu0  ;;  %v958_v25 = vpop.f32.mrb[0].mxu1 }
  0xfb   : > { %v947_v26 = vpop.f32.mrb[1].mxu0  ;;  %v959_v27 = vpop.f32.mrb[1].mxu1 }
  0xfc   : > { %v948_v28 = vadd.f32 %v947_v26, %v946_v24  ;;  %v949_v29 = vpop.f32.mrb[2].mxu0  ;;  %v960_v30 = vadd.f32 %v959_v27, %v958_v25  ;;  %v961_v31 = vpop.f32.mrb[2].mxu1 }
  0xfd   : > { %v950_v32 = vpop.f32.mrb[3].mxu0  ;;  %v962_v33 = vpop.f32.mrb[3].mxu1 }
  0xfe   : > { %560 = vst.msk [vmem:[#allocation2] sm:$0xff] %vm559_vm0, %v948_v28  ;;  %v951_v34 = vadd.f32 %v950_v32, %v949_v29  ;;  %564 = vst.msk [vmem:[#allocation2 + $0x20] sm:$0xff] %vm559_vm0, %v960_v30  ;;  %v963_v35 = vadd.f32 %v962_v33, %v961_v31 }
 0x100   : > { %561 = vst.msk [vmem:[#allocation2 + $0x8] sm:$0xff] %vm559_vm0, %v951_v34  ;;  %565 = vst.msk [vmem:[#allocation2 + $0x28] sm:$0xff] %vm559_vm0, %v963_v35 }
 0x102   : > { %v952_v36 = vpop.f32.mrb[4].mxu0  ;;  %v964_v37 = vpop.f32.mrb[4].mxu1 }
 0x103   : > { %v953_v39 = vpop.f32.mrb[5].mxu0  ;;  %v965_v40 = vpop.f32.mrb[5].mxu1 }
 0x104   : > { %v954_v41 = vadd.f32 %v953_v39, %v952_v36  ;;  %v955_v42 = vpop.f32.mrb[6].mxu0  ;;  %v966_v43 = vadd.f32 %v965_v40, %v964_v37  ;;  %v967_v44 = vpop.f32.mrb[6].mxu1 }
 0x105   : > { %v600_v45 = vld [vmem:[#allocation2] sm:$0xff]  ;;  %v956_v47 = vpop.f32.mrb[7].mxu0  ;;  %v968_v48 = vpop.f32.mrb[7].mxu1 }
 0x106   : > { %v604_v46 = vld [vmem:[#allocation2 + $0x20] sm:$0xff]  ;;  %v615_v49 = vadd.f32 %v1179_v38, %v600_v45  ;;  %562 = vst.msk [vmem:[#allocation2 + $0x10] sm:$0xff] %vm559_vm0, %v954_v41  ;;  %v957_v51 = vadd.f32 %v956_v47, %v955_v42  ;;  %566 = vst.msk [vmem:[#allocation2 + $0x30] sm:$0xff] %vm559_vm0, %v966_v43  ;;  %v969_v52 = vadd.f32 %v968_v48, %v967_v44 }
 0x107   : > { %v619_v50 = vadd.f32 %v1179_v38, %v604_v46  ;;  %v601_v53 = vld [vmem:[#allocation2 + $0x8] sm:$0xff] }
 0x108   : > { %v605_v54 = vld [vmem:[#allocation2 + $0x28] sm:$0xff]  ;;  %v922_v55 = vpack.c.bf16 %v615_v49, %v615_v49  ;;  %v616_v56 = vadd.f32 %v1179_v38, %v601_v53  ;;  %563 = vst.msk [vmem:[#allocation2 + $0x18] sm:$0xff] %vm559_vm0, %v957_v51  ;;  %567 = vst.msk [vmem:[#allocation2 + $0x38] sm:$0xff] %vm559_vm0, %v969_v52  ;;  %v688_v61 = vmul.f32 %v615_v49, %v615_v49  ;;  %v665_v2 = vsel %vm559_vm0, %v615_v49, 0.0 }
 0x109   : > { %v926_v57 = vpack.c.bf16 %v619_v50, %v619_v50  ;;  %v620_v58 = vadd.f32 %v1179_v38, %v605_v54  ;;  %v692_v15 = vmul.f32 %v619_v50, %v619_v50  ;;  %v672_v25 = vsel %vm559_vm0, %v619_v50, 0.0 }
 0x10a   : > { %656 = vst.msk [vmem:[%s1189_s13] sm:$0xf] %vm655_vm1, %v922_v55  ;;  %v923_v59 = vpack.c.bf16 %v616_v56, %v616_v56  ;;  %v689_v60 = vmul.f32 %v616_v56, %v616_v56  ;;  %v666_v63 = vsel %vm559_vm0, %v616_v56, 0.0  ;;  %v696_v6 = vsel %vm559_vm0, %v688_v61, 0.0 }
 0x10b   : > { %660 = vst.msk [vmem:[%s1189_s13 + $0x10] sm:$0xf] %vm655_vm1, %v926_v57  ;;  %v927_v62 = vpack.c.bf16 %v620_v58, %v620_v58  ;;  %v667_v7 = vadd.f32 %v666_v63, %v665_v2  ;;  %v693_v26 = vmul.f32 %v620_v58, %v620_v58  ;;  %v703_v32 = vsel %vm559_vm0, %v692_v15, 0.0 }
 0x10c   : > { %657 = vst.msk [vmem:[%s1189_s13 + $0x4] sm:$0xf] %vm655_vm1, %v923_v59  ;;  %v697_v3 = vsel %vm559_vm0, %v689_v60, 0.0  ;;  %v674_v33 = vsel %vm559_vm0, %v620_v58, 0.0 }
 0x10d   : > { %661 = vst.msk [vmem:[%s1189_s13 + $0x14] sm:$0xf] %vm655_vm1, %v927_v62  ;;  %v602_v0 = vld [vmem:[#allocation2 + $0x10] sm:$0xff]  ;;  %v698_v14 = vadd.f32 %v697_v3, %v696_v6  ;;  %v705_v37 = vsel %vm559_vm0, %v693_v26, 0.0 }
 0x10e   : > { %v606_v1 = vld [vmem:[#allocation2 + $0x30] sm:$0xff]  ;;  %v617_v4 = vadd.f32 %v1179_v38, %v602_v0 }
 0x10f   : > { %v621_v5 = vadd.f32 %v1179_v38, %v606_v1  ;;  %v603_v8 = vld [vmem:[#allocation2 + $0x18] sm:$0xff] }
 0x110   : > { %v924_v9 = vpack.c.bf16 %v617_v4, %v617_v4  ;;  %v668_v10 = vsel %vm559_vm0, %v617_v4, 0.0  ;;  %v690_v11 = vmul.f32 %v617_v4, %v617_v4  ;;  %v618_v12 = vadd.f32 %v1179_v38, %v603_v8  ;;  %v607_v13 = vld [vmem:[#allocation2 + $0x38] sm:$0xff] }
 0x111   : > { %v669_v16 = vadd.f32 %v668_v10, %v667_v7  ;;  %v928_v17 = vpack.c.bf16 %v621_v5, %v621_v5  ;;  %v622_v24 = vadd.f32 %v1179_v38, %v607_v13  ;;  %v694_v28 = vmul.f32 %v621_v5, %v621_v5 }
 0x112   : > { %658 = vst.msk [vmem:[%s1189_s13 + $0x8] sm:$0xf] %vm655_vm1, %v924_v9  ;;  %v699_v18 = vsel %vm559_vm0, %v690_v11, 0.0  ;;  %v925_v19 = vpack.c.bf16 %v618_v12, %v618_v12  ;;  %v670_v20 = vsel %vm559_vm0, %v618_v12, 0.0  ;;  %v691_v21 = vmul.f32 %v618_v12, %v618_v12 }
 0x113   : > { %v700_v22 = vadd.f32 %v699_v18, %v698_v14  ;;  %v671_v23 = vadd.f32 %v670_v20, %v669_v16  ;;  %662 = vst.msk [vmem:[%s1189_s13 + $0x18] sm:$0xf] %vm655_vm1, %v928_v17  ;;  %v929_v31 = vpack.c.bf16 %v622_v24, %v622_v24  ;;  %v676_v34 = vsel %vm559_vm0, %v621_v5, 0.0 }
 0x114   : > { %659 = vst.msk [vmem:[%s1189_s13 + $0xc] sm:$0xf] %vm655_vm1, %v925_v19  ;;  %v701_v27 = vsel %vm559_vm0, %v691_v21, 0.0  ;;  %v707_v38 = vsel %vm559_vm0, %v694_v28, 0.0  ;;  %v695_v39 = vmul.f32 %v622_v24, %v622_v24  ;;  %v678_v42 = vsel %vm559_vm0, %v622_v24, 0.0 }
 0x115   : > { %v673_v29 = vadd.f32 %v672_v25, %v671_v23  ;;  %v702_v30 = vadd.f32 %v701_v27, %v700_v22  ;;  %663 = vst.msk [vmem:[%s1189_s13 + $0x1c] sm:$0xf] %vm655_vm1, %v929_v31 }
 0x116   : > { %v709_v45 = vsel %vm559_vm0, %v695_v39, 0.0 }
 0x117   : > { %v704_v35 = vadd.f32 %v703_v32, %v702_v30  ;;  %v675_v36 = vadd.f32 %v674_v33, %v673_v29 }
 0x119   : > { %v677_v40 = vadd.f32 %v676_v34, %v675_v36  ;;  %v706_v41 = vadd.f32 %v705_v37, %v704_v35 }
 0x11b   : > { %v708_v43 = vadd.f32 %v707_v38, %v706_v41  ;;  %v679_v44 = vadd.f32 %v678_v42, %v677_v40 }
 0x11d   : > { %v680_v46 = vrot.slane %v679_v44, 4  ;;  %v710_v47 = vadd.f32 %v709_v45, %v708_v43 }
 0x11f   : > { %v681_v48 = vadd.f32 %v680_v46, %v679_v44  ;;  %v711_v49 = vrot.slane %v710_v47, 4 }
 0x121   : > { %v682_v50 = vrot.slane %v681_v48, 2  ;;  %v712_v51 = vadd.f32 %v711_v49, %v710_v47 }
 0x123   : > { %v683_v52 = vadd.f32 %v682_v50, %v681_v48  ;;  %v713_v53 = vrot.slane %v712_v51, 2 }
 0x125   : > { %v684_v54 = vrot.slane %v683_v52, 1  ;;  %v714_v55 = vadd.f32 %v713_v53, %v712_v51 }
 0x127   : > { %v685_v56 = vadd.f32 %v684_v54, %v683_v52  ;;  %v715_v57 = vrot.slane %v714_v55, 1 }
 0x129   : > { %687 = vst.msk [vmem:[%s312_s22] sm:$0x1] %vm686_vm2, %v685_v56  ;;  %v716_v58 = vadd.f32 %v715_v57, %v714_v55 }
 0x12b   : > { %717 = vst.msk [vmem:[%s312_s22 + $0x1] sm:$0x1] %vm686_vm2, %v716_v58 }
 0x12c PF: > { %s15_s17 = sadd.s32 1, %s1060_s17   ;;  %s1250_s15 = smov %s1056_s16 }
 0x12d   : > { %p12_p6 = scmp.ge.s32.totalorder %s15_s17, 4   ;;  %s1251_s16 = smov %s1253_s18 }
 0x12f   :  { %14 = sbr.rel (!%p12_p6) target bundleno = 2 (0x2), region = 92 }

// kernel: discriminator_forward.7
= control target key start
LH: loop header
LB: loop body
LE: loop exit
PB: predicated region body
PF: predicated region fallthrough
CT: control target
= control target key end

     0   :  { %s1110_s15 = smov 0   ;;  %s1112_s16 = smov 0   ;;  %s1260_s0 = inlined_call_operand.vmem [shape: bf16[32,512], index: 0, kind: input, shape index: {}]   ;;  %s1261_s1 = inlined_call_operand.vmem [shape: bf16[512,64], index: 1, kind: input, shape index: {}]   ;;  %s1262_s2 = inlined_call_operand.vmem [shape: f32[1,64], index: 2, kind: input, shape index: {}]   ;;  %s1263_s3 = inlined_call_operand.vmem [shape: bf16[32,64], index: 3, kind: output, shape index: {0}]   ;;  %s1264_s4 = inlined_call_operand.vmem [shape: f32[2,2,64], index: 4, kind: output, shape index: {1}]  }
   0x1   :  { %s1114_s17 = smov 0  }
   0x2 LB: > { %s34_s18 = sadd.s32 1, %s1079_s16  ;;  %p904_p0 = scmp.ge.s32.totalorder %s1083_s17, 1  ;;  %s1083_s17 = sphi %s1114_s17, %s15_s17   ;;  %s1079_s16 = sphi %s1112_s16, %s1266_s16   ;;  %s1075_s15 = sphi %s1110_s15, %s1265_s15  }
   0x3   : > { %p36_p1 = scmp.ge.s32.totalorder %s34_s18, 2  ;;  %p221_p2 = scmp.lt.s32.totalorder %s1083_s17, 3 }
   0x5   : > { %s1268_s18 = smov (%p36_p1, %s34_s18), 0  ;;  %p222_p3 = pnand %p904_p0, %p221_p2 }
   0x6   : > { %v1023_v0 = vld [vmem:[%s1261_s1 + $0x40] sm:$0xff] (!%p222_p3)   ;;  %v1027_v4 = vld [vmem:[%s1261_s1 + $0x48] sm:$0xff] (!%p222_p3)   ;;  %v1031_v8 = vld [vmem:[%s1261_s1 + $0x50] sm:$0xff] (!%p222_p3)   ;;  %s905_s29 = sshll.u32 (!%p222_p3), %s1075_s15, 1  ;;  %vm680_vm0 = vcmask (!%p222_p3), 523264   ;;  %vm716_vm1 = vcmask (!%p222_p3), 519168  }
   0x7   : > { %225 = sbr.rel (%p222_p3) target bundleno = 288 (0x120), region = 32  ;;  %v1024_v1 = vld [vmem:[%s1261_s1 + $0xc0] sm:$0xff] (!%p222_p3)   ;;  %955 = vmatprep.subr.bf16.mxu0 (!%p222_p3), %v1023_v0  ;;  %v1028_v5 = vld [vmem:[%s1261_s1 + $0xc8] sm:$0xff] (!%p222_p3)   ;;  %v1032_v9 = vld [vmem:[%s1261_s1 + $0xd0] sm:$0xff] (!%p222_p3)   ;;  %p275_p4 = scmp.lt.s32.totalorder (!%p222_p3), %s905_s29, 3  ;;  %vm729_vm2 = vcmask (!%p222_p3), 516096  }
   0x8   : > { %v1025_v2 = vld [vmem:[%s1261_s1] sm:$0xff] (!%p222_p3)   ;;  %977 = vmatprep.subr.bf16.mxu1 (!%p222_p3), %v1024_v1  ;;  %v1029_v6 = vld [vmem:[%s1261_s1 + $0x8] sm:$0xff] (!%p222_p3)   ;;  %v1033_v10 = vld [vmem:[%s1261_s1 + $0x10] sm:$0xff] (!%p222_p3)   ;;  %p306_p5 = scmp.lt.s32.totalorder (!%p222_p3), %s1075_s15, 1 }
   0x9   : > { %v1026_v3 = vld [vmem:[%s1261_s1 + $0x80] sm:$0xff] (!%p222_p3)   ;;  %956 = vmatpush3.bf16.msra.mxu0 (!%p222_p3), %v1025_v2  ;;  %v1030_v7 = vld [vmem:[%s1261_s1 + $0x88] sm:$0xff] (!%p222_p3)   ;;  %v1034_v11 = vld [vmem:[%s1261_s1 + $0x90] sm:$0xff] (!%p222_p3)  }
   0xa   : > { %978 = vmatpush3.bf16.msra.mxu1 (!%p222_p3), %v1026_v3  ;;  %957 = vmatprep.subr.bf16.mxu0 (!%p222_p3), %v1027_v4  ;;  %v1035_v12 = vld [vmem:[%s1261_s1 + $0x58] sm:$0xff] (!%p222_p3)   ;;  %v1039_v16 = vld [vmem:[%s1261_s1 + $0x60] sm:$0xff] (!%p222_p3)   ;;  %v1043_v20 = vld [vmem:[%s1261_s1 + $0x68] sm:$0xff] (!%p222_p3)  }
   0xb   : > { %979 = vmatprep.subr.bf16.mxu1 (!%p222_p3), %v1028_v5  ;;  %v1036_v13 = vld [vmem:[%s1261_s1 + $0xd8] sm:$0xff] (!%p222_p3)   ;;  %v1040_v17 = vld [vmem:[%s1261_s1 + $0xe0] sm:$0xff] (!%p222_p3)   ;;  %v1044_v21 = vld [vmem:[%s1261_s1 + $0xe8] sm:$0xff] (!%p222_p3)  }
   0xc   : > { %v1037_v14 = vld [vmem:[%s1261_s1 + $0x18] sm:$0xff] (!%p222_p3)   ;;  %v1041_v18 = vld [vmem:[%s1261_s1 + $0x20] sm:$0xff] (!%p222_p3)   ;;  %v1045_v22 = vld [vmem:[%s1261_s1 + $0x28] sm:$0xff] (!%p222_p3)  }
   0xd   : > { %958 = vmatpush3.bf16.msra.mxu0 (!%p222_p3), %v1029_v6  ;;  %v1038_v15 = vld [vmem:[%s1261_s1 + $0x98] sm:$0xff] (!%p222_p3)   ;;  %v1042_v19 = vld [vmem:[%s1261_s1 + $0xa0] sm:$0xff] (!%p222_p3)   ;;  %v1046_v23 = vld [vmem:[%s1261_s1 + $0xa8] sm:$0xff] (!%p222_p3)  }
   0xe   : > { %980 = vmatpush3.bf16.msra.mxu1 %v1030_v7  ;;  %959 = vmatprep.subr.bf16.mxu0 %v1031_v8  ;;  %s1270_s29 = smov (!%p275_p4, %s905_s29), 3  ;;  %v1047_v24 = vld [vmem:[%s1261_s1 + $0x70] sm:$0xff]   ;;  %v1051_v28 = vld [vmem:[%s1261_s1 + $0x78] sm:$0xff]   ;;  %v947_v50 = vld [vmem:[%s1262_s2] ss:$0 sm:$0xff]  ;;  %s1272_s15 = smov (!%p306_p5, %s1075_s15), 1 }
   0xf   : > { %981 = vmatprep.subr.bf16.mxu1 %v1032_v9  ;;  %v1048_v25 = vld [vmem:[%s1261_s1 + $0xf0] sm:$0xff]   ;;  %s952_s5 = sshll.u32 %s1270_s29, 4  ;;  %v1052_v29 = vld [vmem:[%s1261_s1 + $0xf8] sm:$0xff]   ;;  %s909_s25 = sshll.u32 %s1270_s29, 2 }
  0x10   : > { %v1049_v26 = vld [vmem:[%s1261_s1 + $0x30] sm:$0xff]   ;;  %s282_s14 = scalar_lea.vmem %s1260_s0, %s952_s5  ;;  %v1053_v30 = vld [vmem:[%s1261_s1 + $0x38] sm:$0xff]   ;;  %s304_s28 = scalar_lea.vmem %s1263_s3, %s909_s25 }
  0x11   : > { %960 = vmatpush3.bf16.msra.mxu0 %v1033_v10  ;;  %v1050_v27 = vld [vmem:[%s1261_s1 + $0xb0] sm:$0xff]   ;;  %v1054_v31 = vld [vmem:[%s1261_s1 + $0xb8] sm:$0xff]   ;;  %s910_s29 = sshll.u32 %s1272_s15, 1 }
  0x12   : > { %982 = vmatpush3.bf16.msra.mxu1 %v1034_v11  ;;  %961 = vmatprep.subr.bf16.mxu0 %v1035_v12  ;;  %v1055_v32 = vld [vmem:[%s282_s14] ss:$16 sps:$4 sm:$0xff]   ;;  %v1057_v33 = vld [vmem:[%s282_s14 + $0x4] ss:$16 sps:$4 sm:$0xff]   ;;  %v1058_v34 = vld [vmem:[%s282_s14 + $0x8] ss:$16 sps:$4 sm:$0xff]   ;;  %s312_s6 = scalar_lea.vmem %s1264_s4, %s910_s29 }
  0x13   : > { %983 = vmatprep.subr.bf16.mxu1 %v1036_v13  ;;  %v1060_v35 = vld [vmem:[%s282_s14 + $0xc] ss:$16 sps:$4 sm:$0xff]   ;;  %626 = vmatprep.mubr.bf16.mxu0 %v1057_v33 }
  0x14   : > { %667 = vmatprep.mubr.bf16.mxu1 %v1060_v35 }
  0x15   : > { %962 = vmatpush3.bf16.msra.mxu0 %v1037_v14 }
  0x16   : > { %984 = vmatpush3.bf16.msra.mxu1 %v1038_v15  ;;  %963 = vmatprep.subr.bf16.mxu0 %v1039_v16 }
  0x17   : > { %985 = vmatprep.subr.bf16.mxu1 %v1040_v17 }
  0x19   : > { %964 = vmatpush3.bf16.msra.mxu0 %v1041_v18 }
  0x1a   : > { %986 = vmatpush3.bf16.msra.mxu1 %v1042_v19  ;;  %965 = vmatprep.subr.bf16.mxu0 %v1043_v20 }
  0x1b   : > { %987 = vmatprep.subr.bf16.mxu1 %v1044_v21 }
  0x1d   : > { %966 = vmatpush3.bf16.msra.mxu0 %v1045_v22 }
  0x1e   : > { %988 = vmatpush3.bf16.msra.mxu1 %v1046_v23  ;;  %967 = vmatprep.subr.bf16.mxu0 %v1047_v24 }
  0x1f   : > { %989 = vmatprep.subr.bf16.mxu1 %v1048_v25 }
  0x21   : > { %968 = vmatpush3.bf16.msra.mxu0 %v1049_v26 }
  0x22   : > { %990 = vmatpush3.bf16.msra.mxu1 %v1050_v27  ;;  %969 = vmatprep.subr.bf16.mxu0 %v1051_v28 }
  0x23   : > { %991 = vmatprep.subr.bf16.mxu1 %v1052_v29 }
  0x25   : > { %970 = vmatpush3.bf16.msra.mxu0 %v1053_v30 }
  0x26   : > { %992 = vmatpush3.bf16.msra.mxu1 %v1054_v31 }
  0x28   : > { %627 = vmatmul.mubr.bf16.vlgmr.msra.gmra.mrb[0].mxu0 %v1055_v32 }
  0x29   : > { %668 = vmatmul.mubr.bf16.vlgmr.msra.gmra.mrb[0].mxu1 %v1058_v34 }
  0xfb   : > { %v971_v36 = vpop.f32.mrb[0].mxu0 }
  0xfc   : > { %v993_v37 = vpop.f32.mrb[0].mxu1  ;;  %v972_v38 = vpop.f32.mrb[1].mxu0 }
  0xfd   : > { %v973_v39 = vadd.f32 %v972_v38, %v971_v36  ;;  %v994_v40 = vpop.f32.mrb[1].mxu1  ;;  %v974_v41 = vpop.f32.mrb[2].mxu0 }
  0xfe   : > { %v995_v42 = vadd.f32 %v994_v40, %v993_v37  ;;  %v996_v43 = vpop.f32.mrb[2].mxu1  ;;  %v975_v44 = vpop.f32.mrb[3].mxu0 }
  0xff   : > { %v976_v45 = vadd.f32 %v975_v44, %v974_v41  ;;  %v997_v46 = vpop.f32.mrb[3].mxu1 }
 0x100   : > { %v670_v47 = vadd.f32 %v995_v42, %v973_v39  ;;  %v998_v48 = vadd.f32 %v997_v46, %v996_v43 }
 0x102   : > { %681 = vst.msk [vmem:[#allocation2] sm:$0xff] %vm680_vm0, %v670_v47  ;;  %v673_v49 = vadd.f32 %v998_v48, %v976_v45 }
 0x104   : > { %682 = vst.msk [vmem:[#allocation2 + $0x8] sm:$0xff] %vm680_vm0, %v673_v49 }
 0x109   : > { %v697_v51 = vld [vmem:[#allocation2] sm:$0xff] }
 0x10a   : > { %v706_v52 = vadd.f32 %v947_v50, %v697_v51 }
 0x10b   : > { %v698_v53 = vld [vmem:[#allocation2 + $0x8] sm:$0xff] }
 0x10c   : > { %v953_v54 = vpack.c.bf16 %v706_v52, %v706_v52  ;;  %v731_v55 = vmul.f32 %v706_v52, %v706_v52  ;;  %v707_v56 = vadd.f32 %v947_v50, %v698_v53  ;;  %v720_v57 = vsel %vm680_vm0, %v706_v52, 0.0 }
 0x10e   : > { %717 = vst.msk [vmem:[%s304_s28] sm:$0xf] %vm716_vm1, %v953_v54  ;;  %v954_v58 = vpack.c.bf16 %v707_v56, %v707_v56  ;;  %v721_v59 = vsel %vm680_vm0, %v707_v56, 0.0  ;;  %v732_v60 = vmul.f32 %v707_v56, %v707_v56  ;;  %v733_v62 = vsel %vm680_vm0, %v731_v55, 0.0 }
 0x10f   : > { %v722_v61 = vadd.f32 %v721_v59, %v720_v57 }
 0x110   : > { %718 = vst.msk [vmem:[%s304_s28 + $0x4] sm:$0xf] %vm716_vm1, %v954_v58  ;;  %v734_v63 = vsel %vm680_vm0, %v732_v60, 0.0 }
 0x111   : > { %v723_v0 = vrot.slane %v722_v61, 4  ;;  %v735_v1 = vadd.f32 %v734_v63, %v733_v62 }
 0x113   : > { %v724_v2 = vadd.f32 %v723_v0, %v722_v61  ;;  %v736_v3 = vrot.slane %v735_v1, 4 }
 0x115   : > { %v725_v4 = vrot.slane %v724_v2, 2  ;;  %v737_v5 = vadd.f32 %v736_v3, %v735_v1 }
 0x117   : > { %v726_v6 = vadd.f32 %v725_v4, %v724_v2  ;;  %v738_v7 = vrot.slane %v737_v5, 2 }
 0x119   : > { %v727_v8 = vrot.slane %v726_v6, 1  ;;  %v739_v9 = vadd.f32 %v738_v7, %v737_v5 }
 0x11b   : > { %v728_v10 = vadd.f32 %v727_v8, %v726_v6  ;;  %v740_v11 = vrot.slane %v739_v9, 1 }
 0x11d   : > { %730 = vst.msk [vmem:[%s312_s6] sm:$0x1] %vm729_vm2, %v728_v10  ;;  %v741_v12 = vadd.f32 %v740_v11, %v739_v9 }
 0x11f   : > { %742 = vst.msk [vmem:[%s312_s6 + $0x1] sm:$0x1] %vm729_vm2, %v741_v12 }
 0x120 PF: > { %s15_s17 = sadd.s32 1, %s1083_s17   ;;  %s1265_s15 = smov %s1079_s16 }
 0x121   : > { %p12_p6 = scmp.ge.s32.totalorder %s15_s17, 4   ;;  %s1266_s16 = smov %s1268_s18 }
 0x123   :  { %14 = sbr.rel (!%p12_p6) target bundleno = 2 (0x2), region = 92 }

</bundles_post_ra>
